<compile_context>
chip_gen: v7x
topology: tpu7x:2x2x1
jax: 0.10.0
libtpu: 0.0.40
codegen_flags: <defaults>
</compile_context>

<pallas_src>
import numpy as np
import jax
import jax.numpy as jnp
from jax import lax
from jax.experimental import pallas as pl
from jax.experimental.pallas import tpu as pltpu

N_WORD = 16
N_H = 32
N_DEPTH = 2
MAX_TOK_NUM = 400  # the module hardcodes self.max_tok_num = 400


# ---------------------------------------------------------------------------
# Kernel 1: fused X @ W + b (used for all hoisted input projections).
# ---------------------------------------------------------------------------
def _matmul_bias_kernel(x_ref, w_ref, b_ref, o_ref):
    o_ref[...] = (jnp.dot(x_ref[...], w_ref[...],
                          preferred_element_type=jnp.float32) + b_ref[...])


def matmul_bias(x, w, b):
    M = x.shape[0]
    N = w.shape[1]
    return pl.pallas_call(
        _matmul_bias_kernel,
        out_shape=jax.ShapeDtypeStruct((M, N), jnp.float32),
    )(x, w, b)


# ---------------------------------------------------------------------------
# Kernel 2: fused bidirectional LSTM recurrence for one encoder layer.
# xproj: (T, B, 8*He)  -- precomputed x @ [W_ih_fwd | W_ih_bwd] + (b_ih+b_hh)
# mask : (T, B, 1)     -- 1.0 where t < length[b]   (packed-sequence semantics)
# Outputs: per-direction hidden sequences (zero past length) and final h/c.
# Gate order within a direction: (i, f, o | g)  (3H sigmoid block, then H tanh).
# ---------------------------------------------------------------------------
def _bilstm_scan_kernel(xproj_ref, mask_ref, whh_f_ref, whh_b_ref,
                        out_f_ref, out_b_ref, hf_ref, cf_ref, hb_ref, cb_ref):
    T, B, G2 = xproj_ref.shape
    G = G2 // 2           # 4*He
    H = G // 4            # He
    whh_f = whh_f_ref[...]
    whh_b = whh_b_ref[...]

    def cell(xp, h, c, whh):
        gates = xp + jnp.dot(h, whh, preferred_element_type=jnp.float32)
        sig = jax.nn.sigmoid(gates[:, :3 * H])
        g = jnp.tanh(gates[:, 3 * H:])
        c_new = sig[:, H:2 * H] * c + sig[:, 0:H] * g
        h_new = sig[:, 2 * H:3 * H] * jnp.tanh(c_new)
        return h_new, c_new

    def step(i, carry):
        hf, cf, hb, cb = carry
        tf = i
        tb = T - 1 - i
        xp_f = xproj_ref[tf]                      # (B, 8*He)
        xp_b = xproj_ref[tb]
        hf_new, cf_new = cell(xp_f[:, :G], hf, cf, whh_f)
        hb_new, cb_new = cell(xp_b[:, G:], hb, cb, whh_b)
        mf = mask_ref[tf]                         # (B, 1)
        mb = mask_ref[tb]
        hf = mf * hf_new + (1.0 - mf) * hf
        cf = mf * cf_new + (1.0 - mf) * cf
        hb = mb * hb_new + (1.0 - mb) * hb
        cb = mb * cb_new + (1.0 - mb) * cb
        out_f_ref[tf] = mf * hf_new               # pad_packed zero fill
        out_b_ref[tb] = mb * hb_new
        return hf, cf, hb, cb

    z = jnp.zeros(hf_ref.shape, jnp.float32)
    hf, cf, hb, cb = lax.fori_loop(0, T, step, (z, z, z, z), unroll=True)
    hf_ref[...] = hf
    cf_ref[...] = cf
    hb_ref[...] = hb
    cb_ref[...] = cb


def bilstm_layer(x_tm, mask_tm, p):
    """One bidirectional encoder layer. x_tm: (T, B, in) time-major."""
    T, B, _ = x_tm.shape
    He = p["whh_f"].shape[0]
    # Hoisted, fwd/bwd-fused input projection: one (T*B, in) @ (in, 8*He) matmul.
    xproj = matmul_bias(x_tm.reshape(T * B, -1), p["wih_cat"], p["b_cat"])
    xproj = xproj.reshape(T, B, 8 * He)
    out_f, out_b, hf, cf, hb, cb = pl.pallas_call(
        _bilstm_scan_kernel,
        out_shape=(jax.ShapeDtypeStruct((T, B, He), jnp.float32),
                   jax.ShapeDtypeStruct((T, B, He), jnp.float32),
                   jax.ShapeDtypeStruct((B, He), jnp.float32),
                   jax.ShapeDtypeStruct((B, He), jnp.float32),
                   jax.ShapeDtypeStruct((B, He), jnp.float32),
                   jax.ShapeDtypeStruct((B, He), jnp.float32)),
    )(xproj, mask_tm, p["whh_f"], p["whh_b"])
    out = jnp.concatenate([out_f, out_b], axis=-1)   # (T, B, 2*He)
    return out, hf, cf, hb, cb


# ---------------------------------------------------------------------------
# Kernel 3: fused unidirectional LSTM recurrence (decoder layers).
# xproj: (T, B, 4*H) precomputed input projection (+ combined bias), mask (T,B,1).
# ---------------------------------------------------------------------------
def _lstm_scan_kernel(xproj_ref, mask_ref, whh_ref, h0_ref, c0_ref,
                      out_ref, hT_ref, cT_ref):
    T = xproj_ref.shape[0]
    H = whh_ref.shape[0]
    whh = whh_ref[...]

    def step(t, carry):
        h, c = carry
        gates = xproj_ref[t] + jnp.dot(h, whh, preferred_element_type=jnp.float32)
        sig = jax.nn.sigmoid(gates[:, :3 * H])
        g = jnp.tanh(gates[:, 3 * H:])
        c_new = sig[:, H:2 * H] * c + sig[:, 0:H] * g
        h_new = sig[:, 2 * H:3 * H] * jnp.tanh(c_new)
        m = mask_ref[t]                            # (B, 1)
        h = m * h_new + (1.0 - m) * h
        c = m * c_new + (1.0 - m) * c
        out_ref[t] = m * h_new
        return h, c

    h, c = lax.fori_loop(0, T, step, (h0_ref[...], c0_ref[...]), unroll=True)
    hT_ref[...] = h
    cT_ref[...] = c


def lstm_layer_uni(xproj_tm, mask_tm, whh, h0, c0):
    T, B, _ = xproj_tm.shape
    H = whh.shape[0]
    out, hT, cT = pl.pallas_call(
        _lstm_scan_kernel,
        out_shape=(jax.ShapeDtypeStruct((T, B, H), jnp.float32),
                   jax.ShapeDtypeStruct((B, H), jnp.float32),
                   jax.ShapeDtypeStruct((B, H), jnp.float32)),
    )(xproj_tm, mask_tm, whh, h0, c0)
    return out, hT, cT


# ---------------------------------------------------------------------------
# Kernel 4: fused pointer-network scores + length masking (whole batch, 1 call).
# cond_score[b,tg,tx] = w_out . tanh(W_h h_enc[b,tx] + b_h + W_g g_s[b,tg] + b_g) + b_out
# then cond_score[b, :, x_len[b]:] = -100
# ---------------------------------------------------------------------------
def _cond_score_kernel(henc_ref, gs_ref, wh_ref, bh_ref, wg_ref, bg_ref,
                       wout_ref, xlen_ref, bout_ref, out_ref):
    B, Tg, Tx = out_ref.shape
    # Hoisted full-batch projections.
    hh = jnp.dot(henc_ref[...], wh_ref[...],
                 preferred_element_type=jnp.float32) + bh_ref[...]   # (B*Tx, Nh)
    gg = jnp.dot(gs_ref[...], wg_ref[...],
                 preferred_element_type=jnp.float32) + bg_ref[...]   # (B*Tg, Nh)
    wout = wout_ref[...]                                             # (1, 1, Nh)
    bout = bout_ref[0]
    for b in range(B):                                               # static unroll
        hh_b = hh[b * Tx:(b + 1) * Tx]                               # (Tx, Nh)
        gg_b = gg[b * Tg:(b + 1) * Tg]                               # (Tg, Nh)
        s = jnp.tanh(hh_b[None, :, :] + gg_b[:, None, :])            # (Tg, Tx, Nh)
        score = jnp.sum(s * wout, axis=-1) + bout                    # (Tg, Tx)
        tx_ids = lax.broadcasted_iota(jnp.int32, score.shape, 1)
        score = jnp.where(tx_ids < xlen_ref[b], score, -100.0)
        out_ref[b] = score


def cond_score_call(h_enc_flat, g_s_flat, x_len, out_p, B, Tx, Tg):
    vmem = pl.BlockSpec(memory_space=pltpu.MemorySpace.VMEM)
    smem = pl.BlockSpec(memory_space=pltpu.MemorySpace.SMEM)
    return pl.pallas_call(
        _cond_score_kernel,
        out_shape=jax.ShapeDtypeStruct((B, Tg, Tx), jnp.float32),
        in_specs=[vmem, vmem, vmem, vmem, vmem, vmem, vmem, smem, smem],
        out_specs=vmem,
    )(h_enc_flat, g_s_flat, out_p["wh"], out_p["bh"], out_p["wg"], out_p["bg"],
      out_p["wout"], x_len, out_p["bout"])


# ---------------------------------------------------------------------------
# Parameters, gen_gt_batch, full forward (teacher-forcing path).
# ---------------------------------------------------------------------------
def init_params(key):
    def dense(k, shape, scale=0.1):
        return scale * jax.random.normal(k, shape, dtype=jnp.float32)

    keys = iter(jax.random.split(key, 64))
    He = N_H // 2
    enc = []
    for l in range(N_DEPTH):
        in_size = N_WORD if l == 0 else N_H
        enc.append({
            # columns: [fwd gates | bwd gates]; gate order (i, f, o, g); bias = b_ih + b_hh
            "wih_cat": dense(next(keys), (in_size, 8 * He)),
            "b_cat":   dense(next(keys), (1, 8 * He)),
            "whh_f":   dense(next(keys), (He, 4 * He)),
            "whh_b":   dense(next(keys), (He, 4 * He)),
        })
    dec = []
    for l in range(N_DEPTH):
        in_size = MAX_TOK_NUM if l == 0 else N_H
        dec.append({
            "wih": dense(next(keys), (in_size, 4 * N_H)),
            "b":   dense(next(keys), (1, 4 * N_H)),
            "whh": dense(next(keys), (N_H, 4 * N_H)),
        })
    out = {
        "wh": dense(next(keys), (N_H, N_H)),
        "bh": dense(next(keys), (1, N_H)),
        "wg": dense(next(keys), (N_H, N_H)),
        "bg": dense(next(keys), (1, N_H)),
        "wout": dense(next(keys), (1, 1, N_H)),
        "bout": dense(next(keys), (1,)),
    }
    return {"enc": enc, "dec": dec, "out": out}


def gen_gt_batch(tok_seq):
    """Token IDS (not one-hot): decoder layer-0 does an embedding-row gather instead
    of a K=400 one-hot matmul; numerically identical."""
    B = len(tok_seq)
    ret_len = np.array([len(s) - 1 for s in tok_seq], dtype=np.int32)
    max_len = int(ret_len.max())
    ids = np.zeros((B, max_len), dtype=np.int32)
    for b, s in enumerate(tok_seq):
        for t, tok in enumerate(s[:-1]):          # gen_inp=True -> drop last token
            ids[b, t] = tok
    return jnp.asarray(ids), jnp.asarray(ret_len)


def _time_mask(lengths, T):
    t_ids = jnp.arange(T, dtype=jnp.int32)[:, None]              # (T, 1)
    return (t_ids < lengths[None, :].astype(jnp.int32)).astype(jnp.float32)[:, :, None]


@jax.jit
def _forward_core(params, x_emb, x_len, gt_tok_ids, gt_tok_len):
    B, Tx, _ = x_emb.shape
    Tg = gt_tok_ids.shape[1]

    # --- cond_lstm: bidirectional encoder (2 layers), time-major ---
    enc_mask = _time_mask(x_len, Tx)                              # (Tx, B, 1)
    inp = jnp.transpose(x_emb, (1, 0, 2))                         # (Tx, B, N_word)
    h_f, c_f, h_b, c_b = [], [], [], []
    for l in range(N_DEPTH):
        inp, hf, cf, hb, cb = bilstm_layer(inp, enc_mask, params["enc"][l])
        h_f.append(hf); c_f.append(cf); h_b.append(hb); c_b.append(cb)
    h_enc_tm = inp                                                # (Tx, B, N_h)

    # decoder_hidden = tuple(cat((hid[:2], hid[2:]), dim=2)) with PyTorch's
    # (l0_fwd, l0_bwd, l1_fwd, l1_bwd) hidden ordering.
    dec_h0 = [jnp.concatenate([h_f[0], h_f[1]], axis=-1),
              jnp.concatenate([h_b[0], h_b[1]], axis=-1)]
    dec_c0 = [jnp.concatenate([c_f[0], c_f[1]], axis=-1),
              jnp.concatenate([c_b[0], c_b[1]], axis=-1)]

    # --- cond_decoder: unidirectional, 2 layers ---
    dec_mask = _time_mask(gt_tok_len, Tg)                         # (Tg, B, 1)
    d0 = params["dec"][0]
    # one-hot @ W_ih replaced by an embedding-row gather (exact same result)
    xproj0 = jnp.take(d0["wih"], gt_tok_ids, axis=0) + d0["b"]    # (B, Tg, 4*N_h)
    xproj0 = jnp.transpose(xproj0, (1, 0, 2))                     # (Tg, B, 4*N_h)
    out0, _, _ = lstm_layer_uni(xproj0, dec_mask, d0["whh"], dec_h0[0], dec_c0[0])

    d1 = params["dec"][1]
    xproj1 = matmul_bias(out0.reshape(Tg * B, N_H), d1["wih"], d1["b"])
    xproj1 = xproj1.reshape(Tg, B, 4 * N_H)
    g_s_tm, _, _ = lstm_layer_uni(xproj1, dec_mask, d1["whh"], dec_h0[1], dec_c0[1])

    # --- fused pointer scores + masking (whole batch, single call) ---
    h_enc_flat = jnp.transpose(h_enc_tm, (1, 0, 2)).reshape(B * Tx, N_H)
    g_s_flat = jnp.transpose(g_s_tm, (1, 0, 2)).reshape(B * Tg, N_H)
    return cond_score_call(h_enc_flat, g_s_flat, x_len.astype(jnp.int32),
                           params["out"], B, Tx, Tg)


def seq2sql_cond_forward(params, x_emb, x_len, gt_where):
    # teacher-forcing path (gt_where provided); eval-mode semantics (dropout inactive).
    gt_tok_ids, gt_tok_len = gen_gt_batch(gt_where)
    return _forward_core(params, x_emb, x_len.astype(jnp.int32), gt_tok_ids, gt_tok_len)
    # TODO(synk): the gt_where=None greedy/multinomial decoding loop (python done_set,
    # host-side argmax feedback) is dynamic host control flow and is not a Pallas kernel.


if __name__ == "__main__":
    key = jax.random.PRNGKey(0)
    k_param, k_x = jax.random.split(key)
    params = init_params(k_param)

    B, Tx = 2, 8
    x_emb = jax.random.normal(k_x, (B, Tx, N_WORD), dtype=jnp.float32)
    x_len = jnp.array([8, 6], dtype=jnp.int32)
    # where-clause token id sequences (length 5 -> Tg = 4 decoder inputs each)
    gt_where = [[12, 3, 7, 9, 15], [12, 5, 2, 8, 15]]

    cond_score = seq2sql_cond_forward(params, x_emb, x_len, gt_where)
    cond_score = jax.block_until_ready(cond_score)
    assert cond_score.shape == (B, 4, Tx), cond_score.shape
    # masked positions (beyond x_len) must be exactly -100
    assert bool(jnp.all(cond_score[1, :, 6:] == -100.0))
    assert bool(jnp.all(jnp.isfinite(cond_score)))
    print("KERNEL_OK")
</pallas_src>

<mosaic_0001>
module attributes {stable_mosaic.version = 11 : i64} {
  func.func @_matmul_bias_kernel(%arg0: memref<16x16xf32, #tpu.memory_space<vmem>>, %arg1: memref<16x128xf32, #tpu.memory_space<vmem>>, %arg2: memref<1x128xf32, #tpu.memory_space<vmem>>, %arg3: memref<16x128xf32, #tpu.memory_space<vmem>>) attributes {dimension_semantics = [], scalar_prefetch = 0 : i64, scratch_operands = 0 : i64, tpu.core_type = #tpu.core_type<tc>} {
    %c0 = arith.constant 0 : index
    %c0_0 = arith.constant 0 : index
    %0 = vector.load %arg0[%c0, %c0_0] : memref<16x16xf32, #tpu.memory_space<vmem>>, vector<16x16xf32>
    %c0_1 = arith.constant 0 : index
    %c0_2 = arith.constant 0 : index
    %1 = vector.load %arg1[%c0_1, %c0_2] : memref<16x128xf32, #tpu.memory_space<vmem>>, vector<16x128xf32>
    %cst = arith.constant dense<0.000000e+00> : vector<16x128xf32>
    %2 = tpu.matmul %0, %1, %cst {dimension_numbers = #tpu.dot_dimension_numbers<[1], [0], [0], [1], [0, 0, 1, 1], [], []>} : vector<16x16xf32>, vector<16x128xf32>, vector<16x128xf32> -> vector<16x128xf32>
    %c0_3 = arith.constant 0 : index
    %c0_4 = arith.constant 0 : index
    %3 = vector.load %arg2[%c0_3, %c0_4] : memref<1x128xf32, #tpu.memory_space<vmem>>, vector<1x128xf32>
    %4 = vector.broadcast %3 : vector<1x128xf32> to vector<16x128xf32>
    %5 = arith.addf %2, %4 : vector<16x128xf32>
    %c0_5 = arith.constant 0 : index
    %c0_6 = arith.constant 0 : index
    %6 = vector.load %arg3[%c0_5, %c0_6] : memref<16x128xf32, #tpu.memory_space<vmem>>, vector<16x128xf32>
    tpu.vector_store %arg3[%c0_5, %c0_6], %5 {strides = array<i32>} : memref<16x128xf32, #tpu.memory_space<vmem>>, vector<16x128xf32>,
    return
  }
}

module attributes {stable_mosaic.version = 11 : i64} {
  func.func @_bilstm_scan_kernel(%arg0: memref<8x2x128xf32, #tpu.memory_space<vmem>>, %arg1: memref<8x2x1xf32, #tpu.memory_space<vmem>>, %arg2: memref<16x64xf32, #tpu.memory_space<vmem>>, %arg3: memref<16x64xf32, #tpu.memory_space<vmem>>, %arg4: memref<8x2x16xf32, #tpu.memory_space<vmem>>, %arg5: memref<8x2x16xf32, #tpu.memory_space<vmem>>, %arg6: memref<2x16xf32, #tpu.memory_space<vmem>>, %arg7: memref<2x16xf32, #tpu.memory_space<vmem>>, %arg8: memref<2x16xf32, #tpu.memory_space<vmem>>, %arg9: memref<2x16xf32, #tpu.memory_space<vmem>>) attributes {dimension_semantics = [], scalar_prefetch = 0 : i64, scratch_operands = 0 : i64, tpu.core_type = #tpu.core_type<tc>} {
    %c0 = arith.constant 0 : index
    %c0_0 = arith.constant 0 : index
    %0 = vector.load %arg2[%c0, %c0_0] : memref<16x64xf32, #tpu.memory_space<vmem>>, vector<16x64xf32>
    %c0_1 = arith.constant 0 : index
    %c0_2 = arith.constant 0 : index
    %1 = vector.load %arg3[%c0_1, %c0_2] : memref<16x64xf32, #tpu.memory_space<vmem>>, vector<16x64xf32>
    %cst = arith.constant 0.000000e+00 : f32
    %2 = vector.broadcast %cst : f32 to vector<2x16xf32>
    %c0_i32 = arith.constant 0 : i32
    %c7_i32 = arith.constant 7 : i32
    %3 = arith.subi %c7_i32, %c0_i32 : i32
    %4 = arith.index_cast %c0_i32 : i32 to index
    %c0_3 = arith.constant 0 : index
    %c0_4 = arith.constant 0 : index
    %5 = vector.load %arg0[%4, %c0_3, %c0_4] : memref<8x2x128xf32, #tpu.memory_space<vmem>>, vector<1x2x128xf32>
    %6 = vector.shape_cast %5 : vector<1x2x128xf32> to vector<2x128xf32>
    %7 = arith.index_cast %3 : i32 to index
    %c0_5 = arith.constant 0 : index
    %c0_6 = arith.constant 0 : index
    %8 = vector.load %arg0[%7, %c0_5, %c0_6] : memref<8x2x128xf32, #tpu.memory_space<vmem>>, vector<1x2x128xf32>
    %9 = vector.shape_cast %8 : vector<1x2x128xf32> to vector<2x128xf32>
    %10 = vector.extract_strided_slice %6 {offsets = [0, 0], sizes = [2, 64], strides = [1, 1]} : vector<2x128xf32> to vector<2x64xf32>
    %cst_7 = arith.constant dense<0.000000e+00> : vector<2x64xf32>
    %11 = tpu.matmul %2, %0, %cst_7 {dimension_numbers = #tpu.dot_dimension_numbers<[1], [0], [0], [1], [0, 0, 1, 1], [], []>} : vector<2x16xf32>, vector<16x64xf32>, vector<2x64xf32> -> vector<2x64xf32>
    %12 = arith.addf %10, %11 : vector<2x64xf32>
    %13 = vector.extract_strided_slice %12 {offsets = [0, 0], sizes = [2, 48], strides = [1, 1]} : vector<2x64xf32> to vector<2x48xf32>
    %14 = arith.negf %13 : vector<2x48xf32>
    %15 = math.exp %14 : vector<2x48xf32>
    %cst_8 = arith.constant 1.000000e+00 : f32
    %16 = vector.broadcast %cst_8 : f32 to vector<2x48xf32>
    %17 = arith.addf %16, %15 : vector<2x48xf32>
    %18 = arith.divf %16, %17 : vector<2x48xf32>
    %19 = vector.extract_strided_slice %12 {offsets = [0, 48], sizes = [2, 16], strides = [1, 1]} : vector<2x64xf32> to vector<2x16xf32>
    %20 = math.tanh %19 : vector<2x16xf32>
    %21 = vector.extract_strided_slice %18 {offsets = [0, 16], sizes = [2, 16], strides = [1, 1]} : vector<2x48xf32> to vector<2x16xf32>
    %22 = arith.mulf %21, %2 : vector<2x16xf32>
    %23 = vector.extract_strided_slice %18 {offsets = [0, 0], sizes = [2, 16], strides = [1, 1]} : vector<2x48xf32> to vector<2x16xf32>
    %24 = arith.mulf %23, %20 : vector<2x16xf32>
    %25 = arith.addf %22, %24 : vector<2x16xf32>
    %26 = vector.extract_strided_slice %18 {offsets = [0, 32], sizes = [2, 16], strides = [1, 1]} : vector<2x48xf32> to vector<2x16xf32>
    %27 = math.tanh %25 : vector<2x16xf32>
    %28 = arith.mulf %26, %27 : vector<2x16xf32>
    %29 = vector.extract_strided_slice %9 {offsets = [0, 64], sizes = [2, 64], strides = [1, 1]} : vector<2x128xf32> to vector<2x64xf32>
    %cst_9 = arith.constant dense<0.000000e+00> : vector<2x64xf32>
    %30 = tpu.matmul %2, %1, %cst_9 {dimension_numbers = #tpu.dot_dimension_numbers<[1], [0], [0], [1], [0, 0, 1, 1], [], []>} : vector<2x16xf32>, vector<16x64xf32>, vector<2x64xf32> -> vector<2x64xf32>
    %31 = arith.addf %29, %30 : vector<2x64xf32>
    %32 = vector.extract_strided_slice %31 {offsets = [0, 0], sizes = [2, 48], strides = [1, 1]} : vector<2x64xf32> to vector<2x48xf32>
    %33 = arith.negf %32 : vector<2x48xf32>
    %34 = math.exp %33 : vector<2x48xf32>
    %cst_10 = arith.constant 1.000000e+00 : f32
    %35 = vector.broadcast %cst_10 : f32 to vector<2x48xf32>
    %36 = arith.addf %35, %34 : vector<2x48xf32>
    %37 = arith.divf %35, %36 : vector<2x48xf32>
    %38 = vector.extract_strided_slice %31 {offsets = [0, 48], sizes = [2, 16], strides = [1, 1]} : vector<2x64xf32> to vector<2x16xf32>
    %39 = math.tanh %38 : vector<2x16xf32>
    %40 = vector.extract_strided_slice %37 {offsets = [0, 16], sizes = [2, 16], strides = [1, 1]} : vector<2x48xf32> to vector<2x16xf32>
    %41 = arith.mulf %40, %2 : vector<2x16xf32>
    %42 = vector.extract_strided_slice %37 {offsets = [0, 0], sizes = [2, 16], strides = [1, 1]} : vector<2x48xf32> to vector<2x16xf32>
    %43 = arith.mulf %42, %39 : vector<2x16xf32>
    %44 = arith.addf %41, %43 : vector<2x16xf32>
    %45 = vector.extract_strided_slice %37 {offsets = [0, 32], sizes = [2, 16], strides = [1, 1]} : vector<2x48xf32> to vector<2x16xf32>
    %46 = math.tanh %44 : vector<2x16xf32>
    %47 = arith.mulf %45, %46 : vector<2x16xf32>
    %48 = arith.index_cast %c0_i32 : i32 to index
    %c0_11 = arith.constant 0 : index
    %c0_12 = arith.constant 0 : index
    %49 = vector.load %arg1[%48, %c0_11, %c0_12] : memref<8x2x1xf32, #tpu.memory_space<vmem>>, vector<1x2x1xf32>
    %50 = vector.shape_cast %49 : vector<1x2x1xf32> to vector<2x1xf32>
    %51 = arith.index_cast %3 : i32 to index
    %c0_13 = arith.constant 0 : index
    %c0_14 = arith.constant 0 : index
    %52 = vector.load %arg1[%51, %c0_13, %c0_14] : memref<8x2x1xf32, #tpu.memory_space<vmem>>, vector<1x2x1xf32>
    %53 = vector.shape_cast %52 : vector<1x2x1xf32> to vector<2x1xf32>
    %54 = vector.broadcast %50 : vector<2x1xf32> to vector<2x16xf32>
    %55 = arith.mulf %54, %28 : vector<2x16xf32>
    %cst_15 = arith.constant 1.000000e+00 : f32
    %56 = vector.broadcast %cst_15 : f32 to vector<2x1xf32>
    %57 = arith.subf %56, %50 : vector<2x1xf32>
    %58 = vector.broadcast %57 : vector<2x1xf32> to vector<2x16xf32>
    %59 = arith.mulf %58, %2 : vector<2x16xf32>
    %60 = arith.addf %55, %59 : vector<2x16xf32>
    %61 = vector.broadcast %50 : vector<2x1xf32> to vector<2x16xf32>
    %62 = arith.mulf %61, %25 : vector<2x16xf32>
    %cst_16 = arith.constant 1.000000e+00 : f32
    %63 = vector.broadcast %cst_16 : f32 to vector<2x1xf32>
    %64 = arith.subf %63, %50 : vector<2x1xf32>
    %65 = vector.broadcast %64 : vector<2x1xf32> to vector<2x16xf32>
    %66 = arith.mulf %65, %2 : vector<2x16xf32>
    %67 = arith.addf %62, %66 : vector<2x16xf32>
    %68 = vector.broadcast %53 : vector<2x1xf32> to vector<2x16xf32>
    %69 = arith.mulf %68, %47 : vector<2x16xf32>
    %cst_17 = arith.constant 1.000000e+00 : f32
    %70 = vector.broadcast %cst_17 : f32 to vector<2x1xf32>
    %71 = arith.subf %70, %53 : vector<2x1xf32>
    %72 = vector.broadcast %71 : vector<2x1xf32> to vector<2x16xf32>
    %73 = arith.mulf %72, %2 : vector<2x16xf32>
    %74 = arith.addf %69, %73 : vector<2x16xf32>
    %75 = vector.broadcast %53 : vector<2x1xf32> to vector<2x16xf32>
    %76 = arith.mulf %75, %44 : vector<2x16xf32>
    %cst_18 = arith.constant 1.000000e+00 : f32
    %77 = vector.broadcast %cst_18 : f32 to vector<2x1xf32>
    %78 = arith.subf %77, %53 : vector<2x1xf32>
    %79 = vector.broadcast %78 : vector<2x1xf32> to vector<2x16xf32>
    %80 = arith.mulf %79, %2 : vector<2x16xf32>
    %81 = arith.addf %76, %80 : vector<2x16xf32>
    %82 = vector.broadcast %50 : vector<2x1xf32> to vector<2x16xf32>
    %83 = arith.mulf %82, %28 : vector<2x16xf32>
    %84 = arith.index_cast %c0_i32 : i32 to index
    %c0_19 = arith.constant 0 : index
    %c0_20 = arith.constant 0 : index
    %85 = vector.load %arg4[%84, %c0_19, %c0_20] : memref<8x2x16xf32, #tpu.memory_space<vmem>>, vector<1x2x16xf32>
    %86 = vector.shape_cast %85 : vector<1x2x16xf32> to vector<2x16xf32>
    %87 = vector.shape_cast %83 : vector<2x16xf32> to vector<1x2x16xf32>
    tpu.vector_store %arg4[%84, %c0_19, %c0_20], %87 {strides = array<i32>} : memref<8x2x16xf32, #tpu.memory_space<vmem>>, vector<1x2x16xf32>,
    %88 = vector.broadcast %53 : vector<2x1xf32> to vector<2x16xf32>
    %89 = arith.mulf %88, %47 : vector<2x16xf32>
    %90 = arith.index_cast %3 : i32 to index
    %c0_21 = arith.constant 0 : index
    %c0_22 = arith.constant 0 : index
    %91 = vector.load %arg5[%90, %c0_21, %c0_22] : memref<8x2x16xf32, #tpu.memory_space<vmem>>, vector<1x2x16xf32>
    %92 = vector.shape_cast %91 : vector<1x2x16xf32> to vector<2x16xf32>
    %93 = vector.shape_cast %89 : vector<2x16xf32> to vector<1x2x16xf32>
    tpu.vector_store %arg5[%90, %c0_21, %c0_22], %93 {strides = array<i32>} : memref<8x2x16xf32, #tpu.memory_space<vmem>>, vector<1x2x16xf32>,
    %c1_i32 = arith.constant 1 : i32
    %c7_i32_23 = arith.constant 7 : i32
    %94 = arith.subi %c7_i32_23, %c1_i32 : i32
    %95 = arith.index_cast %c1_i32 : i32 to index
    %c0_24 = arith.constant 0 : index
    %c0_25 = arith.constant 0 : index
    %96 = vector.load %arg0[%95, %c0_24, %c0_25] : memref<8x2x128xf32, #tpu.memory_space<vmem>>, vector<1x2x128xf32>
    %97 = vector.shape_cast %96 : vector<1x2x128xf32> to vector<2x128xf32>
    %98 = arith.index_cast %94 : i32 to index
    %c0_26 = arith.constant 0 : index
    %c0_27 = arith.constant 0 : index
    %99 = vector.load %arg0[%98, %c0_26, %c0_27] : memref<8x2x128xf32, #tpu.memory_space<vmem>>, vector<1x2x128xf32>
    %100 = vector.shape_cast %99 : vector<1x2x128xf32> to vector<2x128xf32>
    %101 = vector.extract_strided_slice %97 {offsets = [0, 0], sizes = [2, 64], strides = [1, 1]} : vector<2x128xf32> to vector<2x64xf32>
    %cst_28 = arith.constant dense<0.000000e+00> : vector<2x64xf32>
    %102 = tpu.matmul %60, %0, %cst_28 {dimension_numbers = #tpu.dot_dimension_numbers<[1], [0], [0], [1], [0, 0, 1, 1], [], []>} : vector<2x16xf32>, vector<16x64xf32>, vector<2x64xf32> -> vector<2x64xf32>
    %103 = arith.addf %101, %102 : vector<2x64xf32>
    %104 = vector.extract_strided_slice %103 {offsets = [0, 0], sizes = [2, 48], strides = [1, 1]} : vector<2x64xf32> to vector<2x48xf32>
    %105 = arith.negf %104 : vector<2x48xf32>
    %106 = math.exp %105 : vector<2x48xf32>
    %cst_29 = arith.constant 1.000000e+00 : f32
    %107 = vector.broadcast %cst_29 : f32 to vector<2x48xf32>
    %108 = arith.addf %107, %106 : vector<2x48xf32>
    %109 = arith.divf %107, %108 : vector<2x48xf32>
    %110 = vector.extract_strided_slice %103 {offsets = [0, 48], sizes = [2, 16], strides = [1, 1]} : vector<2x64xf32> to vector<2x16xf32>
    %111 = math.tanh %110 : vector<2x16xf32>
    %112 = vector.extract_strided_slice %109 {offsets = [0, 16], sizes = [2, 16], strides = [1, 1]} : vector<2x48xf32> to vector<2x16xf32>
    %113 = arith.mulf %112, %67 : vector<2x16xf32>
    %114 = vector.extract_strided_slice %109 {offsets = [0, 0], sizes = [2, 16], strides = [1, 1]} : vector<2x48xf32> to vector<2x16xf32>
    %115 = arith.mulf %114, %111 : vector<2x16xf32>
    %116 = arith.addf %113, %115 : vector<2x16xf32>
    %117 = vector.extract_strided_slice %109 {offsets = [0, 32], sizes = [2, 16], strides = [1, 1]} : vector<2x48xf32> to vector<2x16xf32>
    %118 = math.tanh %116 : vector<2x16xf32>
    %119 = arith.mulf %117, %118 : vector<2x16xf32>
    %120 = vector.extract_strided_slice %100 {offsets = [0, 64], sizes = [2, 64], strides = [1, 1]} : vector<2x128xf32> to vector<2x64xf32>
    %cst_30 = arith.constant dense<0.000000e+00> : vector<2x64xf32>
    %121 = tpu.matmul %74, %1, %cst_30 {dimension_numbers = #tpu.dot_dimension_numbers<[1], [0], [0], [1], [0, 0, 1, 1], [], []>} : vector<2x16xf32>, vector<16x64xf32>, vector<2x64xf32> -> vector<2x64xf32>
    %122 = arith.addf %120, %121 : vector<2x64xf32>
    %123 = vector.extract_strided_slice %122 {offsets = [0, 0], sizes = [2, 48], strides = [1, 1]} : vector<2x64xf32> to vector<2x48xf32>
    %124 = arith.negf %123 : vector<2x48xf32>
    %125 = math.exp %124 : vector<2x48xf32>
    %cst_31 = arith.constant 1.000000e+00 : f32
    %126 = vector.broadcast %cst_31 : f32 to vector<2x48xf32>
    %127 = arith.addf %126, %125 : vector<2x48xf32>
    %128 = arith.divf %126, %127 : vector<2x48xf32>
    %129 = vector.extract_strided_slice %122 {offsets = [0, 48], sizes = [2, 16], strides = [1, 1]} : vector<2x64xf32> to vector<2x16xf32>
    %130 = math.tanh %129 : vector<2x16xf32>
    %131 = vector.extract_strided_slice %128 {offsets = [0, 16], sizes = [2, 16], strides = [1, 1]} : vector<2x48xf32> to vector<2x16xf32>
    %132 = arith.mulf %131, %81 : vector<2x16xf32>
    %133 = vector.extract_strided_slice %128 {offsets = [0, 0], sizes = [2, 16], strides = [1, 1]} : vector<2x48xf32> to vector<2x16xf32>
    %134 = arith.mulf %133, %130 : vector<2x16xf32>
    %135 = arith.addf %132, %134 : vector<2x16xf32>
    %136 = vector.extract_strided_slice %128 {offsets = [0, 32], sizes = [2, 16], strides = [1, 1]} : vector<2x48xf32> to vector<2x16xf32>
    %137 = math.tanh %135 : vector<2x16xf32>
    %138 = arith.mulf %136, %137 : vector<2x16xf32>
    %139 = arith.index_cast %c1_i32 : i32 to index
    %c0_32 = arith.constant 0 : index
    %c0_33 = arith.constant 0 : index
    %140 = vector.load %arg1[%139, %c0_32, %c0_33] : memref<8x2x1xf32, #tpu.memory_space<vmem>>, vector<1x2x1xf32>
    %141 = vector.shape_cast %140 : vector<1x2x1xf32> to vector<2x1xf32>
    %142 = arith.index_cast %94 : i32 to index
    %c0_34 = arith.constant 0 : index
    %c0_35 = arith.constant 0 : index
    %143 = vector.load %arg1[%142, %c0_34, %c0_35] : memref<8x2x1xf32, #tpu.memory_space<vmem>>, vector<1x2x1xf32>
    %144 = vector.shape_cast %143 : vector<1x2x1xf32> to vector<2x1xf32>
    %145 = vector.broadcast %141 : vector<2x1xf32> to vector<2x16xf32>
    %146 = arith.mulf %145, %119 : vector<2x16xf32>
    %cst_36 = arith.constant 1.000000e+00 : f32
    %147 = vector.broadcast %cst_36 : f32 to vector<2x1xf32>
    %148 = arith.subf %147, %141 : vector<2x1xf32>
    %149 = vector.broadcast %148 : vector<2x1xf32> to vector<2x16xf32>
    %150 = arith.mulf %149, %60 : vector<2x16xf32>
    %151 = arith.addf %146, %150 : vector<2x16xf32>
    %152 = vector.broadcast %141 : vector<2x1xf32> to vector<2x16xf32>
    %153 = arith.mulf %152, %116 : vector<2x16xf32>
    %cst_37 = arith.constant 1.000000e+00 : f32
    %154 = vector.broadcast %cst_37 : f32 to vector<2x1xf32>
    %155 = arith.subf %154, %141 : vector<2x1xf32>
    %156 = vector.broadcast %155 : vector<2x1xf32> to vector<2x16xf32>
    %157 = arith.mulf %156, %67 : vector<2x16xf32>
    %158 = arith.addf %153, %157 : vector<2x16xf32>
    %159 = vector.broadcast %144 : vector<2x1xf32> to vector<2x16xf32>
    %160 = arith.mulf %159, %138 : vector<2x16xf32>
    %cst_38 = arith.constant 1.000000e+00 : f32
    %161 = vector.broadcast %cst_38 : f32 to vector<2x1xf32>
    %162 = arith.subf %161, %144 : vector<2x1xf32>
    %163 = vector.broadcast %162 : vector<2x1xf32> to vector<2x16xf32>
    %164 = arith.mulf %163, %74 : vector<2x16xf32>
    %165 = arith.addf %160, %164 : vector<2x16xf32>
    %166 = vector.broadcast %144 : vector<2x1xf32> to vector<2x16xf32>
    %167 = arith.mulf %166, %135 : vector<2x16xf32>
    %cst_39 = arith.constant 1.000000e+00 : f32
    %168 = vector.broadcast %cst_39 : f32 to vector<2x1xf32>
    %169 = arith.subf %168, %144 : vector<2x1xf32>
    %170 = vector.broadcast %169 : vector<2x1xf32> to vector<2x16xf32>
    %171 = arith.mulf %170, %81 : vector<2x16xf32>
    %172 = arith.addf %167, %171 : vector<2x16xf32>
    %173 = vector.broadcast %141 : vector<2x1xf32> to vector<2x16xf32>
    %174 = arith.mulf %173, %119 : vector<2x16xf32>
    %175 = arith.index_cast %c1_i32 : i32 to index
    %c0_40 = arith.constant 0 : index
    %c0_41 = arith.constant 0 : index
    %176 = vector.load %arg4[%175, %c0_40, %c0_41] : memref<8x2x16xf32, #tpu.memory_space<vmem>>, vector<1x2x16xf32>
    %177 = vector.shape_cast %176 : vector<1x2x16xf32> to vector<2x16xf32>
    %178 = vector.shape_cast %174 : vector<2x16xf32> to vector<1x2x16xf32>
    tpu.vector_store %arg4[%175, %c0_40, %c0_41], %178 {strides = array<i32>} : memref<8x2x16xf32, #tpu.memory_space<vmem>>, vector<1x2x16xf32>,
    %179 = vector.broadcast %144 : vector<2x1xf32> to vector<2x16xf32>
    %180 = arith.mulf %179, %138 : vector<2x16xf32>
    %181 = arith.index_cast %94 : i32 to index
    %c0_42 = arith.constant 0 : index
    %c0_43 = arith.constant 0 : index
    %182 = vector.load %arg5[%181, %c0_42, %c0_43] : memref<8x2x16xf32, #tpu.memory_space<vmem>>, vector<1x2x16xf32>
    %183 = vector.shape_cast %182 : vector<1x2x16xf32> to vector<2x16xf32>
    %184 = vector.shape_cast %180 : vector<2x16xf32> to vector<1x2x16xf32>
    tpu.vector_store %arg5[%181, %c0_42, %c0_43], %184 {strides = array<i32>} : memref<8x2x16xf32, #tpu.memory_space<vmem>>, vector<1x2x16xf32>,
    %c2_i32 = arith.constant 2 : i32
    %c7_i32_44 = arith.constant 7 : i32
    %185 = arith.subi %c7_i32_44, %c2_i32 : i32
    %186 = arith.index_cast %c2_i32 : i32 to index
    %c0_45 = arith.constant 0 : index
    %c0_46 = arith.constant 0 : index
    %187 = vector.load %arg0[%186, %c0_45, %c0_46] : memref<8x2x128xf32, #tpu.memory_space<vmem>>, vector<1x2x128xf32>
    %188 = vector.shape_cast %187 : vector<1x2x128xf32> to vector<2x128xf32>
    %189 = arith.index_cast %185 : i32 to index
    %c0_47 = arith.constant 0 : index
    %c0_48 = arith.constant 0 : index
    %190 = vector.load %arg0[%189, %c0_47, %c0_48] : memref<8x2x128xf32, #tpu.memory_space<vmem>>, vector<1x2x128xf32>
    %191 = vector.shape_cast %190 : vector<1x2x128xf32> to vector<2x128xf32>
    %192 = vector.extract_strided_slice %188 {offsets = [0, 0], sizes = [2, 64], strides = [1, 1]} : vector<2x128xf32> to vector<2x64xf32>
    %cst_49 = arith.constant dense<0.000000e+00> : vector<2x64xf32>
    %193 = tpu.matmul %151, %0, %cst_49 {dimension_numbers = #tpu.dot_dimension_numbers<[1], [0], [0], [1], [0, 0, 1, 1], [], []>} : vector<2x16xf32>, vector<16x64xf32>, vector<2x64xf32> -> vector<2x64xf32>
    %194 = arith.addf %192, %193 : vector<2x64xf32>
    %195 = vector.extract_strided_slice %194 {offsets = [0, 0], sizes = [2, 48], strides = [1, 1]} : vector<2x64xf32> to vector<2x48xf32>
    %196 = arith.negf %195 : vector<2x48xf32>
    %197 = math.exp %196 : vector<2x48xf32>
    %cst_50 = arith.constant 1.000000e+00 : f32
    %198 = vector.broadcast %cst_50 : f32 to vector<2x48xf32>
    %199 = arith.addf %198, %197 : vector<2x48xf32>
    %200 = arith.divf %198, %199 : vector<2x48xf32>
    %201 = vector.extract_strided_slice %194 {offsets = [0, 48], sizes = [2, 16], strides = [1, 1]} : vector<2x64xf32> to vector<2x16xf32>
    %202 = math.tanh %201 : vector<2x16xf32>
    %203 = vector.extract_strided_slice %200 {offsets = [0, 16], sizes = [2, 16], strides = [1, 1]} : vector<2x48xf32> to vector<2x16xf32>
    %204 = arith.mulf %203, %158 : vector<2x16xf32>
    %205 = vector.extract_strided_slice %200 {offsets = [0, 0], sizes = [2, 16], strides = [1, 1]} : vector<2x48xf32> to vector<2x16xf32>
    %206 = arith.mulf %205, %202 : vector<2x16xf32>
    %207 = arith.addf %204, %206 : vector<2x16xf32>
    %208 = vector.extract_strided_slice %200 {offsets = [0, 32], sizes = [2, 16], strides = [1, 1]} : vector<2x48xf32> to vector<2x16xf32>
    %209 = math.tanh %207 : vector<2x16xf32>
    %210 = arith.mulf %208, %209 : vector<2x16xf32>
    %211 = vector.extract_strided_slice %191 {offsets = [0, 64], sizes = [2, 64], strides = [1, 1]} : vector<2x128xf32> to vector<2x64xf32>
    %cst_51 = arith.constant dense<0.000000e+00> : vector<2x64xf32>
    %212 = tpu.matmul %165, %1, %cst_51 {dimension_numbers = #tpu.dot_dimension_numbers<[1], [0], [0], [1], [0, 0, 1, 1], [], []>} : vector<2x16xf32>, vector<16x64xf32>, vector<2x64xf32> -> vector<2x64xf32>
    %213 = arith.addf %211, %212 : vector<2x64xf32>
    %214 = vector.extract_strided_slice %213 {offsets = [0, 0], sizes = [2, 48], strides = [1, 1]} : vector<2x64xf32> to vector<2x48xf32>
    %215 = arith.negf %214 : vector<2x48xf32>
    %216 = math.exp %215 : vector<2x48xf32>
    %cst_52 = arith.constant 1.000000e+00 : f32
    %217 = vector.broadcast %cst_52 : f32 to vector<2x48xf32>
    %218 = arith.addf %217, %216 : vector<2x48xf32>
    %219 = arith.divf %217, %218 : vector<2x48xf32>
    %220 = vector.extract_strided_slice %213 {offsets = [0, 48], sizes = [2, 16], strides = [1, 1]} : vector<2x64xf32> to vector<2x16xf32>
    %221 = math.tanh %220 : vector<2x16xf32>
    %222 = vector.extract_strided_slice %219 {offsets = [0, 16], sizes = [2, 16], strides = [1, 1]} : vector<2x48xf32> to vector<2x16xf32>
    %223 = arith.mulf %222, %172 : vector<2x16xf32>
    %224 = vector.extract_strided_slice %219 {offsets = [0, 0], sizes = [2, 16], strides = [1, 1]} : vector<2x48xf32> to vector<2x16xf32>
    %225 = arith.mulf %224, %221 : vector<2x16xf32>
    %226 = arith.addf %223, %225 : vector<2x16xf32>
    %227 = vector.extract_strided_slice %219 {offsets = [0, 32], sizes = [2, 16], strides = [1, 1]} : vector<2x48xf32> to vector<2x16xf32>
    %228 = math.tanh %226 : vector<2x16xf32>
    %229 = arith.mulf %227, %228 : vector<2x16xf32>
    %230 = arith.index_cast %c2_i32 : i32 to index
    %c0_53 = arith.constant 0 : index
    %c0_54 = arith.constant 0 : index
    %231 = vector.load %arg1[%230, %c0_53, %c0_54] : memref<8x2x1xf32, #tpu.memory_space<vmem>>, vector<1x2x1xf32>
    %232 = vector.shape_cast %231 : vector<1x2x1xf32> to vector<2x1xf32>
    %233 = arith.index_cast %185 : i32 to index
    %c0_55 = arith.constant 0 : index
    %c0_56 = arith.constant 0 : index
    %234 = vector.load %arg1[%233, %c0_55, %c0_56] : memref<8x2x1xf32, #tpu.memory_space<vmem>>, vector<1x2x1xf32>
    %235 = vector.shape_cast %234 : vector<1x2x1xf32> to vector<2x1xf32>
    %236 = vector.broadcast %232 : vector<2x1xf32> to vector<2x16xf32>
    %237 = arith.mulf %236, %210 : vector<2x16xf32>
    %cst_57 = arith.constant 1.000000e+00 : f32
    %238 = vector.broadcast %cst_57 : f32 to vector<2x1xf32>
    %239 = arith.subf %238, %232 : vector<2x1xf32>
    %240 = vector.broadcast %239 : vector<2x1xf32> to vector<2x16xf32>
    %241 = arith.mulf %240, %151 : vector<2x16xf32>
    %242 = arith.addf %237, %241 : vector<2x16xf32>
    %243 = vector.broadcast %232 : vector<2x1xf32> to vector<2x16xf32>
    %244 = arith.mulf %243, %207 : vector<2x16xf32>
    %cst_58 = arith.constant 1.000000e+00 : f32
    %245 = vector.broadcast %cst_58 : f32 to vector<2x1xf32>
    %246 = arith.subf %245, %232 : vector<2x1xf32>
    %247 = vector.broadcast %246 : vector<2x1xf32> to vector<2x16xf32>
    %248 = arith.mulf %247, %158 : vector<2x16xf32>
    %249 = arith.addf %244, %248 : vector<2x16xf32>
    %250 = vector.broadcast %235 : vector<2x1xf32> to vector<2x16xf32>
    %251 = arith.mulf %250, %229 : vector<2x16xf32>
    %cst_59 = arith.constant 1.000000e+00 : f32
    %252 = vector.broadcast %cst_59 : f32 to vector<2x1xf32>
    %253 = arith.subf %252, %235 : vector<2x1xf32>
    %254 = vector.broadcast %253 : vector<2x1xf32> to vector<2x16xf32>
    %255 = arith.mulf %254, %165 : vector<2x16xf32>
    %256 = arith.addf %251, %255 : vector<2x16xf32>
    %257 = vector.broadcast %235 : vector<2x1xf32> to vector<2x16xf32>
    %258 = arith.mulf %257, %226 : vector<2x16xf32>
    %cst_60 = arith.constant 1.000000e+00 : f32
    %259 = vector.broadcast %cst_60 : f32 to vector<2x1xf32>
    %260 = arith.subf %259, %235 : vector<2x1xf32>
    %261 = vector.broadcast %260 : vector<2x1xf32> to vector<2x16xf32>
    %262 = arith.mulf %261, %172 : vector<2x16xf32>
    %263 = arith.addf %258, %262 : vector<2x16xf32>
    %264 = vector.broadcast %232 : vector<2x1xf32> to vector<2x16xf32>
    %265 = arith.mulf %264, %210 : vector<2x16xf32>
    %266 = arith.index_cast %c2_i32 : i32 to index
    %c0_61 = arith.constant 0 : index
    %c0_62 = arith.constant 0 : index
    %267 = vector.load %arg4[%266, %c0_61, %c0_62] : memref<8x2x16xf32, #tpu.memory_space<vmem>>, vector<1x2x16xf32>
    %268 = vector.shape_cast %267 : vector<1x2x16xf32> to vector<2x16xf32>
    %269 = vector.shape_cast %265 : vector<2x16xf32> to vector<1x2x16xf32>
    tpu.vector_store %arg4[%266, %c0_61, %c0_62], %269 {strides = array<i32>} : memref<8x2x16xf32, #tpu.memory_space<vmem>>, vector<1x2x16xf32>,
    %270 = vector.broadcast %235 : vector<2x1xf32> to vector<2x16xf32>
    %271 = arith.mulf %270, %229 : vector<2x16xf32>
    %272 = arith.index_cast %185 : i32 to index
    %c0_63 = arith.constant 0 : index
    %c0_64 = arith.constant 0 : index
    %273 = vector.load %arg5[%272, %c0_63, %c0_64] : memref<8x2x16xf32, #tpu.memory_space<vmem>>, vector<1x2x16xf32>
    %274 = vector.shape_cast %273 : vector<1x2x16xf32> to vector<2x16xf32>
    %275 = vector.shape_cast %271 : vector<2x16xf32> to vector<1x2x16xf32>
    tpu.vector_store %arg5[%272, %c0_63, %c0_64], %275 {strides = array<i32>} : memref<8x2x16xf32, #tpu.memory_space<vmem>>, vector<1x2x16xf32>,
    %c3_i32 = arith.constant 3 : i32
    %c7_i32_65 = arith.constant 7 : i32
    %276 = arith.subi %c7_i32_65, %c3_i32 : i32
    %277 = arith.index_cast %c3_i32 : i32 to index
    %c0_66 = arith.constant 0 : index
    %c0_67 = arith.constant 0 : index
    %278 = vector.load %arg0[%277, %c0_66, %c0_67] : memref<8x2x128xf32, #tpu.memory_space<vmem>>, vector<1x2x128xf32>
    %279 = vector.shape_cast %278 : vector<1x2x128xf32> to vector<2x128xf32>
    %280 = arith.index_cast %276 : i32 to index
    %c0_68 = arith.constant 0 : index
    %c0_69 = arith.constant 0 : index
    %281 = vector.load %arg0[%280, %c0_68, %c0_69] : memref<8x2x128xf32, #tpu.memory_space<vmem>>, vector<1x2x128xf32>
    %282 = vector.shape_cast %281 : vector<1x2x128xf32> to vector<2x128xf32>
    %283 = vector.extract_strided_slice %279 {offsets = [0, 0], sizes = [2, 64], strides = [1, 1]} : vector<2x128xf32> to vector<2x64xf32>
    %cst_70 = arith.constant dense<0.000000e+00> : vector<2x64xf32>
    %284 = tpu.matmul %242, %0, %cst_70 {dimension_numbers = #tpu.dot_dimension_numbers<[1], [0], [0], [1], [0, 0, 1, 1], [], []>} : vector<2x16xf32>, vector<16x64xf32>, vector<2x64xf32> -> vector<2x64xf32>
    %285 = arith.addf %283, %284 : vector<2x64xf32>
    %286 = vector.extract_strided_slice %285 {offsets = [0, 0], sizes = [2, 48], strides = [1, 1]} : vector<2x64xf32> to vector<2x48xf32>
    %287 = arith.negf %286 : vector<2x48xf32>
    %288 = math.exp %287 : vector<2x48xf32>
    %cst_71 = arith.constant 1.000000e+00 : f32
    %289 = vector.broadcast %cst_71 : f32 to vector<2x48xf32>
    %290 = arith.addf %289, %288 : vector<2x48xf32>
    %291 = arith.divf %289, %290 : vector<2x48xf32>
    %292 = vector.extract_strided_slice %285 {offsets = [0, 48], sizes = [2, 16], strides = [1, 1]} : vector<2x64xf32> to vector<2x16xf32>
    %293 = math.tanh %292 : vector<2x16xf32>
    %294 = vector.extract_strided_slice %291 {offsets = [0, 16], sizes = [2, 16], strides = [1, 1]} : vector<2x48xf32> to vector<2x16xf32>
    %295 = arith.mulf %294, %249 : vector<2x16xf32>
    %296 = vector.extract_strided_slice %291 {offsets = [0, 0], sizes = [2, 16], strides = [1, 1]} : vector<2x48xf32> to vector<2x16xf32>
    %297 = arith.mulf %296, %293 : vector<2x16xf32>
    %298 = arith.addf %295, %297 : vector<2x16xf32>
    %299 = vector.extract_strided_slice %291 {offsets = [0, 32], sizes = [2, 16], strides = [1, 1]} : vector<2x48xf32> to vector<2x16xf32>
    %300 = math.tanh %298 : vector<2x16xf32>
    %301 = arith.mulf %299, %300 : vector<2x16xf32>
    %302 = vector.extract_strided_slice %282 {offsets = [0, 64], sizes = [2, 64], strides = [1, 1]} : vector<2x128xf32> to vector<2x64xf32>
    %cst_72 = arith.constant dense<0.000000e+00> : vector<2x64xf32>
    %303 = tpu.matmul %256, %1, %cst_72 {dimension_numbers = #tpu.dot_dimension_numbers<[1], [0], [0], [1], [0, 0, 1, 1], [], []>} : vector<2x16xf32>, vector<16x64xf32>, vector<2x64xf32> -> vector<2x64xf32>
    %304 = arith.addf %302, %303 : vector<2x64xf32>
    %305 = vector.extract_strided_slice %304 {offsets = [0, 0], sizes = [2, 48], strides = [1, 1]} : vector<2x64xf32> to vector<2x48xf32>
    %306 = arith.negf %305 : vector<2x48xf32>
    %307 = math.exp %306 : vector<2x48xf32>
    %cst_73 = arith.constant 1.000000e+00 : f32
    %308 = vector.broadcast %cst_73 : f32 to vector<2x48xf32>
    %309 = arith.addf %308, %307 : vector<2x48xf32>
    %310 = arith.divf %308, %309 : vector<2x48xf32>
    %311 = vector.extract_strided_slice %304 {offsets = [0, 48], sizes = [2, 16], strides = [1, 1]} : vector<2x64xf32> to vector<2x16xf32>
    %312 = math.tanh %311 : vector<2x16xf32>
    %313 = vector.extract_strided_slice %310 {offsets = [0, 16], sizes = [2, 16], strides = [1, 1]} : vector<2x48xf32> to vector<2x16xf32>
    %314 = arith.mulf %313, %263 : vector<2x16xf32>
    %315 = vector.extract_strided_slice %310 {offsets = [0, 0], sizes = [2, 16], strides = [1, 1]} : vector<2x48xf32> to vector<2x16xf32>
    %316 = arith.mulf %315, %312 : vector<2x16xf32>
    %317 = arith.addf %314, %316 : vector<2x16xf32>
    %318 = vector.extract_strided_slice %310 {offsets = [0, 32], sizes = [2, 16], strides = [1, 1]} : vector<2x48xf32> to vector<2x16xf32>
    %319 = math.tanh %317 : vector<2x16xf32>
    %320 = arith.mulf %318, %319 : vector<2x16xf32>
    %321 = arith.index_cast %c3_i32 : i32 to index
    %c0_74 = arith.constant 0 : index
    %c0_75 = arith.constant 0 : index
    %322 = vector.load %arg1[%321, %c0_74, %c0_75] : memref<8x2x1xf32, #tpu.memory_space<vmem>>, vector<1x2x1xf32>
    %323 = vector.shape_cast %322 : vector<1x2x1xf32> to vector<2x1xf32>
    %324 = arith.index_cast %276 : i32 to index
    %c0_76 = arith.constant 0 : index
    %c0_77 = arith.constant 0 : index
    %325 = vector.load %arg1[%324, %c0_76, %c0_77] : memref<8x2x1xf32, #tpu.memory_space<vmem>>, vector<1x2x1xf32>
    %326 = vector.shape_cast %325 : vector<1x2x1xf32> to vector<2x1xf32>
    %327 = vector.broadcast %323 : vector<2x1xf32> to vector<2x16xf32>
    %328 = arith.mulf %327, %301 : vector<2x16xf32>
    %cst_78 = arith.constant 1.000000e+00 : f32
    %329 = vector.broadcast %cst_78 : f32 to vector<2x1xf32>
    %330 = arith.subf %329, %323 : vector<2x1xf32>
    %331 = vector.broadcast %330 : vector<2x1xf32> to vector<2x16xf32>
    %332 = arith.mulf %331, %242 : vector<2x16xf32>
    %333 = arith.addf %328, %332 : vector<2x16xf32>
    %334 = vector.broadcast %323 : vector<2x1xf32> to vector<2x16xf32>
    %335 = arith.mulf %334, %298 : vector<2x16xf32>
    %cst_79 = arith.constant 1.000000e+00 : f32
    %336 = vector.broadcast %cst_79 : f32 to vector<2x1xf32>
    %337 = arith.subf %336, %323 : vector<2x1xf32>
    %338 = vector.broadcast %337 : vector<2x1xf32> to vector<2x16xf32>
    %339 = arith.mulf %338, %249 : vector<2x16xf32>
    %340 = arith.addf %335, %339 : vector<2x16xf32>
    %341 = vector.broadcast %326 : vector<2x1xf32> to vector<2x16xf32>
    %342 = arith.mulf %341, %320 : vector<2x16xf32>
    %cst_80 = arith.constant 1.000000e+00 : f32
    %343 = vector.broadcast %cst_80 : f32 to vector<2x1xf32>
    %344 = arith.subf %343, %326 : vector<2x1xf32>
    %345 = vector.broadcast %344 : vector<2x1xf32> to vector<2x16xf32>
    %346 = arith.mulf %345, %256 : vector<2x16xf32>
    %347 = arith.addf %342, %346 : vector<2x16xf32>
    %348 = vector.broadcast %326 : vector<2x1xf32> to vector<2x16xf32>
    %349 = arith.mulf %348, %317 : vector<2x16xf32>
    %cst_81 = arith.constant 1.000000e+00 : f32
    %350 = vector.broadcast %cst_81 : f32 to vector<2x1xf32>
    %351 = arith.subf %350, %326 : vector<2x1xf32>
    %352 = vector.broadcast %351 : vector<2x1xf32> to vector<2x16xf32>
    %353 = arith.mulf %352, %263 : vector<2x16xf32>
    %354 = arith.addf %349, %353 : vector<2x16xf32>
    %355 = vector.broadcast %323 : vector<2x1xf32> to vector<2x16xf32>
    %356 = arith.mulf %355, %301 : vector<2x16xf32>
    %357 = arith.index_cast %c3_i32 : i32 to index
    %c0_82 = arith.constant 0 : index
    %c0_83 = arith.constant 0 : index
    %358 = vector.load %arg4[%357, %c0_82, %c0_83] : memref<8x2x16xf32, #tpu.memory_space<vmem>>, vector<1x2x16xf32>
    %359 = vector.shape_cast %358 : vector<1x2x16xf32> to vector<2x16xf32>
    %360 = vector.shape_cast %356 : vector<2x16xf32> to vector<1x2x16xf32>
    tpu.vector_store %arg4[%357, %c0_82, %c0_83], %360 {strides = array<i32>} : memref<8x2x16xf32, #tpu.memory_space<vmem>>, vector<1x2x16xf32>,
    %361 = vector.broadcast %326 : vector<2x1xf32> to vector<2x16xf32>
    %362 = arith.mulf %361, %320 : vector<2x16xf32>
    %363 = arith.index_cast %276 : i32 to index
    %c0_84 = arith.constant 0 : index
    %c0_85 = arith.constant 0 : index
    %364 = vector.load %arg5[%363, %c0_84, %c0_85] : memref<8x2x16xf32, #tpu.memory_space<vmem>>, vector<1x2x16xf32>
    %365 = vector.shape_cast %364 : vector<1x2x16xf32> to vector<2x16xf32>
    %366 = vector.shape_cast %362 : vector<2x16xf32> to vector<1x2x16xf32>
    tpu.vector_store %arg5[%363, %c0_84, %c0_85], %366 {strides = array<i32>} : memref<8x2x16xf32, #tpu.memory_space<vmem>>, vector<1x2x16xf32>,
    %c4_i32 = arith.constant 4 : i32
    %c7_i32_86 = arith.constant 7 : i32
    %367 = arith.subi %c7_i32_86, %c4_i32 : i32
    %368 = arith.index_cast %c4_i32 : i32 to index
    %c0_87 = arith.constant 0 : index
    %c0_88 = arith.constant 0 : index
    %369 = vector.load %arg0[%368, %c0_87, %c0_88] : memref<8x2x128xf32, #tpu.memory_space<vmem>>, vector<1x2x128xf32>
    %370 = vector.shape_cast %369 : vector<1x2x128xf32> to vector<2x128xf32>
    %371 = arith.index_cast %367 : i32 to index
    %c0_89 = arith.constant 0 : index
    %c0_90 = arith.constant 0 : index
    %372 = vector.load %arg0[%371, %c0_89, %c0_90] : memref<8x2x128xf32, #tpu.memory_space<vmem>>, vector<1x2x128xf32>
    %373 = vector.shape_cast %372 : vector<1x2x128xf32> to vector<2x128xf32>
    %374 = vector.extract_strided_slice %370 {offsets = [0, 0], sizes = [2, 64], strides = [1, 1]} : vector<2x128xf32> to vector<2x64xf32>
    %cst_91 = arith.constant dense<0.000000e+00> : vector<2x64xf32>
    %375 = tpu.matmul %333, %0, %cst_91 {dimension_numbers = #tpu.dot_dimension_numbers<[1], [0], [0], [1], [0, 0, 1, 1], [], []>} : vector<2x16xf32>, vector<16x64xf32>, vector<2x64xf32> -> vector<2x64xf32>
    %376 = arith.addf %374, %375 : vector<2x64xf32>
    %377 = vector.extract_strided_slice %376 {offsets = [0, 0], sizes = [2, 48], strides = [1, 1]} : vector<2x64xf32> to vector<2x48xf32>
    %378 = arith.negf %377 : vector<2x48xf32>
    %379 = math.exp %378 : vector<2x48xf32>
    %cst_92 = arith.constant 1.000000e+00 : f32
    %380 = vector.broadcast %cst_92 : f32 to vector<2x48xf32>
    %381 = arith.addf %380, %379 : vector<2x48xf32>
    %382 = arith.divf %380, %381 : vector<2x48xf32>
    %383 = vector.extract_strided_slice %376 {offsets = [0, 48], sizes = [2, 16], strides = [1, 1]} : vector<2x64xf32> to vector<2x16xf32>
    %384 = math.tanh %383 : vector<2x16xf32>
    %385 = vector.extract_strided_slice %382 {offsets = [0, 16], sizes = [2, 16], strides = [1, 1]} : vector<2x48xf32> to vector<2x16xf32>
    %386 = arith.mulf %385, %340 : vector<2x16xf32>
    %387 = vector.extract_strided_slice %382 {offsets = [0, 0], sizes = [2, 16], strides = [1, 1]} : vector<2x48xf32> to vector<2x16xf32>
    %388 = arith.mulf %387, %384 : vector<2x16xf32>
    %389 = arith.addf %386, %388 : vector<2x16xf32>
    %390 = vector.extract_strided_slice %382 {offsets = [0, 32], sizes = [2, 16], strides = [1, 1]} : vector<2x48xf32> to vector<2x16xf32>
    %391 = math.tanh %389 : vector<2x16xf32>
    %392 = arith.mulf %390, %391 : vector<2x16xf32>
    %393 = vector.extract_strided_slice %373 {offsets = [0, 64], sizes = [2, 64], strides = [1, 1]} : vector<2x128xf32> to vector<2x64xf32>
    %cst_93 = arith.constant dense<0.000000e+00> : vector<2x64xf32>
    %394 = tpu.matmul %347, %1, %cst_93 {dimension_numbers = #tpu.dot_dimension_numbers<[1], [0], [0], [1], [0, 0, 1, 1], [], []>} : vector<2x16xf32>, vector<16x64xf32>, vector<2x64xf32> -> vector<2x64xf32>
    %395 = arith.addf %393, %394 : vector<2x64xf32>
    %396 = vector.extract_strided_slice %395 {offsets = [0, 0], sizes = [2, 48], strides = [1, 1]} : vector<2x64xf32> to vector<2x48xf32>
    %397 = arith.negf %396 : vector<2x48xf32>
    %398 = math.exp %397 : vector<2x48xf32>
    %cst_94 = arith.constant 1.000000e+00 : f32
    %399 = vector.broadcast %cst_94 : f32 to vector<2x48xf32>
    %400 = arith.addf %399, %398 : vector<2x48xf32>
    %401 = arith.divf %399, %400 : vector<2x48xf32>
    %402 = vector.extract_strided_slice %395 {offsets = [0, 48], sizes = [2, 16], strides = [1, 1]} : vector<2x64xf32> to vector<2x16xf32>
    %403 = math.tanh %402 : vector<2x16xf32>
    %404 = vector.extract_strided_slice %401 {offsets = [0, 16], sizes = [2, 16], strides = [1, 1]} : vector<2x48xf32> to vector<2x16xf32>
    %405 = arith.mulf %404, %354 : vector<2x16xf32>
    %406 = vector.extract_strided_slice %401 {offsets = [0, 0], sizes = [2, 16], strides = [1, 1]} : vector<2x48xf32> to vector<2x16xf32>
    %407 = arith.mulf %406, %403 : vector<2x16xf32>
    %408 = arith.addf %405, %407 : vector<2x16xf32>
    %409 = vector.extract_strided_slice %401 {offsets = [0, 32], sizes = [2, 16], strides = [1, 1]} : vector<2x48xf32> to vector<2x16xf32>
    %410 = math.tanh %408 : vector<2x16xf32>
    %411 = arith.mulf %409, %410 : vector<2x16xf32>
    %412 = arith.index_cast %c4_i32 : i32 to index
    %c0_95 = arith.constant 0 : index
    %c0_96 = arith.constant 0 : index
    %413 = vector.load %arg1[%412, %c0_95, %c0_96] : memref<8x2x1xf32, #tpu.memory_space<vmem>>, vector<1x2x1xf32>
    %414 = vector.shape_cast %413 : vector<1x2x1xf32> to vector<2x1xf32>
    %415 = arith.index_cast %367 : i32 to index
    %c0_97 = arith.constant 0 : index
    %c0_98 = arith.constant 0 : index
    %416 = vector.load %arg1[%415, %c0_97, %c0_98] : memref<8x2x1xf32, #tpu.memory_space<vmem>>, vector<1x2x1xf32>
    %417 = vector.shape_cast %416 : vector<1x2x1xf32> to vector<2x1xf32>
    %418 = vector.broadcast %414 : vector<2x1xf32> to vector<2x16xf32>
    %419 = arith.mulf %418, %392 : vector<2x16xf32>
    %cst_99 = arith.constant 1.000000e+00 : f32
    %420 = vector.broadcast %cst_99 : f32 to vector<2x1xf32>
    %421 = arith.subf %420, %414 : vector<2x1xf32>
    %422 = vector.broadcast %421 : vector<2x1xf32> to vector<2x16xf32>
    %423 = arith.mulf %422, %333 : vector<2x16xf32>
    %424 = arith.addf %419, %423 : vector<2x16xf32>
    %425 = vector.broadcast %414 : vector<2x1xf32> to vector<2x16xf32>
    %426 = arith.mulf %425, %389 : vector<2x16xf32>
    %cst_100 = arith.constant 1.000000e+00 : f32
    %427 = vector.broadcast %cst_100 : f32 to vector<2x1xf32>
    %428 = arith.subf %427, %414 : vector<2x1xf32>
    %429 = vector.broadcast %428 : vector<2x1xf32> to vector<2x16xf32>
    %430 = arith.mulf %429, %340 : vector<2x16xf32>
    %431 = arith.addf %426, %430 : vector<2x16xf32>
    %432 = vector.broadcast %417 : vector<2x1xf32> to vector<2x16xf32>
    %433 = arith.mulf %432, %411 : vector<2x16xf32>
    %cst_101 = arith.constant 1.000000e+00 : f32
    %434 = vector.broadcast %cst_101 : f32 to vector<2x1xf32>
    %435 = arith.subf %434, %417 : vector<2x1xf32>
    %436 = vector.broadcast %435 : vector<2x1xf32> to vector<2x16xf32>
    %437 = arith.mulf %436, %347 : vector<2x16xf32>
    %438 = arith.addf %433, %437 : vector<2x16xf32>
    %439 = vector.broadcast %417 : vector<2x1xf32> to vector<2x16xf32>
    %440 = arith.mulf %439, %408 : vector<2x16xf32>
    %cst_102 = arith.constant 1.000000e+00 : f32
    %441 = vector.broadcast %cst_102 : f32 to vector<2x1xf32>
    %442 = arith.subf %441, %417 : vector<2x1xf32>
    %443 = vector.broadcast %442 : vector<2x1xf32> to vector<2x16xf32>
    %444 = arith.mulf %443, %354 : vector<2x16xf32>
    %445 = arith.addf %440, %444 : vector<2x16xf32>
    %446 = vector.broadcast %414 : vector<2x1xf32> to vector<2x16xf32>
    %447 = arith.mulf %446, %392 : vector<2x16xf32>
    %448 = arith.index_cast %c4_i32 : i32 to index
    %c0_103 = arith.constant 0 : index
    %c0_104 = arith.constant 0 : index
    %449 = vector.load %arg4[%448, %c0_103, %c0_104] : memref<8x2x16xf32, #tpu.memory_space<vmem>>, vector<1x2x16xf32>
    %450 = vector.shape_cast %449 : vector<1x2x16xf32> to vector<2x16xf32>
    %451 = vector.shape_cast %447 : vector<2x16xf32> to vector<1x2x16xf32>
    tpu.vector_store %arg4[%448, %c0_103, %c0_104], %451 {strides = array<i32>} : memref<8x2x16xf32, #tpu.memory_space<vmem>>, vector<1x2x16xf32>,
    %452 = vector.broadcast %417 : vector<2x1xf32> to vector<2x16xf32>
    %453 = arith.mulf %452, %411 : vector<2x16xf32>
    %454 = arith.index_cast %367 : i32 to index
    %c0_105 = arith.constant 0 : index
    %c0_106 = arith.constant 0 : index
    %455 = vector.load %arg5[%454, %c0_105, %c0_106] : memref<8x2x16xf32, #tpu.memory_space<vmem>>, vector<1x2x16xf32>
    %456 = vector.shape_cast %455 : vector<1x2x16xf32> to vector<2x16xf32>
    %457 = vector.shape_cast %453 : vector<2x16xf32> to vector<1x2x16xf32>
    tpu.vector_store %arg5[%454, %c0_105, %c0_106], %457 {strides = array<i32>} : memref<8x2x16xf32, #tpu.memory_space<vmem>>, vector<1x2x16xf32>,
    %c5_i32 = arith.constant 5 : i32
    %c7_i32_107 = arith.constant 7 : i32
    %458 = arith.subi %c7_i32_107, %c5_i32 : i32
    %459 = arith.index_cast %c5_i32 : i32 to index
    %c0_108 = arith.constant 0 : index
    %c0_109 = arith.constant 0 : index
    %460 = vector.load %arg0[%459, %c0_108, %c0_109] : memref<8x2x128xf32, #tpu.memory_space<vmem>>, vector<1x2x128xf32>
    %461 = vector.shape_cast %460 : vector<1x2x128xf32> to vector<2x128xf32>
    %462 = arith.index_cast %458 : i32 to index
    %c0_110 = arith.constant 0 : index
    %c0_111 = arith.constant 0 : index
    %463 = vector.load %arg0[%462, %c0_110, %c0_111] : memref<8x2x128xf32, #tpu.memory_space<vmem>>, vector<1x2x128xf32>
    %464 = vector.shape_cast %463 : vector<1x2x128xf32> to vector<2x128xf32>
    %465 = vector.extract_strided_slice %461 {offsets = [0, 0], sizes = [2, 64], strides = [1, 1]} : vector<2x128xf32> to vector<2x64xf32>
    %cst_112 = arith.constant dense<0.000000e+00> : vector<2x64xf32>
    %466 = tpu.matmul %424, %0, %cst_112 {dimension_numbers = #tpu.dot_dimension_numbers<[1], [0], [0], [1], [0, 0, 1, 1], [], []>} : vector<2x16xf32>, vector<16x64xf32>, vector<2x64xf32> -> vector<2x64xf32>
    %467 = arith.addf %465, %466 : vector<2x64xf32>
    %468 = vector.extract_strided_slice %467 {offsets = [0, 0], sizes = [2, 48], strides = [1, 1]} : vector<2x64xf32> to vector<2x48xf32>
    %469 = arith.negf %468 : vector<2x48xf32>
    %470 = math.exp %469 : vector<2x48xf32>
    %cst_113 = arith.constant 1.000000e+00 : f32
    %471 = vector.broadcast %cst_113 : f32 to vector<2x48xf32>
    %472 = arith.addf %471, %470 : vector<2x48xf32>
    %473 = arith.divf %471, %472 : vector<2x48xf32>
    %474 = vector.extract_strided_slice %467 {offsets = [0, 48], sizes = [2, 16], strides = [1, 1]} : vector<2x64xf32> to vector<2x16xf32>
    %475 = math.tanh %474 : vector<2x16xf32>
    %476 = vector.extract_strided_slice %473 {offsets = [0, 16], sizes = [2, 16], strides = [1, 1]} : vector<2x48xf32> to vector<2x16xf32>
    %477 = arith.mulf %476, %431 : vector<2x16xf32>
    %478 = vector.extract_strided_slice %473 {offsets = [0, 0], sizes = [2, 16], strides = [1, 1]} : vector<2x48xf32> to vector<2x16xf32>
    %479 = arith.mulf %478, %475 : vector<2x16xf32>
    %480 = arith.addf %477, %479 : vector<2x16xf32>
    %481 = vector.extract_strided_slice %473 {offsets = [0, 32], sizes = [2, 16], strides = [1, 1]} : vector<2x48xf32> to vector<2x16xf32>
    %482 = math.tanh %480 : vector<2x16xf32>
    %483 = arith.mulf %481, %482 : vector<2x16xf32>
    %484 = vector.extract_strided_slice %464 {offsets = [0, 64], sizes = [2, 64], strides = [1, 1]} : vector<2x128xf32> to vector<2x64xf32>
    %cst_114 = arith.constant dense<0.000000e+00> : vector<2x64xf32>
    %485 = tpu.matmul %438, %1, %cst_114 {dimension_numbers = #tpu.dot_dimension_numbers<[1], [0], [0], [1], [0, 0, 1, 1], [], []>} : vector<2x16xf32>, vector<16x64xf32>, vector<2x64xf32> -> vector<2x64xf32>
    %486 = arith.addf %484, %485 : vector<2x64xf32>
    %487 = vector.extract_strided_slice %486 {offsets = [0, 0], sizes = [2, 48], strides = [1, 1]} : vector<2x64xf32> to vector<2x48xf32>
    %488 = arith.negf %487 : vector<2x48xf32>
    %489 = math.exp %488 : vector<2x48xf32>
    %cst_115 = arith.constant 1.000000e+00 : f32
    %490 = vector.broadcast %cst_115 : f32 to vector<2x48xf32>
    %491 = arith.addf %490, %489 : vector<2x48xf32>
    %492 = arith.divf %490, %491 : vector<2x48xf32>
    %493 = vector.extract_strided_slice %486 {offsets = [0, 48], sizes = [2, 16], strides = [1, 1]} : vector<2x64xf32> to vector<2x16xf32>
    %494 = math.tanh %493 : vector<2x16xf32>
    %495 = vector.extract_strided_slice %492 {offsets = [0, 16], sizes = [2, 16], strides = [1, 1]} : vector<2x48xf32> to vector<2x16xf32>
    %496 = arith.mulf %495, %445 : vector<2x16xf32>
    %497 = vector.extract_strided_slice %492 {offsets = [0, 0], sizes = [2, 16], strides = [1, 1]} : vector<2x48xf32> to vector<2x16xf32>
    %498 = arith.mulf %497, %494 : vector<2x16xf32>
    %499 = arith.addf %496, %498 : vector<2x16xf32>
    %500 = vector.extract_strided_slice %492 {offsets = [0, 32], sizes = [2, 16], strides = [1, 1]} : vector<2x48xf32> to vector<2x16xf32>
    %501 = math.tanh %499 : vector<2x16xf32>
    %502 = arith.mulf %500, %501 : vector<2x16xf32>
    %503 = arith.index_cast %c5_i32 : i32 to index
    %c0_116 = arith.constant 0 : index
    %c0_117 = arith.constant 0 : index
    %504 = vector.load %arg1[%503, %c0_116, %c0_117] : memref<8x2x1xf32, #tpu.memory_space<vmem>>, vector<1x2x1xf32>
    %505 = vector.shape_cast %504 : vector<1x2x1xf32> to vector<2x1xf32>
    %506 = arith.index_cast %458 : i32 to index
    %c0_118 = arith.constant 0 : index
    %c0_119 = arith.constant 0 : index
    %507 = vector.load %arg1[%506, %c0_118, %c0_119] : memref<8x2x1xf32, #tpu.memory_space<vmem>>, vector<1x2x1xf32>
    %508 = vector.shape_cast %507 : vector<1x2x1xf32> to vector<2x1xf32>
    %509 = vector.broadcast %505 : vector<2x1xf32> to vector<2x16xf32>
    %510 = arith.mulf %509, %483 : vector<2x16xf32>
    %cst_120 = arith.constant 1.000000e+00 : f32
    %511 = vector.broadcast %cst_120 : f32 to vector<2x1xf32>
    %512 = arith.subf %511, %505 : vector<2x1xf32>
    %513 = vector.broadcast %512 : vector<2x1xf32> to vector<2x16xf32>
    %514 = arith.mulf %513, %424 : vector<2x16xf32>
    %515 = arith.addf %510, %514 : vector<2x16xf32>
    %516 = vector.broadcast %505 : vector<2x1xf32> to vector<2x16xf32>
    %517 = arith.mulf %516, %480 : vector<2x16xf32>
    %cst_121 = arith.constant 1.000000e+00 : f32
    %518 = vector.broadcast %cst_121 : f32 to vector<2x1xf32>
    %519 = arith.subf %518, %505 : vector<2x1xf32>
    %520 = vector.broadcast %519 : vector<2x1xf32> to vector<2x16xf32>
    %521 = arith.mulf %520, %431 : vector<2x16xf32>
    %522 = arith.addf %517, %521 : vector<2x16xf32>
    %523 = vector.broadcast %508 : vector<2x1xf32> to vector<2x16xf32>
    %524 = arith.mulf %523, %502 : vector<2x16xf32>
    %cst_122 = arith.constant 1.000000e+00 : f32
    %525 = vector.broadcast %cst_122 : f32 to vector<2x1xf32>
    %526 = arith.subf %525, %508 : vector<2x1xf32>
    %527 = vector.broadcast %526 : vector<2x1xf32> to vector<2x16xf32>
    %528 = arith.mulf %527, %438 : vector<2x16xf32>
    %529 = arith.addf %524, %528 : vector<2x16xf32>
    %530 = vector.broadcast %508 : vector<2x1xf32> to vector<2x16xf32>
    %531 = arith.mulf %530, %499 : vector<2x16xf32>
    %cst_123 = arith.constant 1.000000e+00 : f32
    %532 = vector.broadcast %cst_123 : f32 to vector<2x1xf32>
    %533 = arith.subf %532, %508 : vector<2x1xf32>
    %534 = vector.broadcast %533 : vector<2x1xf32> to vector<2x16xf32>
    %535 = arith.mulf %534, %445 : vector<2x16xf32>
    %536 = arith.addf %531, %535 : vector<2x16xf32>
    %537 = vector.broadcast %505 : vector<2x1xf32> to vector<2x16xf32>
    %538 = arith.mulf %537, %483 : vector<2x16xf32>
    %539 = arith.index_cast %c5_i32 : i32 to index
    %c0_124 = arith.constant 0 : index
    %c0_125 = arith.constant 0 : index
    %540 = vector.load %arg4[%539, %c0_124, %c0_125] : memref<8x2x16xf32, #tpu.memory_space<vmem>>, vector<1x2x16xf32>
    %541 = vector.shape_cast %540 : vector<1x2x16xf32> to vector<2x16xf32>
    %542 = vector.shape_cast %538 : vector<2x16xf32> to vector<1x2x16xf32>
    tpu.vector_store %arg4[%539, %c0_124, %c0_125], %542 {strides = array<i32>} : memref<8x2x16xf32, #tpu.memory_space<vmem>>, vector<1x2x16xf32>,
    %543 = vector.broadcast %508 : vector<2x1xf32> to vector<2x16xf32>
    %544 = arith.mulf %543, %502 : vector<2x16xf32>
    %545 = arith.index_cast %458 : i32 to index
    %c0_126 = arith.constant 0 : index
    %c0_127 = arith.constant 0 : index
    %546 = vector.load %arg5[%545, %c0_126, %c0_127] : memref<8x2x16xf32, #tpu.memory_space<vmem>>, vector<1x2x16xf32>
    %547 = vector.shape_cast %546 : vector<1x2x16xf32> to vector<2x16xf32>
    %548 = vector.shape_cast %544 : vector<2x16xf32> to vector<1x2x16xf32>
    tpu.vector_store %arg5[%545, %c0_126, %c0_127], %548 {strides = array<i32>} : memref<8x2x16xf32, #tpu.memory_space<vmem>>, vector<1x2x16xf32>,
    %c6_i32 = arith.constant 6 : i32
    %c7_i32_128 = arith.constant 7 : i32
    %549 = arith.subi %c7_i32_128, %c6_i32 : i32
    %550 = arith.index_cast %c6_i32 : i32 to index
    %c0_129 = arith.constant 0 : index
    %c0_130 = arith.constant 0 : index
    %551 = vector.load %arg0[%550, %c0_129, %c0_130] : memref<8x2x128xf32, #tpu.memory_space<vmem>>, vector<1x2x128xf32>
    %552 = vector.shape_cast %551 : vector<1x2x128xf32> to vector<2x128xf32>
    %553 = arith.index_cast %549 : i32 to index
    %c0_131 = arith.constant 0 : index
    %c0_132 = arith.constant 0 : index
    %554 = vector.load %arg0[%553, %c0_131, %c0_132] : memref<8x2x128xf32, #tpu.memory_space<vmem>>, vector<1x2x128xf32>
    %555 = vector.shape_cast %554 : vector<1x2x128xf32> to vector<2x128xf32>
    %556 = vector.extract_strided_slice %552 {offsets = [0, 0], sizes = [2, 64], strides = [1, 1]} : vector<2x128xf32> to vector<2x64xf32>
    %cst_133 = arith.constant dense<0.000000e+00> : vector<2x64xf32>
    %557 = tpu.matmul %515, %0, %cst_133 {dimension_numbers = #tpu.dot_dimension_numbers<[1], [0], [0], [1], [0, 0, 1, 1], [], []>} : vector<2x16xf32>, vector<16x64xf32>, vector<2x64xf32> -> vector<2x64xf32>
    %558 = arith.addf %556, %557 : vector<2x64xf32>
    %559 = vector.extract_strided_slice %558 {offsets = [0, 0], sizes = [2, 48], strides = [1, 1]} : vector<2x64xf32> to vector<2x48xf32>
    %560 = arith.negf %559 : vector<2x48xf32>
    %561 = math.exp %560 : vector<2x48xf32>
    %cst_134 = arith.constant 1.000000e+00 : f32
    %562 = vector.broadcast %cst_134 : f32 to vector<2x48xf32>
    %563 = arith.addf %562, %561 : vector<2x48xf32>
    %564 = arith.divf %562, %563 : vector<2x48xf32>
    %565 = vector.extract_strided_slice %558 {offsets = [0, 48], sizes = [2, 16], strides = [1, 1]} : vector<2x64xf32> to vector<2x16xf32>
    %566 = math.tanh %565 : vector<2x16xf32>
    %567 = vector.extract_strided_slice %564 {offsets = [0, 16], sizes = [2, 16], strides = [1, 1]} : vector<2x48xf32> to vector<2x16xf32>
    %568 = arith.mulf %567, %522 : vector<2x16xf32>
    %569 = vector.extract_strided_slice %564 {offsets = [0, 0], sizes = [2, 16], strides = [1, 1]} : vector<2x48xf32> to vector<2x16xf32>
    %570 = arith.mulf %569, %566 : vector<2x16xf32>
    %571 = arith.addf %568, %570 : vector<2x16xf32>
    %572 = vector.extract_strided_slice %564 {offsets = [0, 32], sizes = [2, 16], strides = [1, 1]} : vector<2x48xf32> to vector<2x16xf32>
    %573 = math.tanh %571 : vector<2x16xf32>
    %574 = arith.mulf %572, %573 : vector<2x16xf32>
    %575 = vector.extract_strided_slice %555 {offsets = [0, 64], sizes = [2, 64], strides = [1, 1]} : vector<2x128xf32> to vector<2x64xf32>
    %cst_135 = arith.constant dense<0.000000e+00> : vector<2x64xf32>
    %576 = tpu.matmul %529, %1, %cst_135 {dimension_numbers = #tpu.dot_dimension_numbers<[1], [0], [0], [1], [0, 0, 1, 1], [], []>} : vector<2x16xf32>, vector<16x64xf32>, vector<2x64xf32> -> vector<2x64xf32>
    %577 = arith.addf %575, %576 : vector<2x64xf32>
    %578 = vector.extract_strided_slice %577 {offsets = [0, 0], sizes = [2, 48], strides = [1, 1]} : vector<2x64xf32> to vector<2x48xf32>
    %579 = arith.negf %578 : vector<2x48xf32>
    %580 = math.exp %579 : vector<2x48xf32>
    %cst_136 = arith.constant 1.000000e+00 : f32
    %581 = vector.broadcast %cst_136 : f32 to vector<2x48xf32>
    %582 = arith.addf %581, %580 : vector<2x48xf32>
    %583 = arith.divf %581, %582 : vector<2x48xf32>
    %584 = vector.extract_strided_slice %577 {offsets = [0, 48], sizes = [2, 16], strides = [1, 1]} : vector<2x64xf32> to vector<2x16xf32>
    %585 = math.tanh %584 : vector<2x16xf32>
    %586 = vector.extract_strided_slice %583 {offsets = [0, 16], sizes = [2, 16], strides = [1, 1]} : vector<2x48xf32> to vector<2x16xf32>
    %587 = arith.mulf %586, %536 : vector<2x16xf32>
    %588 = vector.extract_strided_slice %583 {offsets = [0, 0], sizes = [2, 16], strides = [1, 1]} : vector<2x48xf32> to vector<2x16xf32>
    %589 = arith.mulf %588, %585 : vector<2x16xf32>
    %590 = arith.addf %587, %589 : vector<2x16xf32>
    %591 = vector.extract_strided_slice %583 {offsets = [0, 32], sizes = [2, 16], strides = [1, 1]} : vector<2x48xf32> to vector<2x16xf32>
    %592 = math.tanh %590 : vector<2x16xf32>
    %593 = arith.mulf %591, %592 : vector<2x16xf32>
    %594 = arith.index_cast %c6_i32 : i32 to index
    %c0_137 = arith.constant 0 : index
    %c0_138 = arith.constant 0 : index
    %595 = vector.load %arg1[%594, %c0_137, %c0_138] : memref<8x2x1xf32, #tpu.memory_space<vmem>>, vector<1x2x1xf32>
    %596 = vector.shape_cast %595 : vector<1x2x1xf32> to vector<2x1xf32>
    %597 = arith.index_cast %549 : i32 to index
    %c0_139 = arith.constant 0 : index
    %c0_140 = arith.constant 0 : index
    %598 = vector.load %arg1[%597, %c0_139, %c0_140] : memref<8x2x1xf32, #tpu.memory_space<vmem>>, vector<1x2x1xf32>
    %599 = vector.shape_cast %598 : vector<1x2x1xf32> to vector<2x1xf32>
    %600 = vector.broadcast %596 : vector<2x1xf32> to vector<2x16xf32>
    %601 = arith.mulf %600, %574 : vector<2x16xf32>
    %cst_141 = arith.constant 1.000000e+00 : f32
    %602 = vector.broadcast %cst_141 : f32 to vector<2x1xf32>
    %603 = arith.subf %602, %596 : vector<2x1xf32>
    %604 = vector.broadcast %603 : vector<2x1xf32> to vector<2x16xf32>
    %605 = arith.mulf %604, %515 : vector<2x16xf32>
    %606 = arith.addf %601, %605 : vector<2x16xf32>
    %607 = vector.broadcast %596 : vector<2x1xf32> to vector<2x16xf32>
    %608 = arith.mulf %607, %571 : vector<2x16xf32>
    %cst_142 = arith.constant 1.000000e+00 : f32
    %609 = vector.broadcast %cst_142 : f32 to vector<2x1xf32>
    %610 = arith.subf %609, %596 : vector<2x1xf32>
    %611 = vector.broadcast %610 : vector<2x1xf32> to vector<2x16xf32>
    %612 = arith.mulf %611, %522 : vector<2x16xf32>
    %613 = arith.addf %608, %612 : vector<2x16xf32>
    %614 = vector.broadcast %599 : vector<2x1xf32> to vector<2x16xf32>
    %615 = arith.mulf %614, %593 : vector<2x16xf32>
    %cst_143 = arith.constant 1.000000e+00 : f32
    %616 = vector.broadcast %cst_143 : f32 to vector<2x1xf32>
    %617 = arith.subf %616, %599 : vector<2x1xf32>
    %618 = vector.broadcast %617 : vector<2x1xf32> to vector<2x16xf32>
    %619 = arith.mulf %618, %529 : vector<2x16xf32>
    %620 = arith.addf %615, %619 : vector<2x16xf32>
    %621 = vector.broadcast %599 : vector<2x1xf32> to vector<2x16xf32>
    %622 = arith.mulf %621, %590 : vector<2x16xf32>
    %cst_144 = arith.constant 1.000000e+00 : f32
    %623 = vector.broadcast %cst_144 : f32 to vector<2x1xf32>
    %624 = arith.subf %623, %599 : vector<2x1xf32>
    %625 = vector.broadcast %624 : vector<2x1xf32> to vector<2x16xf32>
    %626 = arith.mulf %625, %536 : vector<2x16xf32>
    %627 = arith.addf %622, %626 : vector<2x16xf32>
    %628 = vector.broadcast %596 : vector<2x1xf32> to vector<2x16xf32>
    %629 = arith.mulf %628, %574 : vector<2x16xf32>
    %630 = arith.index_cast %c6_i32 : i32 to index
    %c0_145 = arith.constant 0 : index
    %c0_146 = arith.constant 0 : index
    %631 = vector.load %arg4[%630, %c0_145, %c0_146] : memref<8x2x16xf32, #tpu.memory_space<vmem>>, vector<1x2x16xf32>
    %632 = vector.shape_cast %631 : vector<1x2x16xf32> to vector<2x16xf32>
    %633 = vector.shape_cast %629 : vector<2x16xf32> to vector<1x2x16xf32>
    tpu.vector_store %arg4[%630, %c0_145, %c0_146], %633 {strides = array<i32>} : memref<8x2x16xf32, #tpu.memory_space<vmem>>, vector<1x2x16xf32>,
    %634 = vector.broadcast %599 : vector<2x1xf32> to vector<2x16xf32>
    %635 = arith.mulf %634, %593 : vector<2x16xf32>
    %636 = arith.index_cast %549 : i32 to index
    %c0_147 = arith.constant 0 : index
    %c0_148 = arith.constant 0 : index
    %637 = vector.load %arg5[%636, %c0_147, %c0_148] : memref<8x2x16xf32, #tpu.memory_space<vmem>>, vector<1x2x16xf32>
    %638 = vector.shape_cast %637 : vector<1x2x16xf32> to vector<2x16xf32>
    %639 = vector.shape_cast %635 : vector<2x16xf32> to vector<1x2x16xf32>
    tpu.vector_store %arg5[%636, %c0_147, %c0_148], %639 {strides = array<i32>} : memref<8x2x16xf32, #tpu.memory_space<vmem>>, vector<1x2x16xf32>,
    %c7_i32_149 = arith.constant 7 : i32
    %c7_i32_150 = arith.constant 7 : i32
    %640 = arith.subi %c7_i32_150, %c7_i32_149 : i32
    %641 = arith.index_cast %c7_i32_149 : i32 to index
    %c0_151 = arith.constant 0 : index
    %c0_152 = arith.constant 0 : index
    %642 = vector.load %arg0[%641, %c0_151, %c0_152] : memref<8x2x128xf32, #tpu.memory_space<vmem>>, vector<1x2x128xf32>
    %643 = vector.shape_cast %642 : vector<1x2x128xf32> to vector<2x128xf32>
    %644 = arith.index_cast %640 : i32 to index
    %c0_153 = arith.constant 0 : index
    %c0_154 = arith.constant 0 : index
    %645 = vector.load %arg0[%644, %c0_153, %c0_154] : memref<8x2x128xf32, #tpu.memory_space<vmem>>, vector<1x2x128xf32>
    %646 = vector.shape_cast %645 : vector<1x2x128xf32> to vector<2x128xf32>
    %647 = vector.extract_strided_slice %643 {offsets = [0, 0], sizes = [2, 64], strides = [1, 1]} : vector<2x128xf32> to vector<2x64xf32>
    %cst_155 = arith.constant dense<0.000000e+00> : vector<2x64xf32>
    %648 = tpu.matmul %606, %0, %cst_155 {dimension_numbers = #tpu.dot_dimension_numbers<[1], [0], [0], [1], [0, 0, 1, 1], [], []>} : vector<2x16xf32>, vector<16x64xf32>, vector<2x64xf32> -> vector<2x64xf32>
    %649 = arith.addf %647, %648 : vector<2x64xf32>
    %650 = vector.extract_strided_slice %649 {offsets = [0, 0], sizes = [2, 48], strides = [1, 1]} : vector<2x64xf32> to vector<2x48xf32>
    %651 = arith.negf %650 : vector<2x48xf32>
    %652 = math.exp %651 : vector<2x48xf32>
    %cst_156 = arith.constant 1.000000e+00 : f32
    %653 = vector.broadcast %cst_156 : f32 to vector<2x48xf32>
    %654 = arith.addf %653, %652 : vector<2x48xf32>
    %655 = arith.divf %653, %654 : vector<2x48xf32>
    %656 = vector.extract_strided_slice %649 {offsets = [0, 48], sizes = [2, 16], strides = [1, 1]} : vector<2x64xf32> to vector<2x16xf32>
    %657 = math.tanh %656 : vector<2x16xf32>
    %658 = vector.extract_strided_slice %655 {offsets = [0, 16], sizes = [2, 16], strides = [1, 1]} : vector<2x48xf32> to vector<2x16xf32>
    %659 = arith.mulf %658, %613 : vector<2x16xf32>
    %660 = vector.extract_strided_slice %655 {offsets = [0, 0], sizes = [2, 16], strides = [1, 1]} : vector<2x48xf32> to vector<2x16xf32>
    %661 = arith.mulf %660, %657 : vector<2x16xf32>
    %662 = arith.addf %659, %661 : vector<2x16xf32>
    %663 = vector.extract_strided_slice %655 {offsets = [0, 32], sizes = [2, 16], strides = [1, 1]} : vector<2x48xf32> to vector<2x16xf32>
    %664 = math.tanh %662 : vector<2x16xf32>
    %665 = arith.mulf %663, %664 : vector<2x16xf32>
    %666 = vector.extract_strided_slice %646 {offsets = [0, 64], sizes = [2, 64], strides = [1, 1]} : vector<2x128xf32> to vector<2x64xf32>
    %cst_157 = arith.constant dense<0.000000e+00> : vector<2x64xf32>
    %667 = tpu.matmul %620, %1, %cst_157 {dimension_numbers = #tpu.dot_dimension_numbers<[1], [0], [0], [1], [0, 0, 1, 1], [], []>} : vector<2x16xf32>, vector<16x64xf32>, vector<2x64xf32> -> vector<2x64xf32>
    %668 = arith.addf %666, %667 : vector<2x64xf32>
    %669 = vector.extract_strided_slice %668 {offsets = [0, 0], sizes = [2, 48], strides = [1, 1]} : vector<2x64xf32> to vector<2x48xf32>
    %670 = arith.negf %669 : vector<2x48xf32>
    %671 = math.exp %670 : vector<2x48xf32>
    %cst_158 = arith.constant 1.000000e+00 : f32
    %672 = vector.broadcast %cst_158 : f32 to vector<2x48xf32>
    %673 = arith.addf %672, %671 : vector<2x48xf32>
    %674 = arith.divf %672, %673 : vector<2x48xf32>
    %675 = vector.extract_strided_slice %668 {offsets = [0, 48], sizes = [2, 16], strides = [1, 1]} : vector<2x64xf32> to vector<2x16xf32>
    %676 = math.tanh %675 : vector<2x16xf32>
    %677 = vector.extract_strided_slice %674 {offsets = [0, 16], sizes = [2, 16], strides = [1, 1]} : vector<2x48xf32> to vector<2x16xf32>
    %678 = arith.mulf %677, %627 : vector<2x16xf32>
    %679 = vector.extract_strided_slice %674 {offsets = [0, 0], sizes = [2, 16], strides = [1, 1]} : vector<2x48xf32> to vector<2x16xf32>
    %680 = arith.mulf %679, %676 : vector<2x16xf32>
    %681 = arith.addf %678, %680 : vector<2x16xf32>
    %682 = vector.extract_strided_slice %674 {offsets = [0, 32], sizes = [2, 16], strides = [1, 1]} : vector<2x48xf32> to vector<2x16xf32>
    %683 = math.tanh %681 : vector<2x16xf32>
    %684 = arith.mulf %682, %683 : vector<2x16xf32>
    %685 = arith.index_cast %c7_i32_149 : i32 to index
    %c0_159 = arith.constant 0 : index
    %c0_160 = arith.constant 0 : index
    %686 = vector.load %arg1[%685, %c0_159, %c0_160] : memref<8x2x1xf32, #tpu.memory_space<vmem>>, vector<1x2x1xf32>
    %687 = vector.shape_cast %686 : vector<1x2x1xf32> to vector<2x1xf32>
    %688 = arith.index_cast %640 : i32 to index
    %c0_161 = arith.constant 0 : index
    %c0_162 = arith.constant 0 : index
    %689 = vector.load %arg1[%688, %c0_161, %c0_162] : memref<8x2x1xf32, #tpu.memory_space<vmem>>, vector<1x2x1xf32>
    %690 = vector.shape_cast %689 : vector<1x2x1xf32> to vector<2x1xf32>
    %691 = vector.broadcast %687 : vector<2x1xf32> to vector<2x16xf32>
    %692 = arith.mulf %691, %665 : vector<2x16xf32>
    %cst_163 = arith.constant 1.000000e+00 : f32
    %693 = vector.broadcast %cst_163 : f32 to vector<2x1xf32>
    %694 = arith.subf %693, %687 : vector<2x1xf32>
    %695 = vector.broadcast %694 : vector<2x1xf32> to vector<2x16xf32>
    %696 = arith.mulf %695, %606 : vector<2x16xf32>
    %697 = arith.addf %692, %696 : vector<2x16xf32>
    %698 = vector.broadcast %687 : vector<2x1xf32> to vector<2x16xf32>
    %699 = arith.mulf %698, %662 : vector<2x16xf32>
    %cst_164 = arith.constant 1.000000e+00 : f32
    %700 = vector.broadcast %cst_164 : f32 to vector<2x1xf32>
    %701 = arith.subf %700, %687 : vector<2x1xf32>
    %702 = vector.broadcast %701 : vector<2x1xf32> to vector<2x16xf32>
    %703 = arith.mulf %702, %613 : vector<2x16xf32>
    %704 = arith.addf %699, %703 : vector<2x16xf32>
    %705 = vector.broadcast %690 : vector<2x1xf32> to vector<2x16xf32>
    %706 = arith.mulf %705, %684 : vector<2x16xf32>
    %cst_165 = arith.constant 1.000000e+00 : f32
    %707 = vector.broadcast %cst_165 : f32 to vector<2x1xf32>
    %708 = arith.subf %707, %690 : vector<2x1xf32>
    %709 = vector.broadcast %708 : vector<2x1xf32> to vector<2x16xf32>
    %710 = arith.mulf %709, %620 : vector<2x16xf32>
    %711 = arith.addf %706, %710 : vector<2x16xf32>
    %712 = vector.broadcast %690 : vector<2x1xf32> to vector<2x16xf32>
    %713 = arith.mulf %712, %681 : vector<2x16xf32>
    %cst_166 = arith.constant 1.000000e+00 : f32
    %714 = vector.broadcast %cst_166 : f32 to vector<2x1xf32>
    %715 = arith.subf %714, %690 : vector<2x1xf32>
    %716 = vector.broadcast %715 : vector<2x1xf32> to vector<2x16xf32>
    %717 = arith.mulf %716, %627 : vector<2x16xf32>
    %718 = arith.addf %713, %717 : vector<2x16xf32>
    %719 = vector.broadcast %687 : vector<2x1xf32> to vector<2x16xf32>
    %720 = arith.mulf %719, %665 : vector<2x16xf32>
    %721 = arith.index_cast %c7_i32_149 : i32 to index
    %c0_167 = arith.constant 0 : index
    %c0_168 = arith.constant 0 : index
    %722 = vector.load %arg4[%721, %c0_167, %c0_168] : memref<8x2x16xf32, #tpu.memory_space<vmem>>, vector<1x2x16xf32>
    %723 = vector.shape_cast %722 : vector<1x2x16xf32> to vector<2x16xf32>
    %724 = vector.shape_cast %720 : vector<2x16xf32> to vector<1x2x16xf32>
    tpu.vector_store %arg4[%721, %c0_167, %c0_168], %724 {strides = array<i32>} : memref<8x2x16xf32, #tpu.memory_space<vmem>>, vector<1x2x16xf32>,
    %725 = vector.broadcast %690 : vector<2x1xf32> to vector<2x16xf32>
    %726 = arith.mulf %725, %684 : vector<2x16xf32>
    %727 = arith.index_cast %640 : i32 to index
    %c0_169 = arith.constant 0 : index
    %c0_170 = arith.constant 0 : index
    %728 = vector.load %arg5[%727, %c0_169, %c0_170] : memref<8x2x16xf32, #tpu.memory_space<vmem>>, vector<1x2x16xf32>
    %729 = vector.shape_cast %728 : vector<1x2x16xf32> to vector<2x16xf32>
    %730 = vector.shape_cast %726 : vector<2x16xf32> to vector<1x2x16xf32>
    tpu.vector_store %arg5[%727, %c0_169, %c0_170], %730 {strides = array<i32>} : memref<8x2x16xf32, #tpu.memory_space<vmem>>, vector<1x2x16xf32>,
    %c8_i32 = arith.constant 8 : i32
    %c0_171 = arith.constant 0 : index
    %c0_172 = arith.constant 0 : index
    %731 = vector.load %arg6[%c0_171, %c0_172] : memref<2x16xf32, #tpu.memory_space<vmem>>, vector<2x16xf32>
    tpu.vector_store %arg6[%c0_171, %c0_172], %697 {strides = array<i32>} : memref<2x16xf32, #tpu.memory_space<vmem>>, vector<2x16xf32>,
    %c0_173 = arith.constant 0 : index
    %c0_174 = arith.constant 0 : index
    %732 = vector.load %arg7[%c0_173, %c0_174] : memref<2x16xf32, #tpu.memory_space<vmem>>, vector<2x16xf32>
    tpu.vector_store %arg7[%c0_173, %c0_174], %704 {strides = array<i32>} : memref<2x16xf32, #tpu.memory_space<vmem>>, vector<2x16xf32>,
    %c0_175 = arith.constant 0 : index
    %c0_176 = arith.constant 0 : index
    %733 = vector.load %arg8[%c0_175, %c0_176] : memref<2x16xf32, #tpu.memory_space<vmem>>, vector<2x16xf32>
    tpu.vector_store %arg8[%c0_175, %c0_176], %711 {strides = array<i32>} : memref<2x16xf32, #tpu.memory_space<vmem>>, vector<2x16xf32>,
    %c0_177 = arith.constant 0 : index
    %c0_178 = arith.constant 0 : index
    %734 = vector.load %arg9[%c0_177, %c0_178] : memref<2x16xf32, #tpu.memory_space<vmem>>, vector<2x16xf32>
    tpu.vector_store %arg9[%c0_177, %c0_178], %718 {strides = array<i32>} : memref<2x16xf32, #tpu.memory_space<vmem>>, vector<2x16xf32>,
    return
  }
}

module attributes {stable_mosaic.version = 11 : i64} {
  func.func @_matmul_bias_kernel(%arg0: memref<16x32xf32, #tpu.memory_space<vmem>>, %arg1: memref<32x128xf32, #tpu.memory_space<vmem>>, %arg2: memref<1x128xf32, #tpu.memory_space<vmem>>, %arg3: memref<16x128xf32, #tpu.memory_space<vmem>>) attributes {dimension_semantics = [], scalar_prefetch = 0 : i64, scratch_operands = 0 : i64, tpu.core_type = #tpu.core_type<tc>} {
    %c0 = arith.constant 0 : index
    %c0_0 = arith.constant 0 : index
    %0 = vector.load %arg0[%c0, %c0_0] : memref<16x32xf32, #tpu.memory_space<vmem>>, vector<16x32xf32>
    %c0_1 = arith.constant 0 : index
    %c0_2 = arith.constant 0 : index
    %1 = vector.load %arg1[%c0_1, %c0_2] : memref<32x128xf32, #tpu.memory_space<vmem>>, vector<32x128xf32>
    %cst = arith.constant dense<0.000000e+00> : vector<16x128xf32>
    %2 = tpu.matmul %0, %1, %cst {dimension_numbers = #tpu.dot_dimension_numbers<[1], [0], [0], [1], [0, 0, 1, 1], [], []>} : vector<16x32xf32>, vector<32x128xf32>, vector<16x128xf32> -> vector<16x128xf32>
    %c0_3 = arith.constant 0 : index
    %c0_4 = arith.constant 0 : index
    %3 = vector.load %arg2[%c0_3, %c0_4] : memref<1x128xf32, #tpu.memory_space<vmem>>, vector<1x128xf32>
    %4 = vector.broadcast %3 : vector<1x128xf32> to vector<16x128xf32>
    %5 = arith.addf %2, %4 : vector<16x128xf32>
    %c0_5 = arith.constant 0 : index
    %c0_6 = arith.constant 0 : index
    %6 = vector.load %arg3[%c0_5, %c0_6] : memref<16x128xf32, #tpu.memory_space<vmem>>, vector<16x128xf32>
    tpu.vector_store %arg3[%c0_5, %c0_6], %5 {strides = array<i32>} : memref<16x128xf32, #tpu.memory_space<vmem>>, vector<16x128xf32>,
    return
  }
}

module attributes {stable_mosaic.version = 11 : i64} {
  func.func @_matmul_bias_kernel(%arg0: memref<8x32xf32, #tpu.memory_space<vmem>>, %arg1: memref<32x128xf32, #tpu.memory_space<vmem>>, %arg2: memref<1x128xf32, #tpu.memory_space<vmem>>, %arg3: memref<8x128xf32, #tpu.memory_space<vmem>>) attributes {dimension_semantics = [], scalar_prefetch = 0 : i64, scratch_operands = 0 : i64, tpu.core_type = #tpu.core_type<tc>} {
    %c0 = arith.constant 0 : index
    %c0_0 = arith.constant 0 : index
    %0 = vector.load %arg0[%c0, %c0_0] : memref<8x32xf32, #tpu.memory_space<vmem>>, vector<8x32xf32>
    %c0_1 = arith.constant 0 : index
    %c0_2 = arith.constant 0 : index
    %1 = vector.load %arg1[%c0_1, %c0_2] : memref<32x128xf32, #tpu.memory_space<vmem>>, vector<32x128xf32>
    %cst = arith.constant dense<0.000000e+00> : vector<8x128xf32>
    %2 = tpu.matmul %0, %1, %cst {dimension_numbers = #tpu.dot_dimension_numbers<[1], [0], [0], [1], [0, 0, 1, 1], [], []>} : vector<8x32xf32>, vector<32x128xf32>, vector<8x128xf32> -> vector<8x128xf32>
    %c0_3 = arith.constant 0 : index
    %c0_4 = arith.constant 0 : index
    %3 = vector.load %arg2[%c0_3, %c0_4] : memref<1x128xf32, #tpu.memory_space<vmem>>, vector<1x128xf32>
    %4 = vector.broadcast %3 : vector<1x128xf32> to vector<8x128xf32>
    %5 = arith.addf %2, %4 : vector<8x128xf32>
    %c0_5 = arith.constant 0 : index
    %c0_6 = arith.constant 0 : index
    %6 = vector.load %arg3[%c0_5, %c0_6] : memref<8x128xf32, #tpu.memory_space<vmem>>, vector<8x128xf32>
    tpu.vector_store %arg3[%c0_5, %c0_6], %5 {strides = array<i32>} : memref<8x128xf32, #tpu.memory_space<vmem>>, vector<8x128xf32>,
    return
  }
}

module attributes {stable_mosaic.version = 11 : i64} {
  func.func @_lstm_scan_kernel(%arg0: memref<4x2x128xf32, #tpu.memory_space<vmem>>, %arg1: memref<4x2x1xf32, #tpu.memory_space<vmem>>, %arg2: memref<32x128xf32, #tpu.memory_space<vmem>>, %arg3: memref<2x32xf32, #tpu.memory_space<vmem>>, %arg4: memref<2x32xf32, #tpu.memory_space<vmem>>, %arg5: memref<4x2x32xf32, #tpu.memory_space<vmem>>, %arg6: memref<2x32xf32, #tpu.memory_space<vmem>>, %arg7: memref<2x32xf32, #tpu.memory_space<vmem>>) attributes {dimension_semantics = [], scalar_prefetch = 0 : i64, scratch_operands = 0 : i64, tpu.core_type = #tpu.core_type<tc>} {
    %c0 = arith.constant 0 : index
    %c0_0 = arith.constant 0 : index
    %0 = vector.load %arg2[%c0, %c0_0] : memref<32x128xf32, #tpu.memory_space<vmem>>, vector<32x128xf32>
    %c0_1 = arith.constant 0 : index
    %c0_2 = arith.constant 0 : index
    %1 = vector.load %arg3[%c0_1, %c0_2] : memref<2x32xf32, #tpu.memory_space<vmem>>, vector<2x32xf32>
    %c0_3 = arith.constant 0 : index
    %c0_4 = arith.constant 0 : index
    %2 = vector.load %arg4[%c0_3, %c0_4] : memref<2x32xf32, #tpu.memory_space<vmem>>, vector<2x32xf32>
    %c0_i32 = arith.constant 0 : i32
    %3 = arith.index_cast %c0_i32 : i32 to index
    %c0_5 = arith.constant 0 : index
    %c0_6 = arith.constant 0 : index
    %4 = vector.load %arg0[%3, %c0_5, %c0_6] : memref<4x2x128xf32, #tpu.memory_space<vmem>>, vector<1x2x128xf32>
    %5 = vector.shape_cast %4 : vector<1x2x128xf32> to vector<2x128xf32>
    %cst = arith.constant dense<0.000000e+00> : vector<2x128xf32>
    %6 = tpu.matmul %1, %0, %cst {dimension_numbers = #tpu.dot_dimension_numbers<[1], [0], [0], [1], [0, 0, 1, 1], [], []>} : vector<2x32xf32>, vector<32x128xf32>, vector<2x128xf32> -> vector<2x128xf32>
    %7 = arith.addf %5, %6 : vector<2x128xf32>
    %8 = vector.extract_strided_slice %7 {offsets = [0, 0], sizes = [2, 96], strides = [1, 1]} : vector<2x128xf32> to vector<2x96xf32>
    %9 = arith.negf %8 : vector<2x96xf32>
    %10 = math.exp %9 : vector<2x96xf32>
    %cst_7 = arith.constant 1.000000e+00 : f32
    %11 = vector.broadcast %cst_7 : f32 to vector<2x96xf32>
    %12 = arith.addf %11, %10 : vector<2x96xf32>
    %13 = arith.divf %11, %12 : vector<2x96xf32>
    %14 = vector.extract_strided_slice %7 {offsets = [0, 96], sizes = [2, 32], strides = [1, 1]} : vector<2x128xf32> to vector<2x32xf32>
    %15 = math.tanh %14 : vector<2x32xf32>
    %16 = vector.extract_strided_slice %13 {offsets = [0, 32], sizes = [2, 32], strides = [1, 1]} : vector<2x96xf32> to vector<2x32xf32>
    %17 = arith.mulf %16, %2 : vector<2x32xf32>
    %18 = vector.extract_strided_slice %13 {offsets = [0, 0], sizes = [2, 32], strides = [1, 1]} : vector<2x96xf32> to vector<2x32xf32>
    %19 = arith.mulf %18, %15 : vector<2x32xf32>
    %20 = arith.addf %17, %19 : vector<2x32xf32>
    %21 = vector.extract_strided_slice %13 {offsets = [0, 64], sizes = [2, 32], strides = [1, 1]} : vector<2x96xf32> to vector<2x32xf32>
    %22 = math.tanh %20 : vector<2x32xf32>
    %23 = arith.mulf %21, %22 : vector<2x32xf32>
    %24 = arith.index_cast %c0_i32 : i32 to index
    %c0_8 = arith.constant 0 : index
    %c0_9 = arith.constant 0 : index
    %25 = vector.load %arg1[%24, %c0_8, %c0_9] : memref<4x2x1xf32, #tpu.memory_space<vmem>>, vector<1x2x1xf32>
    %26 = vector.shape_cast %25 : vector<1x2x1xf32> to vector<2x1xf32>
    %27 = vector.broadcast %26 : vector<2x1xf32> to vector<2x32xf32>
    %28 = arith.mulf %27, %23 : vector<2x32xf32>
    %cst_10 = arith.constant 1.000000e+00 : f32
    %29 = vector.broadcast %cst_10 : f32 to vector<2x1xf32>
    %30 = arith.subf %29, %26 : vector<2x1xf32>
    %31 = vector.broadcast %30 : vector<2x1xf32> to vector<2x32xf32>
    %32 = arith.mulf %31, %1 : vector<2x32xf32>
    %33 = arith.addf %28, %32 : vector<2x32xf32>
    %34 = vector.broadcast %26 : vector<2x1xf32> to vector<2x32xf32>
    %35 = arith.mulf %34, %20 : vector<2x32xf32>
    %cst_11 = arith.constant 1.000000e+00 : f32
    %36 = vector.broadcast %cst_11 : f32 to vector<2x1xf32>
    %37 = arith.subf %36, %26 : vector<2x1xf32>
    %38 = vector.broadcast %37 : vector<2x1xf32> to vector<2x32xf32>
    %39 = arith.mulf %38, %2 : vector<2x32xf32>
    %40 = arith.addf %35, %39 : vector<2x32xf32>
    %41 = vector.broadcast %26 : vector<2x1xf32> to vector<2x32xf32>
    %42 = arith.mulf %41, %23 : vector<2x32xf32>
    %43 = arith.index_cast %c0_i32 : i32 to index
    %c0_12 = arith.constant 0 : index
    %c0_13 = arith.constant 0 : index
    %44 = vector.load %arg5[%43, %c0_12, %c0_13] : memref<4x2x32xf32, #tpu.memory_space<vmem>>, vector<1x2x32xf32>
    %45 = vector.shape_cast %44 : vector<1x2x32xf32> to vector<2x32xf32>
    %46 = vector.shape_cast %42 : vector<2x32xf32> to vector<1x2x32xf32>
    tpu.vector_store %arg5[%43, %c0_12, %c0_13], %46 {strides = array<i32>} : memref<4x2x32xf32, #tpu.memory_space<vmem>>, vector<1x2x32xf32>,
    %c1_i32 = arith.constant 1 : i32
    %47 = arith.index_cast %c1_i32 : i32 to index
    %c0_14 = arith.constant 0 : index
    %c0_15 = arith.constant 0 : index
    %48 = vector.load %arg0[%47, %c0_14, %c0_15] : memref<4x2x128xf32, #tpu.memory_space<vmem>>, vector<1x2x128xf32>
    %49 = vector.shape_cast %48 : vector<1x2x128xf32> to vector<2x128xf32>
    %cst_16 = arith.constant dense<0.000000e+00> : vector<2x128xf32>
    %50 = tpu.matmul %33, %0, %cst_16 {dimension_numbers = #tpu.dot_dimension_numbers<[1], [0], [0], [1], [0, 0, 1, 1], [], []>} : vector<2x32xf32>, vector<32x128xf32>, vector<2x128xf32> -> vector<2x128xf32>
    %51 = arith.addf %49, %50 : vector<2x128xf32>
    %52 = vector.extract_strided_slice %51 {offsets = [0, 0], sizes = [2, 96], strides = [1, 1]} : vector<2x128xf32> to vector<2x96xf32>
    %53 = arith.negf %52 : vector<2x96xf32>
    %54 = math.exp %53 : vector<2x96xf32>
    %cst_17 = arith.constant 1.000000e+00 : f32
    %55 = vector.broadcast %cst_17 : f32 to vector<2x96xf32>
    %56 = arith.addf %55, %54 : vector<2x96xf32>
    %57 = arith.divf %55, %56 : vector<2x96xf32>
    %58 = vector.extract_strided_slice %51 {offsets = [0, 96], sizes = [2, 32], strides = [1, 1]} : vector<2x128xf32> to vector<2x32xf32>
    %59 = math.tanh %58 : vector<2x32xf32>
    %60 = vector.extract_strided_slice %57 {offsets = [0, 32], sizes = [2, 32], strides = [1, 1]} : vector<2x96xf32> to vector<2x32xf32>
    %61 = arith.mulf %60, %40 : vector<2x32xf32>
    %62 = vector.extract_strided_slice %57 {offsets = [0, 0], sizes = [2, 32], strides = [1, 1]} : vector<2x96xf32> to vector<2x32xf32>
    %63 = arith.mulf %62, %59 : vector<2x32xf32>
    %64 = arith.addf %61, %63 : vector<2x32xf32>
    %65 = vector.extract_strided_slice %57 {offsets = [0, 64], sizes = [2, 32], strides = [1, 1]} : vector<2x96xf32> to vector<2x32xf32>
    %66 = math.tanh %64 : vector<2x32xf32>
    %67 = arith.mulf %65, %66 : vector<2x32xf32>
    %68 = arith.index_cast %c1_i32 : i32 to index
    %c0_18 = arith.constant 0 : index
    %c0_19 = arith.constant 0 : index
    %69 = vector.load %arg1[%68, %c0_18, %c0_19] : memref<4x2x1xf32, #tpu.memory_space<vmem>>, vector<1x2x1xf32>
    %70 = vector.shape_cast %69 : vector<1x2x1xf32> to vector<2x1xf32>
    %71 = vector.broadcast %70 : vector<2x1xf32> to vector<2x32xf32>
    %72 = arith.mulf %71, %67 : vector<2x32xf32>
    %cst_20 = arith.constant 1.000000e+00 : f32
    %73 = vector.broadcast %cst_20 : f32 to vector<2x1xf32>
    %74 = arith.subf %73, %70 : vector<2x1xf32>
    %75 = vector.broadcast %74 : vector<2x1xf32> to vector<2x32xf32>
    %76 = arith.mulf %75, %33 : vector<2x32xf32>
    %77 = arith.addf %72, %76 : vector<2x32xf32>
    %78 = vector.broadcast %70 : vector<2x1xf32> to vector<2x32xf32>
    %79 = arith.mulf %78, %64 : vector<2x32xf32>
    %cst_21 = arith.constant 1.000000e+00 : f32
    %80 = vector.broadcast %cst_21 : f32 to vector<2x1xf32>
    %81 = arith.subf %80, %70 : vector<2x1xf32>
    %82 = vector.broadcast %81 : vector<2x1xf32> to vector<2x32xf32>
    %83 = arith.mulf %82, %40 : vector<2x32xf32>
    %84 = arith.addf %79, %83 : vector<2x32xf32>
    %85 = vector.broadcast %70 : vector<2x1xf32> to vector<2x32xf32>
    %86 = arith.mulf %85, %67 : vector<2x32xf32>
    %87 = arith.index_cast %c1_i32 : i32 to index
    %c0_22 = arith.constant 0 : index
    %c0_23 = arith.constant 0 : index
    %88 = vector.load %arg5[%87, %c0_22, %c0_23] : memref<4x2x32xf32, #tpu.memory_space<vmem>>, vector<1x2x32xf32>
    %89 = vector.shape_cast %88 : vector<1x2x32xf32> to vector<2x32xf32>
    %90 = vector.shape_cast %86 : vector<2x32xf32> to vector<1x2x32xf32>
    tpu.vector_store %arg5[%87, %c0_22, %c0_23], %90 {strides = array<i32>} : memref<4x2x32xf32, #tpu.memory_space<vmem>>, vector<1x2x32xf32>,
    %c2_i32 = arith.constant 2 : i32
    %91 = arith.index_cast %c2_i32 : i32 to index
    %c0_24 = arith.constant 0 : index
    %c0_25 = arith.constant 0 : index
    %92 = vector.load %arg0[%91, %c0_24, %c0_25] : memref<4x2x128xf32, #tpu.memory_space<vmem>>, vector<1x2x128xf32>
    %93 = vector.shape_cast %92 : vector<1x2x128xf32> to vector<2x128xf32>
    %cst_26 = arith.constant dense<0.000000e+00> : vector<2x128xf32>
    %94 = tpu.matmul %77, %0, %cst_26 {dimension_numbers = #tpu.dot_dimension_numbers<[1], [0], [0], [1], [0, 0, 1, 1], [], []>} : vector<2x32xf32>, vector<32x128xf32>, vector<2x128xf32> -> vector<2x128xf32>
    %95 = arith.addf %93, %94 : vector<2x128xf32>
    %96 = vector.extract_strided_slice %95 {offsets = [0, 0], sizes = [2, 96], strides = [1, 1]} : vector<2x128xf32> to vector<2x96xf32>
    %97 = arith.negf %96 : vector<2x96xf32>
    %98 = math.exp %97 : vector<2x96xf32>
    %cst_27 = arith.constant 1.000000e+00 : f32
    %99 = vector.broadcast %cst_27 : f32 to vector<2x96xf32>
    %100 = arith.addf %99, %98 : vector<2x96xf32>
    %101 = arith.divf %99, %100 : vector<2x96xf32>
    %102 = vector.extract_strided_slice %95 {offsets = [0, 96], sizes = [2, 32], strides = [1, 1]} : vector<2x128xf32> to vector<2x32xf32>
    %103 = math.tanh %102 : vector<2x32xf32>
    %104 = vector.extract_strided_slice %101 {offsets = [0, 32], sizes = [2, 32], strides = [1, 1]} : vector<2x96xf32> to vector<2x32xf32>
    %105 = arith.mulf %104, %84 : vector<2x32xf32>
    %106 = vector.extract_strided_slice %101 {offsets = [0, 0], sizes = [2, 32], strides = [1, 1]} : vector<2x96xf32> to vector<2x32xf32>
    %107 = arith.mulf %106, %103 : vector<2x32xf32>
    %108 = arith.addf %105, %107 : vector<2x32xf32>
    %109 = vector.extract_strided_slice %101 {offsets = [0, 64], sizes = [2, 32], strides = [1, 1]} : vector<2x96xf32> to vector<2x32xf32>
    %110 = math.tanh %108 : vector<2x32xf32>
    %111 = arith.mulf %109, %110 : vector<2x32xf32>
    %112 = arith.index_cast %c2_i32 : i32 to index
    %c0_28 = arith.constant 0 : index
    %c0_29 = arith.constant 0 : index
    %113 = vector.load %arg1[%112, %c0_28, %c0_29] : memref<4x2x1xf32, #tpu.memory_space<vmem>>, vector<1x2x1xf32>
    %114 = vector.shape_cast %113 : vector<1x2x1xf32> to vector<2x1xf32>
    %115 = vector.broadcast %114 : vector<2x1xf32> to vector<2x32xf32>
    %116 = arith.mulf %115, %111 : vector<2x32xf32>
    %cst_30 = arith.constant 1.000000e+00 : f32
    %117 = vector.broadcast %cst_30 : f32 to vector<2x1xf32>
    %118 = arith.subf %117, %114 : vector<2x1xf32>
    %119 = vector.broadcast %118 : vector<2x1xf32> to vector<2x32xf32>
    %120 = arith.mulf %119, %77 : vector<2x32xf32>
    %121 = arith.addf %116, %120 : vector<2x32xf32>
    %122 = vector.broadcast %114 : vector<2x1xf32> to vector<2x32xf32>
    %123 = arith.mulf %122, %108 : vector<2x32xf32>
    %cst_31 = arith.constant 1.000000e+00 : f32
    %124 = vector.broadcast %cst_31 : f32 to vector<2x1xf32>
    %125 = arith.subf %124, %114 : vector<2x1xf32>
    %126 = vector.broadcast %125 : vector<2x1xf32> to vector<2x32xf32>
    %127 = arith.mulf %126, %84 : vector<2x32xf32>
    %128 = arith.addf %123, %127 : vector<2x32xf32>
    %129 = vector.broadcast %114 : vector<2x1xf32> to vector<2x32xf32>
    %130 = arith.mulf %129, %111 : vector<2x32xf32>
    %131 = arith.index_cast %c2_i32 : i32 to index
    %c0_32 = arith.constant 0 : index
    %c0_33 = arith.constant 0 : index
    %132 = vector.load %arg5[%131, %c0_32, %c0_33] : memref<4x2x32xf32, #tpu.memory_space<vmem>>, vector<1x2x32xf32>
    %133 = vector.shape_cast %132 : vector<1x2x32xf32> to vector<2x32xf32>
    %134 = vector.shape_cast %130 : vector<2x32xf32> to vector<1x2x32xf32>
    tpu.vector_store %arg5[%131, %c0_32, %c0_33], %134 {strides = array<i32>} : memref<4x2x32xf32, #tpu.memory_space<vmem>>, vector<1x2x32xf32>,
    %c3_i32 = arith.constant 3 : i32
    %135 = arith.index_cast %c3_i32 : i32 to index
    %c0_34 = arith.constant 0 : index
    %c0_35 = arith.constant 0 : index
    %136 = vector.load %arg0[%135, %c0_34, %c0_35] : memref<4x2x128xf32, #tpu.memory_space<vmem>>, vector<1x2x128xf32>
    %137 = vector.shape_cast %136 : vector<1x2x128xf32> to vector<2x128xf32>
    %cst_36 = arith.constant dense<0.000000e+00> : vector<2x128xf32>
    %138 = tpu.matmul %121, %0, %cst_36 {dimension_numbers = #tpu.dot_dimension_numbers<[1], [0], [0], [1], [0, 0, 1, 1], [], []>} : vector<2x32xf32>, vector<32x128xf32>, vector<2x128xf32> -> vector<2x128xf32>
    %139 = arith.addf %137, %138 : vector<2x128xf32>
    %140 = vector.extract_strided_slice %139 {offsets = [0, 0], sizes = [2, 96], strides = [1, 1]} : vector<2x128xf32> to vector<2x96xf32>
    %141 = arith.negf %140 : vector<2x96xf32>
    %142 = math.exp %141 : vector<2x96xf32>
    %cst_37 = arith.constant 1.000000e+00 : f32
    %143 = vector.broadcast %cst_37 : f32 to vector<2x96xf32>
    %144 = arith.addf %143, %142 : vector<2x96xf32>
    %145 = arith.divf %143, %144 : vector<2x96xf32>
    %146 = vector.extract_strided_slice %139 {offsets = [0, 96], sizes = [2, 32], strides = [1, 1]} : vector<2x128xf32> to vector<2x32xf32>
    %147 = math.tanh %146 : vector<2x32xf32>
    %148 = vector.extract_strided_slice %145 {offsets = [0, 32], sizes = [2, 32], strides = [1, 1]} : vector<2x96xf32> to vector<2x32xf32>
    %149 = arith.mulf %148, %128 : vector<2x32xf32>
    %150 = vector.extract_strided_slice %145 {offsets = [0, 0], sizes = [2, 32], strides = [1, 1]} : vector<2x96xf32> to vector<2x32xf32>
    %151 = arith.mulf %150, %147 : vector<2x32xf32>
    %152 = arith.addf %149, %151 : vector<2x32xf32>
    %153 = vector.extract_strided_slice %145 {offsets = [0, 64], sizes = [2, 32], strides = [1, 1]} : vector<2x96xf32> to vector<2x32xf32>
    %154 = math.tanh %152 : vector<2x32xf32>
    %155 = arith.mulf %153, %154 : vector<2x32xf32>
    %156 = arith.index_cast %c3_i32 : i32 to index
    %c0_38 = arith.constant 0 : index
    %c0_39 = arith.constant 0 : index
    %157 = vector.load %arg1[%156, %c0_38, %c0_39] : memref<4x2x1xf32, #tpu.memory_space<vmem>>, vector<1x2x1xf32>
    %158 = vector.shape_cast %157 : vector<1x2x1xf32> to vector<2x1xf32>
    %159 = vector.broadcast %158 : vector<2x1xf32> to vector<2x32xf32>
    %160 = arith.mulf %159, %155 : vector<2x32xf32>
    %cst_40 = arith.constant 1.000000e+00 : f32
    %161 = vector.broadcast %cst_40 : f32 to vector<2x1xf32>
    %162 = arith.subf %161, %158 : vector<2x1xf32>
    %163 = vector.broadcast %162 : vector<2x1xf32> to vector<2x32xf32>
    %164 = arith.mulf %163, %121 : vector<2x32xf32>
    %165 = arith.addf %160, %164 : vector<2x32xf32>
    %166 = vector.broadcast %158 : vector<2x1xf32> to vector<2x32xf32>
    %167 = arith.mulf %166, %152 : vector<2x32xf32>
    %cst_41 = arith.constant 1.000000e+00 : f32
    %168 = vector.broadcast %cst_41 : f32 to vector<2x1xf32>
    %169 = arith.subf %168, %158 : vector<2x1xf32>
    %170 = vector.broadcast %169 : vector<2x1xf32> to vector<2x32xf32>
    %171 = arith.mulf %170, %128 : vector<2x32xf32>
    %172 = arith.addf %167, %171 : vector<2x32xf32>
    %173 = vector.broadcast %158 : vector<2x1xf32> to vector<2x32xf32>
    %174 = arith.mulf %173, %155 : vector<2x32xf32>
    %175 = arith.index_cast %c3_i32 : i32 to index
    %c0_42 = arith.constant 0 : index
    %c0_43 = arith.constant 0 : index
    %176 = vector.load %arg5[%175, %c0_42, %c0_43] : memref<4x2x32xf32, #tpu.memory_space<vmem>>, vector<1x2x32xf32>
    %177 = vector.shape_cast %176 : vector<1x2x32xf32> to vector<2x32xf32>
    %178 = vector.shape_cast %174 : vector<2x32xf32> to vector<1x2x32xf32>
    tpu.vector_store %arg5[%175, %c0_42, %c0_43], %178 {strides = array<i32>} : memref<4x2x32xf32, #tpu.memory_space<vmem>>, vector<1x2x32xf32>,
    %c4_i32 = arith.constant 4 : i32
    %c0_44 = arith.constant 0 : index
    %c0_45 = arith.constant 0 : index
    %179 = vector.load %arg6[%c0_44, %c0_45] : memref<2x32xf32, #tpu.memory_space<vmem>>, vector<2x32xf32>
    tpu.vector_store %arg6[%c0_44, %c0_45], %165 {strides = array<i32>} : memref<2x32xf32, #tpu.memory_space<vmem>>, vector<2x32xf32>,
    %c0_46 = arith.constant 0 : index
    %c0_47 = arith.constant 0 : index
    %180 = vector.load %arg7[%c0_46, %c0_47] : memref<2x32xf32, #tpu.memory_space<vmem>>, vector<2x32xf32>
    tpu.vector_store %arg7[%c0_46, %c0_47], %172 {strides = array<i32>} : memref<2x32xf32, #tpu.memory_space<vmem>>, vector<2x32xf32>,
    return
  }
}

module attributes {stable_mosaic.version = 11 : i64} {
  func.func @_cond_score_kernel(%arg0: memref<16x32xf32, #tpu.memory_space<vmem>>, %arg1: memref<8x32xf32, #tpu.memory_space<vmem>>, %arg2: memref<32x32xf32, #tpu.memory_space<vmem>>, %arg3: memref<1x32xf32, #tpu.memory_space<vmem>>, %arg4: memref<32x32xf32, #tpu.memory_space<vmem>>, %arg5: memref<1x32xf32, #tpu.memory_space<vmem>>, %arg6: memref<1x1x32xf32, #tpu.memory_space<vmem>>, %arg7: memref<2xi32, #tpu.memory_space<smem>>, %arg8: memref<1xf32, #tpu.memory_space<smem>>, %arg9: memref<2x4x8xf32, #tpu.memory_space<vmem>>) attributes {dimension_semantics = [], scalar_prefetch = 0 : i64, scratch_operands = 0 : i64, tpu.core_type = #tpu.core_type<tc>} {
    %c0 = arith.constant 0 : index
    %c0_0 = arith.constant 0 : index
    %0 = vector.load %arg0[%c0, %c0_0] : memref<16x32xf32, #tpu.memory_space<vmem>>, vector<16x32xf32>
    %c0_1 = arith.constant 0 : index
    %c0_2 = arith.constant 0 : index
    %1 = vector.load %arg2[%c0_1, %c0_2] : memref<32x32xf32, #tpu.memory_space<vmem>>, vector<32x32xf32>
    %cst = arith.constant dense<0.000000e+00> : vector<16x32xf32>
    %2 = tpu.matmul %0, %1, %cst {dimension_numbers = #tpu.dot_dimension_numbers<[1], [0], [0], [1], [0, 0, 1, 1], [], []>} : vector<16x32xf32>, vector<32x32xf32>, vector<16x32xf32> -> vector<16x32xf32>
    %c0_3 = arith.constant 0 : index
    %c0_4 = arith.constant 0 : index
    %3 = vector.load %arg3[%c0_3, %c0_4] : memref<1x32xf32, #tpu.memory_space<vmem>>, vector<1x32xf32>
    %4 = vector.broadcast %3 : vector<1x32xf32> to vector<16x32xf32>
    %5 = arith.addf %2, %4 : vector<16x32xf32>
    %c0_5 = arith.constant 0 : index
    %c0_6 = arith.constant 0 : index
    %6 = vector.load %arg1[%c0_5, %c0_6] : memref<8x32xf32, #tpu.memory_space<vmem>>, vector<8x32xf32>
    %c0_7 = arith.constant 0 : index
    %c0_8 = arith.constant 0 : index
    %7 = vector.load %arg4[%c0_7, %c0_8] : memref<32x32xf32, #tpu.memory_space<vmem>>, vector<32x32xf32>
    %cst_9 = arith.constant dense<0.000000e+00> : vector<8x32xf32>
    %8 = tpu.matmul %6, %7, %cst_9 {dimension_numbers = #tpu.dot_dimension_numbers<[1], [0], [0], [1], [0, 0, 1, 1], [], []>} : vector<8x32xf32>, vector<32x32xf32>, vector<8x32xf32> -> vector<8x32xf32>
    %c0_10 = arith.constant 0 : index
    %c0_11 = arith.constant 0 : index
    %9 = vector.load %arg5[%c0_10, %c0_11] : memref<1x32xf32, #tpu.memory_space<vmem>>, vector<1x32xf32>
    %10 = vector.broadcast %9 : vector<1x32xf32> to vector<8x32xf32>
    %11 = arith.addf %8, %10 : vector<8x32xf32>
    %c0_12 = arith.constant 0 : index
    %c0_13 = arith.constant 0 : index
    %c0_14 = arith.constant 0 : index
    %12 = vector.load %arg6[%c0_12, %c0_13, %c0_14] : memref<1x1x32xf32, #tpu.memory_space<vmem>>, vector<1x1x32xf32>
    %c0_15 = arith.constant 0 : index
    %13 = memref.load %arg8[%c0_15] : memref<1xf32, #tpu.memory_space<smem>>
    %14 = vector.extract_strided_slice %5 {offsets = [0, 0], sizes = [8, 32], strides = [1, 1]} : vector<16x32xf32> to vector<8x32xf32>
    %15 = vector.extract_strided_slice %11 {offsets = [0, 0], sizes = [4, 32], strides = [1, 1]} : vector<8x32xf32> to vector<4x32xf32>
    %16 = vector.shape_cast %14 : vector<8x32xf32> to vector<1x8x32xf32>
    %17 = vector.shape_cast %15 : vector<4x32xf32> to vector<4x1x32xf32>
    %18 = vector.broadcast %16 : vector<1x8x32xf32> to vector<4x8x32xf32>
    %19 = vector.broadcast %17 : vector<4x1x32xf32> to vector<4x8x32xf32>
    %20 = arith.addf %18, %19 : vector<4x8x32xf32>
    %21 = math.tanh %20 : vector<4x8x32xf32>
    %22 = vector.broadcast %12 : vector<1x1x32xf32> to vector<4x8x32xf32>
    %23 = arith.mulf %21, %22 : vector<4x8x32xf32>
    %cst_16 = arith.constant dense<0.000000e+00> : vector<4x8xf32>
    %24 = vector.multi_reduction <add>, %23, %cst_16 [2] : vector<4x8x32xf32> to vector<4x8xf32>
    %25 = vector.broadcast %13 : f32 to vector<4x8xf32>
    %26 = arith.addf %24, %25 : vector<4x8xf32>
    %27 = tpu.iota {dimensions = array<i32: 1>} : vector<4x8xi32>
    %c0_17 = arith.constant 0 : index
    %28 = memref.load %arg7[%c0_17] : memref<2xi32, #tpu.memory_space<smem>>
    %29 = vector.broadcast %28 : i32 to vector<4x8xi32>
    %30 = arith.cmpi slt, %27, %29 : vector<4x8xi32>
    %cst_18 = arith.constant -1.000000e+02 : f32
    %31 = vector.broadcast %cst_18 : f32 to vector<4x8xf32>
    %32 = arith.select %30, %26, %31 : vector<4x8xi1>, vector<4x8xf32>
    %c0_19 = arith.constant 0 : index
    %c0_20 = arith.constant 0 : index
    %c0_21 = arith.constant 0 : index
    %33 = vector.load %arg9[%c0_19, %c0_20, %c0_21] : memref<2x4x8xf32, #tpu.memory_space<vmem>>, vector<1x4x8xf32>
    %34 = vector.shape_cast %33 : vector<1x4x8xf32> to vector<4x8xf32>
    %35 = vector.shape_cast %32 : vector<4x8xf32> to vector<1x4x8xf32>
    tpu.vector_store %arg9[%c0_19, %c0_20, %c0_21], %35 {strides = array<i32>} : memref<2x4x8xf32, #tpu.memory_space<vmem>>, vector<1x4x8xf32>,
    %36 = vector.extract_strided_slice %5 {offsets = [8, 0], sizes = [8, 32], strides = [1, 1]} : vector<16x32xf32> to vector<8x32xf32>
    %37 = vector.extract_strided_slice %11 {offsets = [4, 0], sizes = [4, 32], strides = [1, 1]} : vector<8x32xf32> to vector<4x32xf32>
    %38 = vector.shape_cast %36 : vector<8x32xf32> to vector<1x8x32xf32>
    %39 = vector.shape_cast %37 : vector<4x32xf32> to vector<4x1x32xf32>
    %40 = vector.broadcast %38 : vector<1x8x32xf32> to vector<4x8x32xf32>
    %41 = vector.broadcast %39 : vector<4x1x32xf32> to vector<4x8x32xf32>
    %42 = arith.addf %40, %41 : vector<4x8x32xf32>
    %43 = math.tanh %42 : vector<4x8x32xf32>
    %44 = vector.broadcast %12 : vector<1x1x32xf32> to vector<4x8x32xf32>
    %45 = arith.mulf %43, %44 : vector<4x8x32xf32>
    %cst_22 = arith.constant dense<0.000000e+00> : vector<4x8xf32>
    %46 = vector.multi_reduction <add>, %45, %cst_22 [2] : vector<4x8x32xf32> to vector<4x8xf32>
    %47 = vector.broadcast %13 : f32 to vector<4x8xf32>
    %48 = arith.addf %46, %47 : vector<4x8xf32>
    %49 = tpu.iota {dimensions = array<i32: 1>} : vector<4x8xi32>
    %c1 = arith.constant 1 : index
    %50 = memref.load %arg7[%c1] : memref<2xi32, #tpu.memory_space<smem>>
    %51 = vector.broadcast %50 : i32 to vector<4x8xi32>
    %52 = arith.cmpi slt, %49, %51 : vector<4x8xi32>
    %cst_23 = arith.constant -1.000000e+02 : f32
    %53 = vector.broadcast %cst_23 : f32 to vector<4x8xf32>
    %54 = arith.select %52, %48, %53 : vector<4x8xi1>, vector<4x8xf32>
    %c1_24 = arith.constant 1 : index
    %c0_25 = arith.constant 0 : index
    %c0_26 = arith.constant 0 : index
    %55 = vector.load %arg9[%c1_24, %c0_25, %c0_26] : memref<2x4x8xf32, #tpu.memory_space<vmem>>, vector<1x4x8xf32>
    %56 = vector.shape_cast %55 : vector<1x4x8xf32> to vector<4x8xf32>
    %57 = vector.shape_cast %54 : vector<4x8xf32> to vector<1x4x8xf32>
    tpu.vector_store %arg9[%c1_24, %c0_25, %c0_26], %57 {strides = array<i32>} : memref<2x4x8xf32, #tpu.memory_space<vmem>>, vector<1x4x8xf32>,
    return
  }
}

</mosaic_0001>

<bundles_post_ra>
// kernel: _forward_core.8
= control target key start
LH: loop header
LB: loop body
LE: loop exit
PB: predicated region body
PF: predicated region fallthrough
CT: control target
= control target key end

     0   :  { %vm25_vm0 = vcmask 130048   ;;  %s172_s1 = inlined_call_operand.vmem [shape: f32[16,128], index: 1, kind: input, shape index: {}]   ;;  %s173_s0 = inlined_call_operand.vmem [shape: f32[16,16], index: 0, kind: input, shape index: {}]   ;;  %s174_s2 = inlined_call_operand.vmem [shape: f32[1,128], index: 2, kind: input, shape index: {}]   ;;  %s175_s3 = inlined_call_operand.vmem [shape: f32[16,128], index: 3, kind: output, shape index: {}]  }
   0x1   :  { %v16_v0 = vld [vmem:[%s172_s1] sm:$0xff]  ;;  %v17_v1 = vld [vmem:[%s172_s1 + $0x8] sm:$0xff] }
   0x2   :  { %v14_v2 = vld [vmem:[%s173_s0] sm:$0xff]  ;;  %v127_v3 = vpack.c.bf16 %v17_v1, %v16_v0  ;;  %v15_v4 = vld [vmem:[%s173_s0 + $0x8] sm:$0xff] }
   0x3   :  { %124 = vmatprep.mubr.msk.f32.mxu0 %vm25_vm0, %v14_v2  ;;  %v113_v5 = vld [vmem:[%s174_s2] ss:$0 sm:$0xff] }
   0x4   :  { %128 = vmatprep.subr.bf16.mxu0 %v127_v3 }
   0x5   :  { %130 = vmatpush3.bf16.msra.mxu0 %v127_v3 }
   0x8   :  { %125 = vmatmul.mubr.msk.f32.vlgmr.msra.gmra.mrb[0].mxu0 %vm25_vm0, %v15_v4 }
  0xdb   :  { %v126_v6 = vpop.f32.mrb[0].mxu0 }
  0xdc   :  { %v104_v7 = vadd.f32 %v126_v6, %v113_v5  ;;  %v98_v8 = vpop.f32.mrb[1].mxu0 }
  0xdd   :  { %v99_v9 = vadd.f32 %v113_v5, %v98_v8 }
  0xde   :  { %108 = vst [vmem:[%s175_s3 + $0x8] sm:$0xff] %v104_v7 }
  0xdf   :  { %107 = vst [vmem:[%s175_s3] sm:$0xff] %v99_v9 }

// kernel: _forward_core.10
= control target key start
LH: loop header
LB: loop body
LE: loop exit
PB: predicated region body
PF: predicated region fallthrough
CT: control target
= control target key end

     0   :  { %vm27_vm0 = vcmask 261120   ;;  %s190_s1 = inlined_call_operand.vmem [shape: f32[32,128], index: 1, kind: input, shape index: {}]   ;;  %s191_s0 = inlined_call_operand.vmem [shape: f32[16,32], index: 0, kind: input, shape index: {}]   ;;  %s192_s2 = inlined_call_operand.vmem [shape: f32[1,128], index: 2, kind: input, shape index: {}]   ;;  %s193_s3 = inlined_call_operand.vmem [shape: f32[16,128], index: 3, kind: output, shape index: {}]  }
   0x1   :  { %v16_v0 = vld [vmem:[%s190_s1] sm:$0xff]  ;;  %v17_v1 = vld [vmem:[%s190_s1 + $0x8] sm:$0xff]  ;;  %v18_v2 = vld [vmem:[%s190_s1 + $0x10] sm:$0xff] }
   0x2   :  { %v135_v3 = vpack.c.bf16 %v17_v1, %v16_v0  ;;  %v19_v4 = vld [vmem:[%s190_s1 + $0x18] sm:$0xff]  ;;  %v14_v5 = vld [vmem:[%s191_s0] sm:$0xff]  ;;  %v15_v7 = vld [vmem:[%s191_s0 + $0x8] sm:$0xff] }
   0x3   :  { %v139_v6 = vpack.c.bf16 %v19_v4, %v18_v2  ;;  %132 = vmatprep.mubr.msk.f32.mxu0 %vm27_vm0, %v14_v5  ;;  %v115_v8 = vld [vmem:[%s192_s2] ss:$0 sm:$0xff] }
   0x4   :  { %136 = vmatprep.subr.bf16.mxu0 %v135_v3 }
   0x5   :  { %138 = vmatpush3.bf16.msra.mxu0 %v135_v3 }
   0x6   :  { %140 = vmatprep.subr.bf16.mxu0 %v139_v6 }
   0x9   :  { %142 = vmatpush3.bf16.msra.mxu0 %v139_v6 }
   0xc   :  { %133 = vmatmul.mubr.msk.f32.vlgmr.msra.gmra.mrb[0].mxu0 %vm27_vm0, %v15_v7 }
  0xdf   :  { %v134_v9 = vpop.f32.mrb[0].mxu0 }
  0xe0   :  { %v106_v10 = vadd.f32 %v134_v9, %v115_v8  ;;  %v100_v11 = vpop.f32.mrb[1].mxu0 }
  0xe1   :  { %v101_v12 = vadd.f32 %v115_v8, %v100_v11 }
  0xe2   :  { %110 = vst [vmem:[%s193_s3 + $0x8] sm:$0xff] %v106_v10 }
  0xe3   :  { %109 = vst [vmem:[%s193_s3] sm:$0xff] %v101_v12 }

// kernel: _forward_core.13
= control target key start
LH: loop header
LB: loop body
LE: loop exit
PB: predicated region body
PF: predicated region fallthrough
CT: control target
= control target key end

     0   :  { %v132_v0 = vmov 0.0|0.0   ;;  %vm133_vm0 = vmmov 0   ;;  %v134_v4 = vmov 0.0   ;;  %vm26_vm1 = vcmask 261120   ;;  %s176_s1 = inlined_call_operand.vmem [shape: f32[32,128], index: 1, kind: input, shape index: {}]   ;;  %s177_s0 = inlined_call_operand.vmem [shape: f32[8,32], index: 0, kind: input, shape index: {}]   ;;  %s178_s2 = inlined_call_operand.vmem [shape: f32[1,128], index: 2, kind: input, shape index: {}]   ;;  %s179_s3 = inlined_call_operand.vmem [shape: f32[8,128], index: 3, kind: output, shape index: {}]  }
   0x1   :  { %123 = vmatprep.subr.bf16.mxu0 %v132_v0  ;;  %v15_v1 = vld [vmem:[%s176_s1] sm:$0xff]  ;;  %v16_v2 = vld [vmem:[%s176_s1 + $0x8] sm:$0xff]  ;;  %v17_v3 = vld [vmem:[%s176_s1 + $0x10] sm:$0xff]  ;;  %120 = vmatprep.mubr.msk.f32.mxu0 %vm133_vm0, %v134_v4 }
   0x2   :  { %v124_v5 = vpack.c.bf16 %v16_v2, %v15_v1  ;;  %v18_v6 = vld [vmem:[%s176_s1 + $0x18] sm:$0xff]  ;;  %v14_v8 = vld [vmem:[%s177_s0] sm:$0xff] }
   0x3   :  { %v127_v7 = vpack.c.bf16 %v18_v6, %v17_v3  ;;  %v105_v9 = vld [vmem:[%s178_s2] ss:$0 sm:$0xff] }
   0x4   :  { %125 = vmatpush3.bf16.msra.mxu0 %v124_v5 }
   0x5   :  { %126 = vmatprep.subr.bf16.mxu0 %v132_v0 }
   0x8   :  { %128 = vmatpush3.bf16.msra.mxu0 %v127_v7 }
   0xb   :  { %121 = vmatmul.mubr.msk.f32.vlgmr.msra.gmra.mrb[0].mxu0 %vm26_vm1, %v14_v8 }
  0xde   :  { %v96_v10 = vpop.f32.mrb[0].mxu0 }
  0xdf   :  { %v97_v11 = vadd.f32 %v105_v9, %v96_v10  ;;  %v122_v12 = vpop.f32.mrb[1].mxu0 }
  0xe1   :  { %100 = vst [vmem:[%s179_s3] sm:$0xff] %v97_v11 }

// kernel: _forward_core.9
= control target key start
LH: loop header
LB: loop body
LE: loop exit
PB: predicated region body
PF: predicated region fallthrough
CT: control target
= control target key end

     0   :  { %v2529_v0 = vmov 0.0|0.0   ;;  %vm2530_vm0 = vmmov 0   ;;  %v2531_v3 = vmov 0.0   ;;  %s2532_s16 = smov 64   ;;  %v2533_v10 = vmov 0   ;;  %s2534_s22 = smov 80   ;;  %s3223_s3 = inlined_call_operand.vmem [shape: f32[16,64], index: 3, kind: input, shape index: {}]   ;;  %s3224_s2 = inlined_call_operand.vmem [shape: f32[16,64], index: 2, kind: input, shape index: {}]   ;;  %s3225_s0 = inlined_call_operand.vmem [shape: f32[8,2,128], index: 0, kind: input, shape index: {}]   ;;  %s3226_s1 = inlined_call_operand.vmem [shape: f32[8,2,1], index: 1, kind: input, shape index: {}]   ;;  %s3227_s4 = inlined_call_operand.vmem [shape: f32[8,2,16], index: 4, kind: output, shape index: {0}]   ;;  %s3228_s5 = inlined_call_operand.vmem [shape: f32[8,2,16], index: 5, kind: output, shape index: {1}]   ;;  %s3229_s6 = inlined_call_operand.vmem [shape: f32[2,16], index: 6, kind: output, shape index: {2}]   ;;  %s3230_s7 = inlined_call_operand.vmem [shape: f32[2,16], index: 7, kind: output, shape index: {3}]   ;;  %s3231_s8 = inlined_call_operand.vmem [shape: f32[2,16], index: 8, kind: output, shape index: {4}]   ;;  %s3232_s9 = inlined_call_operand.vmem [shape: f32[2,16], index: 9, kind: output, shape index: {5}]  }
   0x1   :  { %2343 = vmatprep.subr.bf16.mxu1 %v2529_v0  ;;  %v25_v1 = vld [vmem:[%s3223_s3] sm:$0xff]  ;;  %v26_v2 = vld [vmem:[%s3223_s3 + $0x8] sm:$0xff]  ;;  %2239 = vmatprep.mubr.msk.f32.mxu1 %vm2530_vm0, %v2531_v3  ;;  %s2535_s23 = smov 16   ;;  %s2536_s26 = smov 32   ;;  %vm30_vm1 = vcmask 130048   ;;  %vm267_vm2 = vcmask 123904  }
   0x2   :  { %v2599_v4 = vpack.c.bf16 %v26_v2, %v25_v1  ;;  %2340 = vmatprep.subr.bf16.mxu0 %v2529_v0  ;;  %2232 = vmatprep.mubr.msk.f32.mxu0 %vm2530_vm0, %v2531_v3  ;;  %v23_v5 = vld [vmem:[%s3224_s2] sm:$0xff]  ;;  %v24_v6 = vld [vmem:[%s3224_s2 + $0x8] sm:$0xff]  ;;  %s2537_s10 = smov 96   ;;  %s2538_s28 = smov 112  }
   0x3   :  { %v2617_v7 = vpack.c.bf16 %v24_v6, %v23_v5  ;;  %2400 = vset.pattern.permute.xlu0 %v2533_v10  ;;  %2399 = vset.pattern.permute.xlu1 %v2533_v10  ;;  %v2108_v13 = vld [vmem:[%s3225_s0 + $0xe] sm:$0x3]  ;;  %v27_v16 = vld [vmem:[%s3225_s0] sm:$0x3]  ;;  %v2114_v54 = vld [vmem:[%s3225_s0 + $0xc] sm:$0x3] }
   0x4   :  { %2345 = vmatpush3.bf16.msra.mxu1 %v2599_v4  ;;  %v2111_v18 = vld [vmem:[%s3226_s1 + $0xe] sm:$0x3]  ;;  %v228_v34 = vld [vmem:[%s3226_s1] sm:$0x3]  ;;  %v2120_v1 = vld [vmem:[%s3226_s1 + $0xc] sm:$0x3] }
   0x5   :  { %2349 = vmatprep.subr.bf16.mxu1 %v2529_v0  ;;  %2342 = vmatpush3.bf16.msra.mxu0 %v2617_v7  ;;  %v253_v20 = vsub.f32 1.0, %v2111_v18  ;;  %v237_v36 = vsub.f32 1.0, %v228_v34  ;;  %v510_v5 = vsub.f32 1.0, %v2120_v1  ;;  %s2539_s21 = smov 48  }
   0x6   :  { %2346 = vmatprep.subr.bf16.mxu0 %v2529_v0 }
   0x7   :  { %2240 = vmatmul.mubr.f32.vlgmr.msra.gmra.mrb[0].mxu1 %v2531_v3 }
   0x8   :  { %2351 = vmatpush3.bf16.msra.mxu1 %v2599_v4  ;;  %2253 = vmatprep.mubr.msk.f32.mxu1 %vm2530_vm0, %v2531_v3 }
   0x9   :  { %2355 = vmatprep.subr.bf16.mxu1 %v2529_v0  ;;  %2233 = vmatmul.mubr.f32.vlgmr.msra.gmra.mrb[0].mxu0 %v2531_v3 }
   0xa   :  { %2348 = vmatpush3.bf16.msra.mxu0 %v2617_v7  ;;  %2246 = vmatprep.mubr.msk.f32.mxu0 %vm2530_vm0, %v2531_v3 }
   0xb   :  { %2352 = vmatprep.subr.bf16.mxu0 %v2529_v0 }
  0xda   :  { %v195_v8 = vpop.f32.mrb[0].mxu1 }
  0xdb   :  { %200 = vrot.lane.b32.xlu0 %v195_v8, %s2532_s16  ;;  %v2241_v9 = vpop.f32.mrb[1].mxu1 }
  0xdc   :  { %v100_v11 = vpop.f32.mrb[0].mxu0 }
  0xdd   :  { %v2234_v12 = vpop.f32.mrb[1].mxu0  ;;  %v104_v17 = vadd.f32 %v100_v11, %v27_v16 }
  0xdf   :  { %v2109_v25 = vmul.f32 -1.442695, %v104_v17 }
 0x14d   :  { %v201_v14 = vpop.permute.xlu0 %200 }
 0x14e   :  { %v203_v15 = vadd.f32 %v2108_v13, %v201_v14 }
 0x150   :  { %2401 = vtanh.f32 %v203_v15  ;;  %v2110_v22 = vmul.f32 -1.442695, %v203_v15 }
 0x151   :  { %2403 = vtanh.f32 %v104_v17 }
 0x152   :  { %2405 = vpow2.f32 %v2110_v22 }
 0x15a   :  { %v2402_v19 = vpop.eup %2401 }
 0x15b   :  { %213 = vrot.lane.b32.xlu0 %v2402_v19, %s2534_s22  ;;  %v2404_v21 = vpop.eup %2403 }
 0x15c   :  { %v2406_v23 = vpop.eup %2405 }
 0x15d   :  { %v207_v24 = vadd.f32 1.0, %v2406_v23 }
 0x15f   :  { %256 = vperm.xlu0 %2400, %v253_v20   ;;  %2407 = vrcp.f32 %v207_v24  ;;  %v2113_v20 = vld [vmem:[%s3225_s0 + $0x2] sm:$0x3] }
 0x160   :  { %2409 = vpow2.f32 %v2109_v25 }
 0x163   :  { %114 = vrot.lane.b32.xlu0 %v2404_v21, %s2534_s22 }
 0x169   :  { %v2408_v26 = vpop.eup %2407 }
 0x16a   :  { %v2410_v29 = vpop.eup %2409  ;;  %v211_v37 = vmul.f32 0.0, %v2408_v26 }
 0x16b   :  { %v108_v30 = vadd.f32 1.0, %v2410_v29 }
 0x16d   :  { %2411 = vrcp.f32 %v108_v30 }
 0x177   :  { %v2412_v32 = vpop.eup %2411 }
 0x178   :  { %v112_v41 = vmul.f32 0.0, %v2412_v32 }
 0x1cd   :  { %v214_v27 = vpop.permute.xlu0 %213 }
 0x1ce   :  { %v216_v28 = vmul.f32 %v2408_v26, %v214_v27 }
 0x1d0   :  { %218 = vrot.lane.b32.xlu1 %v216_v28, %s2535_s23 }
 0x1d4   :  { %249 = vperm.xlu1 %2399, %v2111_v18  }
 0x1de   :  { %v257_v31 = vpop.permute.xlu0 %256 }
 0x1df   :  { %v259_v48 = vmul.f32 0.0, %v257_v31 }
 0x1e2   :  { %v115_v33 = vpop.permute.xlu0 %114 }
 0x1e3   :  { %v117_v35 = vmul.f32 %v2412_v32, %v115_v33 }
 0x1e5   :  { %119 = vrot.lane.b32.xlu0 %v117_v35, %s2535_s23 }
 0x1e9   :  { %240 = vperm.xlu0 %2400, %v237_v36  }
 0x242   :  { %v219_v38 = vpop.permute.xlu1 %218 }
 0x243   :  { %v221_v39 = vadd.f32 %v219_v38, %v211_v37  ;;  %v2119_v38 = vld [vmem:[%s3226_s1 + $0x2] sm:$0x3] }
 0x245   :  { %2413 = vtanh.f32 %v221_v39 }
 0x24f   :  { %v2414_v40 = vpop.eup %2413 }
 0x250   :  { %224 = vrot.lane.b32.xlu1 %v2414_v40, %s2535_s23 }
 0x253   :  { %v250_v45 = vpop.permute.xlu1 %249 }
 0x254   :  { %v261_v14 = vmul.f32 %v250_v45, %v221_v39 }
 0x256   :  { %v2687_v15 = vadd.f32 %v261_v14, %v259_v48 }
 0x257   :  { %v120_v42 = vpop.permute.xlu0 %119 }
 0x258   :  { %v2644_v43 = vadd.f32 %v120_v42, %v112_v41 }
 0x25a   :  { %2415 = vtanh.f32 %v2644_v43 }
 0x264   :  { %v2416_v44 = vpop.eup %2415 }
 0x265   :  { %125 = vrot.lane.b32.xlu0 %v2416_v44, %s2535_s23 }
 0x268   :  { %v241_v57 = vpop.permute.xlu0 %240 }
 0x269   :  { %v2667_v62 = vmul.f32 0.0, %v241_v57 }
 0x2c2   :  { %v225_v46 = vpop.permute.xlu1 %224 }
 0x2c3   :  { %v227_v47 = vmul.f32 %v2408_v26, %v225_v46 }
 0x2c5   :  { %v2648_v49 = vmul.f32 %v250_v45, %v227_v47 }
 0x2c7   :  { %v2651_v50 = vadd.f32 %v259_v48, %v2648_v49  ;;  %v493_v48 = vsub.f32 1.0, %v2119_v38 }
 0x2c9   :  { %380 = vrot.lane.b32.xlu1 %v2651_v50, %s2536_s26 }
 0x2d7   :  { %v126_v59 = vpop.permute.xlu0 %125 }
 0x2d8   :  { %v128_v60 = vmul.f32 %v2412_v32, %v126_v59 }
 0x33b   :  { %v381_v51 = vpop.permute.xlu1 %380 }
 0x33c   :  { %2254 = vmatmul.mubr.msk.f32.vlgmr.msra.gmra.mrb[2].mxu1 %vm30_vm1, %v381_v51 }
 0x33d   :  { %2357 = vmatpush3.bf16.msra.mxu1 %v2599_v4  ;;  %2267 = vmatprep.mubr.msk.f32.mxu1 %vm2530_vm0, %v2531_v3 }
 0x33e   :  { %2361 = vmatprep.subr.bf16.mxu1 %v2529_v0 }
 0x40f   :  { %v450_v52 = vpop.f32.mrb[2].mxu1 }
 0x410   :  { %455 = vrot.lane.b32.xlu1 %v450_v52, %s2532_s16  ;;  %v2255_v53 = vpop.f32.mrb[3].mxu1 }
 0x414   :  { %233 = vperm.xlu1 %2399, %v228_v34  }
 0x482   :  { %v456_v55 = vpop.permute.xlu1 %455 }
 0x483   :  { %v458_v56 = vadd.f32 %v2114_v54, %v456_v55 }
 0x485   :  { %2417 = vtanh.f32 %v458_v56  ;;  %v2118_v6 = vmul.f32 -1.442695, %v458_v56 }
 0x487   :  { %2419 = vpow2.f32 %v2118_v6 }
 0x48f   :  { %v2418_v58 = vpop.eup %2417 }
 0x490   :  { %468 = vrot.lane.b32.xlu1 %v2418_v58, %s2534_s22 }
 0x491   :  { %v2420_v8 = vpop.eup %2419 }
 0x492   :  { %v462_v9 = vadd.f32 1.0, %v2420_v8 }
 0x493   :  { %v2665_v61 = vpop.permute.xlu1 %233 }
 0x494   :  { %v2670_v63 = vmul.f32 %v2665_v61, %v128_v60  ;;  %2421 = vrcp.f32 %v462_v9  ;;  %v245_v40 = vmul.f32 %v2665_v61, %v2644_v43  ;;  %v2124_v43 = vld [vmem:[%s3225_s0 + $0xa] sm:$0x3] }
 0x495   :  { %v2130_v61 = vld [vmem:[%s3226_s1 + $0xa] sm:$0x3] }
 0x496   :  { %v2677_v2 = vadd.f32 %v2667_v62, %v2670_v63  ;;  %v2724_v41 = vadd.f32 %v245_v40, %v2667_v62 }
 0x498   :  { %280 = vrot.lane.b32.xlu0 %v2677_v2, %s2537_s10 }
 0x49c   :  { %513 = vperm.xlu0 %2400, %v510_v5  }
 0x49e   :  { %v2422_v10 = vpop.eup %2421 }
 0x49f   :  { %v466_v16 = vmul.f32 %v2422_v10, %v2687_v15 }
 0x502   :  { %v469_v11 = vpop.permute.xlu1 %468 }
 0x503   :  { %v471_v12 = vmul.f32 %v2422_v10, %v469_v11 }
 0x505   :  { %473 = vrot.lane.b32.xlu1 %v471_v12, %s2535_s23 }
 0x509   :  { %506 = vperm.xlu1 %2399, %v2120_v1  }
 0x50a   :  { %v281_v13 = vpop.permute.xlu0 %280 }
 0x50b   :  { %2247 = vmatmul.mubr.msk.f32.vlgmr.msra.gmra.mrb[2].mxu0 %vm30_vm1, %v281_v13 }
 0x50c   :  { %2354 = vmatpush3.bf16.msra.mxu0 %v2617_v7  ;;  %2260 = vmatprep.mubr.msk.f32.mxu0 %vm2530_vm0, %v2531_v3 }
 0x50d   :  { %2358 = vmatprep.subr.bf16.mxu0 %v2529_v0 }
 0x51b   :  { %v2700_v26 = vpop.permute.xlu0 %513 }
 0x51c   :  { %v516_v29 = vmul.f32 %v2700_v26, %v2651_v50  ;;  %v519_v12 = vmul.f32 %v2700_v26, %v2687_v15 }
 0x577   :  { %v474_v17 = vpop.permute.xlu1 %473 }
 0x578   :  { %v2690_v18 = vadd.f32 %v474_v17, %v466_v16 }
 0x57a   :  { %2423 = vtanh.f32 %v2690_v18 }
 0x584   :  { %v2424_v19 = vpop.eup %2423 }
 0x585   :  { %479 = vrot.lane.b32.xlu1 %v2424_v19, %s2535_s23 }
 0x588   :  { %v2698_v25 = vpop.permute.xlu1 %506 }
 0x589   :  { %v518_v11 = vmul.f32 %v2698_v25, %v2690_v18 }
 0x58b   :  { %v2763_v13 = vadd.f32 %v519_v12, %v518_v11 }
 0x5de   :  { %v350_v21 = vpop.f32.mrb[2].mxu0 }
 0x5df   :  { %v354_v22 = vadd.f32 %v2113_v20, %v350_v21  ;;  %v2248_v23 = vpop.f32.mrb[3].mxu0  ;;  %v2123_v20 = vld [vmem:[%s3225_s0 + $0x4] sm:$0x3] }
 0x5e0   :  { %v2129_v23 = vld [vmem:[%s3226_s1 + $0x4] sm:$0x3] }
 0x5e1   :  { %2425 = vtanh.f32 %v354_v22  ;;  %v2116_v32 = vmul.f32 -1.442695, %v354_v22 }
 0x5e3   :  { %2427 = vpow2.f32 %v2116_v32 }
 0x5eb   :  { %v2426_v24 = vpop.eup %2425 }
 0x5ec   :  { %364 = vrot.lane.b32.xlu1 %v2426_v24, %s2534_s22 }
 0x5ed   :  { %v2428_v33 = vpop.eup %2427 }
 0x5ee   :  { %v358_v34 = vadd.f32 1.0, %v2428_v33 }
 0x5f0   :  { %2429 = vrcp.f32 %v358_v34 }
 0x5f7   :  { %v480_v27 = vpop.permute.xlu1 %479 }
 0x5f8   :  { %v482_v28 = vmul.f32 %v2422_v10, %v480_v27 }
 0x5fa   :  { %v2705_v30 = vmul.f32 %v2698_v25, %v482_v28  ;;  %v2430_v35 = vpop.eup %2429 }
 0x5fb   :  { %v362_v42 = vmul.f32 %v2430_v35, %v2724_v41 }
 0x5fc   :  { %v2708_v31 = vadd.f32 %v516_v29, %v2705_v30 }
 0x5fe   :  { %638 = vrot.lane.b32.xlu0 %v2708_v31, %s2536_s26 }
 0x65e   :  { %v365_v36 = vpop.permute.xlu1 %364 }
 0x65f   :  { %v367_v37 = vmul.f32 %v2430_v35, %v365_v36 }
 0x661   :  { %369 = vrot.lane.b32.xlu0 %v367_v37, %s2535_s23 }
 0x665   :  { %489 = vperm.xlu0 %2400, %v2119_v38  }
 0x670   :  { %v639_v39 = vpop.permute.xlu0 %638 }
 0x671   :  { %2268 = vmatmul.mubr.msk.f32.vlgmr.msra.gmra.mrb[4].mxu1 %vm30_vm1, %v639_v39  ;;  %v751_v39 = vsub.f32 1.0, %v2129_v23 }
 0x672   :  { %2363 = vmatpush3.bf16.msra.mxu1 %v2599_v4  ;;  %2281 = vmatprep.mubr.msk.f32.mxu1 %vm2530_vm0, %v2531_v3 }
 0x673   :  { %2367 = vmatprep.subr.bf16.mxu1 %v2529_v0 }
 0x6d3   :  { %v370_v44 = vpop.permute.xlu0 %369 }
 0x6d4   :  { %v2727_v45 = vadd.f32 %v370_v44, %v362_v42 }
 0x6d6   :  { %2431 = vtanh.f32 %v2727_v45 }
 0x6e0   :  { %v2432_v46 = vpop.eup %2431 }
 0x6e1   :  { %375 = vrot.lane.b32.xlu0 %v2432_v46, %s2535_s23 }
 0x6e4   :  { %v2735_v53 = vpop.permute.xlu0 %489 }
 0x6e5   :  { %v501_v42 = vmul.f32 %v2735_v53, %v2727_v45 }
 0x744   :  { %v708_v47 = vpop.f32.mrb[4].mxu1 }
 0x745   :  { %713 = vrot.lane.b32.xlu1 %v708_v47, %s2532_s16  ;;  %v2269_v50 = vpop.f32.mrb[5].mxu1 }
 0x749   :  { %496 = vperm.xlu1 %2399, %v493_v48  }
 0x753   :  { %v376_v54 = vpop.permute.xlu0 %375 }
 0x754   :  { %v378_v56 = vmul.f32 %v2430_v35, %v376_v54 }
 0x756   :  { %v2741_v58 = vmul.f32 %v2735_v53, %v378_v56 }
 0x7b7   :  { %v714_v51 = vpop.permute.xlu1 %713 }
 0x7b8   :  { %v716_v52 = vadd.f32 %v2124_v43, %v714_v51 }
 0x7ba   :  { %2433 = vtanh.f32 %v716_v52  ;;  %v2128_v62 = vmul.f32 -1.442695, %v716_v52 }
 0x7bc   :  { %2435 = vpow2.f32 %v2128_v62 }
 0x7c4   :  { %v2434_v55 = vpop.eup %2433 }
 0x7c5   :  { %726 = vrot.lane.b32.xlu1 %v2434_v55, %s2534_s22 }
 0x7c6   :  { %v2436_v1 = vpop.eup %2435 }
 0x7c7   :  { %v720_v5 = vadd.f32 1.0, %v2436_v1 }
 0x7c8   :  { %v2738_v57 = vpop.permute.xlu1 %496 }
 0x7c9   :  { %v499_v59 = vmul.f32 %v2738_v57, %v2677_v2  ;;  %2437 = vrcp.f32 %v720_v5  ;;  %v768_v2 = vsub.f32 1.0, %v2130_v61  ;;  %v502_v40 = vmul.f32 %v2738_v57, %v2724_v41  ;;  %v2134_v57 = vld [vmem:[%s3225_s0 + $0x8] sm:$0x3] }
 0x7cb   :  { %v2746_v60 = vadd.f32 %v499_v59, %v2741_v58  ;;  %v2801_v44 = vadd.f32 %v502_v40, %v501_v42 }
 0x7cd   :  { %538 = vrot.lane.b32.xlu0 %v2746_v60, %s2537_s10 }
 0x7d1   :  { %764 = vperm.xlu0 %2400, %v2130_v61  }
 0x7d3   :  { %v2438_v6 = vpop.eup %2437 }
 0x7d4   :  { %v724_v14 = vmul.f32 %v2438_v6, %v2763_v13 }
 0x837   :  { %v727_v8 = vpop.permute.xlu1 %726 }
 0x838   :  { %v729_v9 = vmul.f32 %v2438_v6, %v727_v8 }
 0x83a   :  { %731 = vrot.lane.b32.xlu1 %v729_v9, %s2535_s23 }
 0x83e   :  { %771 = vperm.xlu1 %2399, %v768_v2  }
 0x83f   :  { %v539_v10 = vpop.permute.xlu0 %538 }
 0x840   :  { %2261 = vmatmul.mubr.msk.f32.vlgmr.msra.gmra.mrb[4].mxu0 %vm30_vm1, %v539_v10 }
 0x841   :  { %2360 = vmatpush3.bf16.msra.mxu0 %v2617_v7  ;;  %2274 = vmatprep.mubr.msk.f32.mxu0 %vm2530_vm0, %v2531_v3 }
 0x842   :  { %2364 = vmatprep.subr.bf16.mxu0 %v2529_v0 }
 0x850   :  { %v2777_v24 = vpop.permute.xlu0 %764 }
 0x8ac   :  { %v732_v16 = vpop.permute.xlu1 %731 }
 0x8ad   :  { %v2766_v17 = vadd.f32 %v732_v16, %v724_v14 }
 0x8af   :  { %2439 = vtanh.f32 %v2766_v17 }
 0x8b9   :  { %v2440_v19 = vpop.eup %2439 }
 0x8ba   :  { %737 = vrot.lane.b32.xlu0 %v2440_v19, %s2535_s23  ;;  %v776_v19 = vmul.f32 %v2777_v24, %v2766_v17  ;;  %v2139_v17 = vld [vmem:[%s3226_s1 + $0x6] sm:$0x3] }
 0x8bb   :  { %v1009_v42 = vsub.f32 1.0, %v2139_v17 }
 0x8bd   :  { %v2779_v25 = vpop.permute.xlu1 %771 }
 0x8be   :  { %v774_v28 = vmul.f32 %v2779_v25, %v2708_v31  ;;  %v777_v16 = vmul.f32 %v2779_v25, %v2763_v13 }
 0x913   :  { %v608_v18 = vpop.f32.mrb[4].mxu0 }
 0x914   :  { %v612_v21 = vadd.f32 %v2123_v20, %v608_v18  ;;  %v2262_v22 = vpop.f32.mrb[5].mxu0  ;;  %v2840_v20 = vadd.f32 %v777_v16, %v776_v19  ;;  %v2143_v19 = vld [vmem:[%s3225_s0 + $0x8] sm:$0x3] }
 0x916   :  { %2441 = vtanh.f32 %v612_v21  ;;  %v2126_v33 = vmul.f32 -1.442695, %v612_v21  ;;  %v2133_v21 = vld [vmem:[%s3225_s0 + $0x6] sm:$0x3] }
 0x918   :  { %2443 = vpow2.f32 %v2126_v33 }
 0x920   :  { %v2442_v15 = vpop.eup %2441 }
 0x921   :  { %622 = vrot.lane.b32.xlu0 %v2442_v15, %s2534_s22 }
 0x922   :  { %v2444_v34 = vpop.eup %2443 }
 0x923   :  { %v616_v35 = vadd.f32 1.0, %v2444_v34 }
 0x925   :  { %747 = vperm.xlu0 %2400, %v2129_v23   ;;  %2445 = vrcp.f32 %v616_v35 }
 0x92c   :  { %v738_v26 = vpop.permute.xlu0 %737 }
 0x92d   :  { %v740_v27 = vmul.f32 %v2438_v6, %v738_v26 }
 0x92f   :  { %v2784_v29 = vmul.f32 %v2777_v24, %v740_v27  ;;  %v2446_v36 = vpop.eup %2445 }
 0x930   :  { %v620_v46 = vmul.f32 %v2446_v36, %v2801_v44 }
 0x931   :  { %v2787_v32 = vadd.f32 %v774_v28, %v2784_v29 }
 0x933   :  { %896 = vrot.lane.b32.xlu1 %v2787_v32, %s2536_s26 }
 0x993   :  { %v623_v37 = vpop.permute.xlu0 %622 }
 0x994   :  { %v625_v38 = vmul.f32 %v2446_v36, %v623_v37 }
 0x996   :  { %627 = vrot.lane.b32.xlu1 %v625_v38, %s2535_s23 }
 0x99a   :  { %754 = vperm.xlu1 %2399, %v751_v39  }
 0x9a4   :  { %v2809_v41 = vpop.permute.xlu0 %747 }
 0x9a5   :  { %v897_v31 = vpop.permute.xlu1 %896 }
 0x9a6   :  { %2282 = vmatmul.mubr.msk.f32.vlgmr.msra.gmra.mrb[6].mxu1 %vm30_vm1, %v897_v31 }
 0x9a7   :  { %2369 = vmatpush3.bf16.msra.mxu1 %v2599_v4  ;;  %2295 = vmatprep.mubr.msk.f32.mxu1 %vm2530_vm0, %v2531_v3 }
 0x9a8   :  { %2373 = vmatprep.subr.bf16.mxu1 %v2529_v0 }
 0xa08   :  { %v628_v47 = vpop.permute.xlu1 %627 }
 0xa09   :  { %v2804_v48 = vadd.f32 %v628_v47, %v620_v46 }
 0xa0b   :  { %2447 = vtanh.f32 %v2804_v48 }
 0xa15   :  { %v2448_v50 = vpop.eup %2447 }
 0xa16   :  { %633 = vrot.lane.b32.xlu0 %v2448_v50, %s2535_s23 }
 0xa19   :  { %v2811_v52 = vpop.permute.xlu1 %754 }
 0xa1a   :  { %v757_v54 = vmul.f32 %v2811_v52, %v2746_v60  ;;  %v2140_v60 = vld [vmem:[%s3226_s1 + $0x8] sm:$0x3]  ;;  %v760_v46 = vmul.f32 %v2811_v52, %v2801_v44 }
 0xa1b   :  { %v1026_v11 = vsub.f32 1.0, %v2140_v60 }
 0xa79   :  { %v966_v43 = vpop.f32.mrb[6].mxu1 }
 0xa7a   :  { %v2283_v51 = vpop.f32.mrb[7].mxu1  ;;  %971 = vrot.lane.b32.xlu1 %v966_v43, %s2532_s16 }
 0xa88   :  { %v634_v45 = vpop.permute.xlu0 %633 }
 0xa89   :  { %v636_v53 = vmul.f32 %v2446_v36, %v634_v45 }
 0xa8b   :  { %v2816_v55 = vmul.f32 %v2809_v41, %v636_v53 }
 0xa8d   :  { %v2819_v56 = vadd.f32 %v757_v54, %v2816_v55 }
 0xa8f   :  { %796 = vrot.lane.b32.xlu0 %v2819_v56, %s2537_s10 }
 0xaec   :  { %v972_v59 = vpop.permute.xlu1 %971 }
 0xaed   :  { %v974_v61 = vadd.f32 %v2134_v57, %v972_v59 }
 0xaef   :  { %2449 = vtanh.f32 %v974_v61  ;;  %v2138_v5 = vmul.f32 -1.442695, %v974_v61 }
 0xaf1   :  { %2451 = vpow2.f32 %v2138_v5 }
 0xaf9   :  { %v2450_v62 = vpop.eup %2449 }
 0xafa   :  { %984 = vrot.lane.b32.xlu1 %v2450_v62, %s2534_s22 }
 0xafb   :  { %v2452_v6 = vpop.eup %2451 }
 0xafc   :  { %v978_v8 = vadd.f32 1.0, %v2452_v6 }
 0xafe   :  { %1022 = vperm.xlu1 %2399, %v2140_v60   ;;  %2453 = vrcp.f32 %v978_v8  ;;  %v2150_v8 = vld [vmem:[%s3226_s1 + $0x6] sm:$0x3] }
 0xaff   :  { %v1280_v16 = vsub.f32 1.0, %v2150_v8 }
 0xb01   :  { %v797_v1 = vpop.permute.xlu0 %796 }
 0xb02   :  { %2275 = vmatmul.mubr.msk.f32.vlgmr.msra.gmra.mrb[6].mxu0 %vm30_vm1, %v797_v1 }
 0xb03   :  { %2366 = vmatpush3.bf16.msra.mxu0 %v2617_v7  ;;  %2288 = vmatprep.mubr.msk.f32.mxu0 %vm2530_vm0, %v2531_v3 }
 0xb04   :  { %2370 = vmatprep.subr.bf16.mxu0 %v2529_v0 }
 0xb08   :  { %v2454_v9 = vpop.eup %2453 }
 0xb09   :  { %v982_v18 = vmul.f32 %v2454_v9, %v2840_v20 }
 0xb6c   :  { %v985_v2 = vpop.permute.xlu1 %984 }
 0xb6d   :  { %v987_v10 = vmul.f32 %v2454_v9, %v985_v2 }
 0xb6f   :  { %989 = vrot.lane.b32.xlu0 %v987_v10, %s2535_s23 }
 0xb73   :  { %1029 = vperm.xlu0 %2400, %v1026_v11  }
 0xb7d   :  { %v2854_v28 = vpop.permute.xlu1 %1022 }
 0xbd5   :  { %v866_v12 = vpop.f32.mrb[6].mxu0 }
 0xbd6   :  { %v2276_v14 = vpop.f32.mrb[7].mxu0  ;;  %v870_v23 = vadd.f32 %v2133_v21, %v866_v12 }
 0xbd8   :  { %v2136_v24 = vmul.f32 -1.442695, %v870_v23 }
 0xbe1   :  { %v990_v22 = vpop.permute.xlu0 %989 }
 0xbe2   :  { %v2846_v15 = vadd.f32 %v990_v22, %v982_v18 }
 0xbe4   :  { %2455 = vtanh.f32 %v2846_v15 }
 0xbe5   :  { %2457 = vtanh.f32 %v870_v23 }
 0xbe6   :  { %2459 = vpow2.f32 %v2136_v24 }
 0xbee   :  { %v2456_v26 = vpop.eup %2455 }
 0xbef   :  { %995 = vrot.lane.b32.xlu1 %v2456_v26, %s2535_s23  ;;  %v2458_v13 = vpop.eup %2457 }
 0xbf0   :  { %v2460_v25 = vpop.eup %2459 }
 0xbf1   :  { %v874_v27 = vadd.f32 1.0, %v2460_v25 }
 0xbf2   :  { %v2856_v33 = vpop.permute.xlu0 %1029 }
 0xbf3   :  { %880 = vrot.lane.b32.xlu1 %v2458_v13, %s2534_s22  ;;  %2461 = vrcp.f32 %v874_v27  ;;  %v1032_v36 = vmul.f32 %v2856_v33, %v2787_v32  ;;  %v759_v32 = vmul.f32 %v2809_v41, %v2804_v48  ;;  %v1035_v13 = vmul.f32 %v2856_v33, %v2840_v20 }
 0xbf5   :  { %v2873_v50 = vadd.f32 %v760_v46, %v759_v32 }
 0xbf7   :  { %1005 = vperm.xlu1 %2399, %v2139_v17   ;;  %v1034_v17 = vmul.f32 %v2854_v28, %v2846_v15  ;;  %v2149_v15 = vld [vmem:[%s3226_s1 + $0x8] sm:$0x3] }
 0xbf9   :  { %v1036_v24 = vadd.f32 %v1035_v13, %v1034_v17 }
 0xbfd   :  { %v2462_v31 = vpop.eup %2461 }
 0xbfe   :  { %v878_v43 = vmul.f32 %v2462_v31, %v2873_v50 }
 0xc61   :  { %v996_v34 = vpop.permute.xlu1 %995 }
 0xc62   :  { %v998_v35 = vmul.f32 %v2454_v9, %v996_v34 }
 0xc64   :  { %v2861_v37 = vmul.f32 %v2854_v28, %v998_v35 }
 0xc65   :  { %v881_v39 = vpop.permute.xlu1 %880 }
 0xc66   :  { %v2864_v38 = vadd.f32 %v1032_v36, %v2861_v37  ;;  %v883_v40 = vmul.f32 %v2462_v31, %v881_v39 }
 0xc68   :  { %1152 = vrot.lane.b32.xlu0 %v2864_v38, %s2536_s26 }
 0xc6c   :  { %885 = vrot.lane.b32.xlu0 %v883_v40, %s2535_s23 }
 0xc70   :  { %1012 = vperm.xlu0 %2400, %v1009_v42  }
 0xc76   :  { %v2885_v48 = vpop.permute.xlu1 %1005 }
 0xcda   :  { %v1153_v47 = vpop.permute.xlu0 %1152 }
 0xcdb   :  { %2296 = vmatmul.mubr.msk.f32.vlgmr.msra.gmra.mrb[8].mxu1 %vm30_vm1, %v1153_v47  ;;  %v1263_v47 = vsub.f32 1.0, %v2149_v15 }
 0xcdc   :  { %2375 = vmatpush3.bf16.msra.mxu1 %v2599_v4  ;;  %2309 = vmatprep.mubr.msk.f32.mxu1 %vm2530_vm0, %v2531_v3 }
 0xcdd   :  { %2379 = vmatprep.subr.bf16.mxu1 %v2529_v0 }
 0xcde   :  { %v886_v51 = vpop.permute.xlu0 %885 }
 0xcdf   :  { %v2881_v45 = vadd.f32 %v886_v51, %v878_v43 }
 0xce1   :  { %2463 = vtanh.f32 %v2881_v45 }
 0xceb   :  { %v2464_v44 = vpop.eup %2463 }
 0xcec   :  { %891 = vrot.lane.b32.xlu1 %v2464_v44, %s2535_s23 }
 0xcef   :  { %v2887_v41 = vpop.permute.xlu0 %1012 }
 0xcf0   :  { %v1015_v54 = vmul.f32 %v2887_v41, %v2819_v56  ;;  %v2144_v56 = vld [vmem:[%s3225_s0 + $0x6] sm:$0x3]  ;;  %v1018_v44 = vmul.f32 %v2887_v41, %v2873_v50 }
 0xd5e   :  { %v892_v52 = vpop.permute.xlu1 %891 }
 0xd5f   :  { %v894_v53 = vmul.f32 %v2462_v31, %v892_v52 }
 0xd61   :  { %v2892_v57 = vmul.f32 %v2885_v48, %v894_v53 }
 0xd63   :  { %v2895_v59 = vadd.f32 %v1015_v54, %v2892_v57  ;;  %v1017_v54 = vmul.f32 %v2885_v48, %v2881_v45 }
 0xd65   :  { %1052 = vrot.lane.b32.xlu0 %v2895_v59, %s2537_s10 }
 0xdae   :  { %v1222_v61 = vpop.f32.mrb[8].mxu1 }
 0xdaf   :  { %v2297_v62 = vpop.f32.mrb[9].mxu1  ;;  %1227 = vrot.lane.b32.xlu1 %v1222_v61, %s2532_s16 }
 0xdb0   :  { %v2938_v62 = vadd.f32 %v1018_v44, %v1017_v54 }
 0xdd7   :  { %v1053_v60 = vpop.permute.xlu0 %1052 }
 0xdd8   :  { %2289 = vmatmul.mubr.msk.f32.vlgmr.msra.gmra.mrb[8].mxu0 %vm30_vm1, %v1053_v60 }
 0xdd9   :  { %2372 = vmatpush3.bf16.msra.mxu0 %v2617_v7  ;;  %2302 = vmatprep.mubr.msk.f32.mxu0 %vm2530_vm0, %v2531_v3 }
 0xdda   :  { %2376 = vmatprep.subr.bf16.mxu0 %v2529_v0 }
 0xe21   :  { %v1228_v1 = vpop.permute.xlu1 %1227 }
 0xe22   :  { %v1230_v5 = vadd.f32 %v2144_v56, %v1228_v1 }
 0xe24   :  { %2465 = vtanh.f32 %v1230_v5  ;;  %v2148_v9 = vmul.f32 -1.442695, %v1230_v5 }
 0xe26   :  { %2467 = vpow2.f32 %v2148_v9 }
 0xe2e   :  { %v2466_v6 = vpop.eup %2465 }
 0xe2f   :  { %1240 = vrot.lane.b32.xlu0 %v2466_v6, %s2534_s22 }
 0xe30   :  { %v2468_v2 = vpop.eup %2467 }
 0xe31   :  { %v1234_v10 = vadd.f32 1.0, %v2468_v2 }
 0xe33   :  { %1276 = vperm.xlu0 %2400, %v2150_v8   ;;  %2469 = vrcp.f32 %v1234_v10 }
 0xe3d   :  { %v2470_v11 = vpop.eup %2469 }
 0xe3e   :  { %v1238_v25 = vmul.f32 %v2470_v11, %v1036_v24 }
 0xea1   :  { %v1241_v12 = vpop.permute.xlu0 %1240 }
 0xea2   :  { %v1243_v14 = vmul.f32 %v2470_v11, %v1241_v12 }
 0xea4   :  { %1245 = vrot.lane.b32.xlu1 %v1243_v14, %s2535_s23 }
 0xea8   :  { %1283 = vperm.xlu1 %2399, %v1280_v16  }
 0xeab   :  { %v1122_v18 = vpop.f32.mrb[8].mxu0 }
 0xeac   :  { %v1126_v21 = vadd.f32 %v2143_v19, %v1122_v18  ;;  %v2290_v22 = vpop.f32.mrb[9].mxu0  ;;  %v2153_v19 = vld [vmem:[%s3225_s0 + $0xa] sm:$0x3] }
 0xead   :  { %v2160_v22 = vld [vmem:[%s3226_s1 + $0x4] sm:$0x3] }
 0xeae   :  { %2471 = vtanh.f32 %v1126_v21  ;;  %v2146_v26 = vmul.f32 -1.442695, %v1126_v21 }
 0xeb0   :  { %2473 = vpow2.f32 %v2146_v26  ;;  %v1534_v26 = vsub.f32 1.0, %v2160_v22 }
 0xeb2   :  { %v1277_v31 = vpop.permute.xlu0 %1276 }
 0xeb8   :  { %v2472_v23 = vpop.eup %2471 }
 0xeb9   :  { %1136 = vrot.lane.b32.xlu1 %v2472_v23, %s2534_s22 }
 0xeba   :  { %v2474_v35 = vpop.eup %2473 }
 0xebb   :  { %v1130_v36 = vadd.f32 1.0, %v2474_v35 }
 0xf16   :  { %v1246_v27 = vpop.permute.xlu1 %1245 }
 0xf17   :  { %v1248_v34 = vadd.f32 %v1246_v27, %v1238_v25 }
 0xf19   :  { %2475 = vtanh.f32 %v1248_v34  ;;  %v1288_v42 = vmul.f32 %v1277_v31, %v1248_v34 }
 0xf1a   :  { %2477 = vrcp.f32 %v1130_v36 }
 0xf23   :  { %v2476_v39 = vpop.eup %2475 }
 0xf24   :  { %1251 = vrot.lane.b32.xlu0 %v2476_v39, %s2535_s23  ;;  %v2478_v33 = vpop.eup %2477 }
 0xf25   :  { %v1134_v60 = vmul.f32 %v2478_v33, %v2938_v62 }
 0xf27   :  { %v1284_v40 = vpop.permute.xlu1 %1283 }
 0xf28   :  { %v1289_v46 = vmul.f32 %v1284_v40, %v1036_v24  ;;  %v1286_v52 = vmul.f32 %v1284_v40, %v2864_v38 }
 0xf2a   :  { %v2922_v20 = vadd.f32 %v1289_v46, %v1288_v42  ;;  %v2159_v46 = vld [vmem:[%s3226_s1 + $0xa] sm:$0x3] }
 0xf2b   :  { %v1137_v32 = vpop.permute.xlu1 %1136 }
 0xf2c   :  { %v1139_v28 = vmul.f32 %v2478_v33, %v1137_v32 }
 0xf2e   :  { %1141 = vrot.lane.b32.xlu1 %v1139_v28, %s2535_s23 }
 0xf32   :  { %1266 = vperm.xlu1 %2399, %v1263_v47  }
 0xf96   :  { %v1252_v43 = vpop.permute.xlu0 %1251 }
 0xf97   :  { %v1254_v51 = vmul.f32 %v2470_v11, %v1252_v43  ;;  %v2154_v11 = vld [vmem:[%s3225_s0 + $0x4] sm:$0x3] }
 0xf99   :  { %v2931_v53 = vmul.f32 %v1277_v31, %v1254_v51 }
 0xf9b   :  { %v2936_v61 = vadd.f32 %v1286_v52, %v2931_v53 }
 0xf9d   :  { %1406 = vrot.lane.b32.xlu0 %v2936_v61, %s2536_s26 }
 0xfa0   :  { %v1142_v56 = vpop.permute.xlu1 %1141 }
 0xfa1   :  { %v2943_v1 = vadd.f32 %v1142_v56, %v1134_v60  ;;  %1259 = vperm.xlu0 %2400, %v2149_v15  }
 0xfa3   :  { %2479 = vtanh.f32 %v2943_v1 }
 0xfad   :  { %v2480_v38 = vpop.eup %2479 }
 0xfae   :  { %1147 = vrot.lane.b32.xlu0 %v2480_v38, %s2535_s23 }
 0xfb1   :  { %v1267_v48 = vpop.permute.xlu1 %1266 }
 0xfb2   :  { %v1269_v6 = vmul.f32 %v1267_v48, %v2895_v59  ;;  %v1272_v43 = vmul.f32 %v1267_v48, %v2938_v62 }
0x100f   :  { %v1407_v50 = vpop.permute.xlu0 %1406 }
0x1010   :  { %2310 = vmatmul.mubr.msk.f32.vlgmr.msra.gmra.mrb[10].mxu1 %vm30_vm1, %v1407_v50 }
0x1011   :  { %2381 = vmatpush3.bf16.msra.mxu1 %v2599_v4  ;;  %2323 = vmatprep.mubr.msk.f32.mxu1 %vm2530_vm0, %v2531_v3 }
0x1012   :  { %2385 = vmatprep.subr.bf16.mxu1 %v2529_v0 }
0x1020   :  { %v1260_v45 = vpop.permute.xlu0 %1259 }
0x1021   :  { %v1271_v47 = vmul.f32 %v1260_v45, %v2943_v1 }
0x1023   :  { %v2991_v44 = vadd.f32 %v1272_v43, %v1271_v47 }
0x1024   :  { %v1148_v41 = vpop.permute.xlu0 %1147 }
0x1025   :  { %v1150_v5 = vmul.f32 %v2478_v33, %v1148_v41  ;;  %v1517_v41 = vsub.f32 1.0, %v2159_v46 }
0x1027   :  { %v2953_v8 = vmul.f32 %v1260_v45, %v1150_v5 }
0x1029   :  { %v2956_v9 = vadd.f32 %v1269_v6, %v2953_v8 }
0x102b   :  { %1306 = vrot.lane.b32.xlu1 %v2956_v9, %s2537_s10 }
0x109d   :  { %v1307_v2 = vpop.permute.xlu1 %1306 }
0x109e   :  { %2303 = vmatmul.mubr.msk.f32.vlgmr.msra.gmra.mrb[10].mxu0 %vm30_vm1, %v1307_v2 }
0x109f   :  { %2378 = vmatpush3.bf16.msra.mxu0 %v2617_v7  ;;  %2316 = vmatprep.mubr.msk.f32.mxu0 %vm2530_vm0, %v2531_v3 }
0x10a0   :  { %2382 = vmatprep.subr.bf16.mxu0 %v2529_v0 }
0x10e3   :  { %v1476_v10 = vpop.f32.mrb[10].mxu1 }
0x10e4   :  { %1481 = vrot.lane.b32.xlu0 %v1476_v10, %s2532_s16  ;;  %v2311_v59 = vpop.f32.mrb[11].mxu1 }
0x1156   :  { %v1482_v12 = vpop.permute.xlu0 %1481 }
0x1157   :  { %v1484_v14 = vadd.f32 %v2154_v11, %v1482_v12 }
0x1159   :  { %2481 = vtanh.f32 %v1484_v14  ;;  %v2158_v13 = vmul.f32 -1.442695, %v1484_v14 }
0x1163   :  { %v2482_v16 = vpop.eup %2481 }
0x1164   :  { %1494 = vrot.lane.b32.xlu1 %v2482_v16, %s2534_s22 }
0x1171   :  { %v1376_v18 = vpop.f32.mrb[10].mxu0 }
0x1172   :  { %v1380_v0 = vadd.f32 %v2153_v19, %v1376_v18  ;;  %v2304_v21 = vpop.f32.mrb[11].mxu0 }
0x1174   :  { %2483 = vtanh.f32 %v1380_v0  ;;  %v2156_v25 = vmul.f32 -1.442695, %v1380_v0 }
0x1175   :  { %2485 = vpow2.f32 %v2158_v13 }
0x117e   :  { %v2484_v23 = vpop.eup %2483 }
0x117f   :  { %1390 = vrot.lane.b32.xlu1 %v2484_v23, %s2534_s22  ;;  %v2486_v17 = vpop.eup %2485 }
0x1180   :  { %v1488_v24 = vadd.f32 1.0, %v2486_v17 }
0x1182   :  { %2487 = vrcp.f32 %v1488_v24 }
0x1183   :  { %1537 = vperm.xlu1 %2399, %v1534_v26   ;;  %2489 = vpow2.f32 %v2156_v25 }
0x118c   :  { %v2488_v27 = vpop.eup %2487 }
0x118d   :  { %v2490_v36 = vpop.eup %2489  ;;  %v1492_v33 = vmul.f32 %v2488_v27, %v2922_v20 }
0x118e   :  { %v1384_v39 = vadd.f32 1.0, %v2490_v36  ;;  %v2170_v36 = vld [vmem:[%s3226_s1 + $0x2] sm:$0x3] }
0x1190   :  { %2491 = vrcp.f32 %v1384_v39 }
0x119a   :  { %v2492_v31 = vpop.eup %2491 }
0x119b   :  { %v1388_v52 = vmul.f32 %v2492_v31, %v2991_v44 }
0x11d6   :  { %v1495_v34 = vpop.permute.xlu1 %1494 }
0x11d7   :  { %v1497_v35 = vmul.f32 %v2488_v27, %v1495_v34 }
0x11d9   :  { %1499 = vrot.lane.b32.xlu0 %v1497_v35, %s2535_s23 }
0x11dd   :  { %1530 = vperm.xlu0 %2400, %v2160_v22  }
0x11f1   :  { %v1391_v40 = vpop.permute.xlu1 %1390 }
0x11f2   :  { %v1393_v42 = vmul.f32 %v2492_v31, %v1391_v40 }
0x11f4   :  { %1395 = vrot.lane.b32.xlu1 %v1393_v42, %s2535_s23 }
0x11f8   :  { %1513 = vperm.xlu1 %2399, %v2159_v46   ;;  %v1788_v46 = vsub.f32 1.0, %v2170_v36 }
0x1202   :  { %v2989_v51 = vpop.permute.xlu1 %1537 }
0x1203   :  { %v1540_v62 = vmul.f32 %v2989_v51, %v2936_v61 }
0x124b   :  { %v1500_v32 = vpop.permute.xlu0 %1499 }
0x124c   :  { %v2983_v15 = vadd.f32 %v1500_v32, %v1492_v33  ;;  %v2169_v33 = vld [vmem:[%s3226_s1 + $0xc] sm:$0x3] }
0x124e   :  { %2493 = vtanh.f32 %v2983_v15 }
0x1258   :  { %v2494_v28 = vpop.eup %2493 }
0x1259   :  { %1505 = vrot.lane.b32.xlu0 %v2494_v28, %s2535_s23  ;;  %v1543_v28 = vmul.f32 %v2989_v51, %v2922_v20 }
0x125c   :  { %v2998_v38 = vpop.permute.xlu0 %1530 }
0x125d   :  { %v1542_v32 = vmul.f32 %v2998_v38, %v2983_v15 }
0x125f   :  { %v1544_v47 = vadd.f32 %v1543_v28, %v1542_v32  ;;  %v2018_v32 = vld [vmem:[%s3226_s1] sm:$0x3] }
0x1266   :  { %v1396_v54 = vpop.permute.xlu1 %1395 }
0x1267   :  { %v2994_v60 = vadd.f32 %v1396_v54, %v1388_v52 }
0x1269   :  { %2495 = vtanh.f32 %v2994_v60 }
0x1273   :  { %v2496_v56 = vpop.eup %2495 }
0x1274   :  { %1401 = vrot.lane.b32.xlu1 %v2496_v56, %s2535_s23 }
0x1277   :  { %v3014_v61 = vpop.permute.xlu1 %1513 }
0x12cb   :  { %v1506_v50 = vpop.permute.xlu0 %1505 }
0x12cc   :  { %v1508_v1 = vmul.f32 %v2488_v27, %v1506_v50 }
0x12ce   :  { %v3003_v45 = vmul.f32 %v2998_v38, %v1508_v1  ;;  %v1771_v1 = vsub.f32 1.0, %v2169_v33 }
0x12d0   :  { %v3006_v48 = vadd.f32 %v1540_v62, %v3003_v45  ;;  %v1525_v62 = vmul.f32 %v3014_v61, %v2994_v60 }
0x12d2   :  { %1660 = vrot.lane.b32.xlu0 %v3006_v48, %s2536_s26 }
0x12d6   :  { %1520 = vperm.xlu0 %2400, %v1517_v41  }
0x12e6   :  { %v1402_v6 = vpop.permute.xlu1 %1401 }
0x12e7   :  { %v1404_v2 = vmul.f32 %v2492_v31, %v1402_v6 }
0x12e9   :  { %v3017_v59 = vmul.f32 %v3014_v61, %v1404_v2 }
0x1344   :  { %v1661_v5 = vpop.permute.xlu0 %1660 }
0x1345   :  { %2324 = vmatmul.mubr.msk.f32.vlgmr.msra.gmra.mrb[12].mxu1 %vm30_vm1, %v1661_v5 }
0x1346   :  { %2387 = vmatpush3.bf16.msra.mxu1 %v2599_v4  ;;  %2337 = vmatprep.mubr.msk.f32.mxu1 %vm2530_vm0, %v2531_v3 }
0x1355   :  { %v1521_v10 = vpop.permute.xlu0 %1520 }
0x1356   :  { %v1523_v11 = vmul.f32 %v1521_v10, %v2956_v9  ;;  %v2164_v9 = vld [vmem:[%s3225_s0 + $0x2] sm:$0x3]  ;;  %v1526_v50 = vmul.f32 %v1521_v10, %v2991_v44 }
0x1358   :  { %v3021_v12 = vadd.f32 %v1523_v11, %v3017_v59  ;;  %v3054_v41 = vadd.f32 %v1526_v50, %v1525_v62 }
0x135a   :  { %1560 = vrot.lane.b32.xlu0 %v3021_v12, %s2537_s10 }
0x13cc   :  { %v1561_v4 = vpop.permute.xlu0 %1560 }
0x13cd   :  { %2317 = vmatmul.mubr.msk.f32.vlgmr.msra.gmra.mrb[12].mxu0 %vm30_vm1, %v1561_v4 }
0x13ce   :  { %2384 = vmatpush3.bf16.msra.mxu0 %v2617_v7  ;;  %2330 = vmatprep.mubr.msk.f32.mxu0 %vm2530_vm0, %v2531_v3  ;;  %v2163_v7 = vld [vmem:[%s3225_s0 + $0xc] sm:$0x3] }
0x1418   :  { %v1730_v14 = vpop.f32.mrb[12].mxu1 }
0x1419   :  { %1735 = vrot.lane.b32.xlu1 %v1730_v14, %s2532_s16  ;;  %v2325_v16 = vpop.f32.mrb[13].mxu1 }
0x148b   :  { %v1736_v19 = vpop.permute.xlu1 %1735 }
0x148c   :  { %v1738_v18 = vadd.f32 %v2164_v9, %v1736_v19 }
0x148e   :  { %2497 = vtanh.f32 %v1738_v18  ;;  %v2168_v26 = vmul.f32 -1.442695, %v1738_v18 }
0x1498   :  { %v2498_v0 = vpop.eup %2497 }
0x1499   :  { %1748 = vrot.lane.b32.xlu0 %v2498_v0, %s2534_s22 }
0x14a0   :  { %v1630_v21 = vpop.f32.mrb[12].mxu0 }
0x14a1   :  { %v1634_v3 = vadd.f32 %v2163_v7, %v1630_v21  ;;  %v2318_v22 = vpop.f32.mrb[13].mxu0 }
0x14a3   :  { %2499 = vtanh.f32 %v1634_v3  ;;  %v2166_v24 = vmul.f32 -1.442695, %v1634_v3 }
0x14a4   :  { %2501 = vpow2.f32 %v2168_v26 }
0x14ad   :  { %v2500_v23 = vpop.eup %2499 }
0x14ae   :  { %1644 = vrot.lane.b32.xlu1 %v2500_v23, %s2534_s22  ;;  %v2502_v13 = vpop.eup %2501 }
0x14af   :  { %v1742_v17 = vadd.f32 1.0, %v2502_v13 }
0x14b1   :  { %2503 = vrcp.f32 %v1742_v17 }
0x14b2   :  { %2505 = vpow2.f32 %v2166_v24 }
0x14bb   :  { %v2504_v25 = vpop.eup %2503 }
0x14bc   :  { %v2506_v35 = vpop.eup %2505  ;;  %v1746_v43 = vmul.f32 %v2504_v25, %v1544_v47 }
0x14bd   :  { %v1638_v39 = vadd.f32 1.0, %v2506_v35 }
0x14bf   :  { %2507 = vrcp.f32 %v1638_v39 }
0x14c9   :  { %v2508_v31 = vpop.eup %2507 }
0x14ca   :  { %v1642_v15 = vmul.f32 %v2508_v31, %v3054_v41 }
0x150b   :  { %v1749_v27 = vpop.permute.xlu0 %1748 }
0x150c   :  { %v1751_v34 = vmul.f32 %v2504_v25, %v1749_v27 }
0x150e   :  { %1753 = vrot.lane.b32.xlu0 %v1751_v34, %s2535_s23 }
0x1512   :  { %1784 = vperm.xlu0 %2400, %v2170_v36  }
0x1520   :  { %v1645_v40 = vpop.permute.xlu1 %1644 }
0x1521   :  { %v1647_v42 = vmul.f32 %v2508_v31, %v1645_v40 }
0x1523   :  { %1649 = vrot.lane.b32.xlu1 %v1647_v42, %s2535_s23 }
0x1527   :  { %1791 = vperm.xlu1 %2399, %v1788_v46  }
0x152b   :  { %1767 = vperm.xlu1 %2399, %v2169_v33   ;;  %v2178_v33 = vld [vmem:[%s3226_s1 + $0xe] sm:$0x3] }
0x152c   :  { %v2025_v50 = vsub.f32 1.0, %v2178_v33 }
0x1580   :  { %v1754_v52 = vpop.permute.xlu0 %1753 }
0x1581   :  { %v1756_v54 = vadd.f32 %v1754_v52, %v1746_v43 }
0x1583   :  { %2509 = vtanh.f32 %v1756_v54 }
0x158d   :  { %v2510_v56 = vpop.eup %2509 }
0x158e   :  { %1759 = vrot.lane.b32.xlu0 %v2510_v56, %s2535_s23 }
0x1591   :  { %v1785_v44 = vpop.permute.xlu0 %1784 }
0x1592   :  { %1774 = vperm.xlu0 %2400, %v1771_v1   ;;  %v1796_v6 = vmul.f32 %v1785_v44, %v1756_v54  ;;  %v2042_v1 = vsub.f32 1.0, %v2018_v32 }
0x1595   :  { %v1650_v20 = vpop.permute.xlu1 %1649 }
0x1596   :  { %v3057_v51 = vadd.f32 %v1650_v20, %v1642_v15 }
0x1598   :  { %2511 = vtanh.f32 %v3057_v51 }
0x15a2   :  { %v2512_v38 = vpop.eup %2511 }
0x15a3   :  { %1655 = vrot.lane.b32.xlu1 %v2512_v38, %s2535_s23 }
0x15a6   :  { %v1792_v5 = vpop.permute.xlu1 %1791 }
0x15a7   :  { %v1797_v2 = vmul.f32 %v1792_v5, %v1544_v47  ;;  %v1794_v11 = vmul.f32 %v1792_v5, %v3006_v48 }
0x15a9   :  { %v3061_v10 = vadd.f32 %v1797_v2, %v1796_v6 }
0x15aa   :  { %v1768_v16 = vpop.permute.xlu1 %1767 }
0x15ab   :  { %v1779_v15 = vmul.f32 %v1768_v16, %v3057_v51 }
0x1600   :  { %v1760_v60 = vpop.permute.xlu0 %1759 }
0x1601   :  { %v1762_v61 = vmul.f32 %v2504_v25, %v1760_v60  ;;  %v1812_v25 = vld [vmem:[%s3225_s0] sm:$0x3] }
0x1603   :  { %v3064_v4 = vmul.f32 %v1785_v44, %v1762_v61 }
0x1605   :  { %v3067_v14 = vadd.f32 %v1794_v11, %v3064_v4 }
0x1607   :  { %1914 = vrot.lane.b32.xlu0 %v3067_v14, %s2536_s26 }
0x1611   :  { %v1775_v9 = vpop.permute.xlu0 %1774 }
0x1612   :  { %v1777_v0 = vmul.f32 %v1775_v9, %v3021_v12  ;;  %v2173_v12 = vld [vmem:[%s3225_s0 + $0xe] sm:$0x3]  ;;  %v1780_v62 = vmul.f32 %v1775_v9, %v3054_v41 }
0x1614   :  { %v1781_v20 = vadd.f32 %v1780_v62, %v1779_v15 }
0x1615   :  { %v1656_v19 = vpop.permute.xlu1 %1655 }
0x1616   :  { %v1658_v18 = vmul.f32 %v2508_v31, %v1656_v19 }
0x1618   :  { %v3072_v7 = vmul.f32 %v1768_v16, %v1658_v18 }
0x161a   :  { %v3075_v21 = vadd.f32 %v1777_v0, %v3072_v7 }
0x161c   :  { %1814 = vrot.lane.b32.xlu1 %v3075_v21, %s2537_s10 }
0x1679   :  { %v1915_v48 = vpop.permute.xlu0 %1914 }
0x167a   :  { %2338 = vmatmul.mubr.msk.f32.vlgmr.msra.gmra.mrb[14].mxu1 %vm30_vm1, %v1915_v48 }
0x168e   :  { %v1815_v3 = vpop.permute.xlu1 %1814 }
0x168f   :  { %2331 = vmatmul.mubr.msk.f32.vlgmr.msra.gmra.mrb[14].mxu0 %vm30_vm1, %v1815_v3 }
0x174d   :  { %v1984_v22 = vpop.f32.mrb[14].mxu1 }
0x174e   :  { %1989 = vrot.lane.b32.xlu0 %v1984_v22, %s2532_s16  ;;  %v2339_v23 = vpop.f32.mrb[15].mxu1 }
0x1762   :  { %v1884_v26 = vpop.f32.mrb[14].mxu0 }
0x1763   :  { %v1888_v13 = vadd.f32 %v2173_v12, %v1884_v26  ;;  %v2332_v17 = vpop.f32.mrb[15].mxu0 }
0x1765   :  { %2513 = vtanh.f32 %v1888_v13  ;;  %v2175_v35 = vmul.f32 -1.442695, %v1888_v13 }
0x176f   :  { %v2514_v24 = vpop.eup %2513 }
0x1770   :  { %1898 = vrot.lane.b32.xlu1 %v2514_v24, %s2534_s22 }
0x17c0   :  { %v1990_v27 = vpop.permute.xlu0 %1989 }
0x17c1   :  { %v1992_v34 = vadd.f32 %v1990_v27, %v1812_v25 }
0x17c3   :  { %2515 = vtanh.f32 %v1992_v34  ;;  %v2177_v28 = vmul.f32 -1.442695, %v1992_v34 }
0x17c4   :  { %2517 = vpow2.f32 %v2175_v35 }
0x17cd   :  { %v2516_v36 = vpop.eup %2515 }
0x17ce   :  { %2002 = vrot.lane.b32.xlu0 %v2516_v36, %s2534_s22  ;;  %v2518_v39 = vpop.eup %2517 }
0x17cf   :  { %v1892_v31 = vadd.f32 1.0, %v2518_v39 }
0x17d1   :  { %2519 = vrcp.f32 %v1892_v31 }
0x17d2   :  { %2521 = vpow2.f32 %v2177_v28 }
0x17db   :  { %v2520_v40 = vpop.eup %2519 }
0x17dc   :  { %v2522_v47 = vpop.eup %2521  ;;  %v1896_v38 = vmul.f32 %v2520_v40, %v1781_v20 }
0x17dd   :  { %v1996_v43 = vadd.f32 1.0, %v2522_v47 }
0x17df   :  { %2523 = vrcp.f32 %v1996_v43 }
0x17e2   :  { %v1899_v42 = vpop.permute.xlu1 %1898 }
0x17e3   :  { %v1901_v46 = vmul.f32 %v2520_v40, %v1899_v42 }
0x17e5   :  { %1903 = vrot.lane.b32.xlu1 %v1901_v46, %s2535_s23 }
0x17e9   :  { %2021 = vperm.xlu1 %2399, %v2178_v33   ;;  %v3097_v52 = vpop.eup %2523 }
0x17ed   :  { %2038 = vperm.xlu1 %2399, %v2018_v32  }
0x1840   :  { %v2003_v54 = vpop.permute.xlu0 %2002 }
0x1841   :  { %v2005_v56 = vmul.f32 %v3097_v52, %v2003_v54 }
0x1843   :  { %2007 = vrot.lane.b32.xlu0 %v2005_v56, %s2535_s23 }
0x1847   :  { %2028 = vperm.xlu0 %2400, %v2025_v50  }
0x184b   :  { %2045 = vperm.xlu0 %2400, %v2042_v1  }
0x1857   :  { %v1904_v44 = vpop.permute.xlu1 %1903 }
0x1858   :  { %v1906_v5 = vadd.f32 %v1904_v44, %v1896_v38 }
0x185a   :  { %2525 = vtanh.f32 %v1906_v5 }
0x1864   :  { %v2526_v6 = vpop.eup %2525 }
0x1865   :  { %1909 = vrot.lane.b32.xlu1 %v2526_v6, %s2535_s23 }
0x1869   :  { %264 = vrot.lane.b32.xlu1 %v2670_v63, %s2537_s10  ;;  %v2000_v63 = vmul.f32 %v3097_v52, %v3061_v10 }
0x186d   :  { %522 = vrot.lane.b32.xlu1 %v2741_v58, %s2537_s10 }
0x1871   :  { %780 = vrot.lane.b32.xlu1 %v2816_v55, %s2537_s10  ;;  %v2022_v55 = vpop.permute.xlu1 %2021 }
0x1875   :  { %1038 = vrot.lane.b32.xlu1 %v2892_v57, %s2537_s10  ;;  %v2039_v57 = vpop.permute.xlu1 %2038 }
0x1879   :  { %1292 = vrot.lane.b32.xlu1 %v2953_v8, %s2537_s10 }
0x187d   :  { %1546 = vrot.lane.b32.xlu1 %v3017_v59, %s2537_s10 }
0x1881   :  { %1800 = vrot.lane.b32.xlu1 %v3072_v7, %s2537_s10 }
0x18b5   :  { %v2008_v41 = vpop.permute.xlu0 %2007 }
0x18b6   :  { %v2010_v58 = vadd.f32 %v2008_v41, %v2000_v63 }
0x18b8   :  { %2527 = vtanh.f32 %v2010_v58  ;;  %v2050_v23 = vmul.f32 %v2039_v57, %v2010_v58 }
0x18c2   :  { %v2528_v51 = vpop.eup %2527 }
0x18c3   :  { %2013 = vrot.lane.b32.xlu0 %v2528_v51, %s2535_s23 }
0x18c6   :  { %v2029_v2 = vpop.permute.xlu0 %2028 }
0x18c7   :  { %270 = vrot.lane.b32.xlu0 %v2648_v49, %s2536_s26 }
0x18ca   :  { %v2046_v18 = vpop.permute.xlu0 %2045 }
0x18cb   :  { %528 = vrot.lane.b32.xlu0 %v2705_v30, %s2536_s26  ;;  %v2031_v30 = vmul.f32 %v2029_v2, %v3075_v21  ;;  %v2048_v21 = vmul.f32 %v2046_v18, %v3067_v14  ;;  %v2051_v48 = vmul.f32 %v2046_v18, %v3061_v10 }
0x18cd   :  { %v2052_v26 = vadd.f32 %v2051_v48, %v2050_v23 }
0x18cf   :  { %786 = vrot.lane.b32.xlu0 %v2784_v29, %s2536_s26  ;;  %v2034_v29 = vmul.f32 %v2029_v2, %v1781_v20 }
0x18d3   :  { %1044 = vrot.lane.b32.xlu0 %v2861_v37, %s2536_s26 }
0x18d7   :  { %v1910_v8 = vpop.permute.xlu1 %1909  ;;  %1298 = vrot.lane.b32.xlu0 %v2931_v53, %s2536_s26  ;;  %v2033_v53 = vmul.f32 %v2022_v55, %v1906_v5 }
0x18d8   :  { %v1912_v59 = vmul.f32 %v2520_v40, %v1910_v8 }
0x18da   :  { %v2024_v60 = vmul.f32 %v2022_v55, %v1912_v59 }
0x18db   :  { %v265_v49 = vpop.permute.xlu1 %264  ;;  %1552 = vrot.lane.b32.xlu0 %v3003_v45, %s2536_s26  ;;  %v2035_v45 = vadd.f32 %v2034_v29, %v2033_v53 }
0x18dc   :  { %268 = vst.msk [vmem:[%s3227_s4] sm:$0x3] %vm267_vm2, %v265_v49  ;;  %2054 = vrot.lane.b32.xlu1 %v2024_v60, %s2537_s10  ;;  %v2032_v37 = vadd.f32 %v2031_v30, %v2024_v60 }
0x18df   :  { %v523_v61 = vpop.permute.xlu1 %522  ;;  %1806 = vrot.lane.b32.xlu0 %v3064_v4, %s2536_s26 }
0x18e0   :  { %2121 = vst.msk [vmem:[%s3227_s4 + $0x2] sm:$0x3] %vm267_vm2, %v523_v61  ;;  %2065 = vrot.lane.b32.xlu1 %v2032_v37, %s2537_s10 }
0x18e3   :  { %v781_v11 = vpop.permute.xlu1 %780  ;;  %2070 = vrot.lane.b32.xlu0 %v2035_v45, %s2538_s28 }
0x18e4   :  { %2131 = vst.msk [vmem:[%s3227_s4 + $0x4] sm:$0x3] %vm267_vm2, %v781_v11 }
0x18e7   :  { %v1039_v16 = vpop.permute.xlu1 %1038 }
0x18e8   :  { %2141 = vst.msk [vmem:[%s3227_s4 + $0x6] sm:$0x3] %vm267_vm2, %v1039_v16 }
0x18eb   :  { %v1293_v4 = vpop.permute.xlu1 %1292 }
0x18ec   :  { %2151 = vst.msk [vmem:[%s3227_s4 + $0x8] sm:$0x3] %vm267_vm2, %v1293_v4 }
0x18ef   :  { %v1547_v9 = vpop.permute.xlu1 %1546 }
0x18f0   :  { %2161 = vst.msk [vmem:[%s3227_s4 + $0xa] sm:$0x3] %vm267_vm2, %v1547_v9 }
0x18f3   :  { %v1801_v19 = vpop.permute.xlu1 %1800 }
0x18f4   :  { %2171 = vst.msk [vmem:[%s3227_s4 + $0xc] sm:$0x3] %vm267_vm2, %v1801_v19 }
0x1935   :  { %v2014_v0 = vpop.permute.xlu0 %2013 }
0x1936   :  { %v2016_v7 = vmul.f32 %v3097_v52, %v2014_v0 }
0x1938   :  { %v2041_v3 = vmul.f32 %v2039_v57, %v2016_v7 }
0x1939   :  { %v271_v22 = vpop.permute.xlu0 %270 }
0x193a   :  { %v2049_v12 = vadd.f32 %v2048_v21, %v2041_v3  ;;  %2112 = vst.msk [vmem:[%s3228_s5 + $0xe] sm:$0x3] %vm267_vm2, %v271_v22  ;;  %2060 = vrot.lane.b32.xlu0 %v2041_v3, %s2536_s26 }
0x193c   :  { %2075 = vrot.lane.b32.xlu1 %v2049_v12, %s2536_s26 }
0x193d   :  { %v529_v13 = vpop.permute.xlu0 %528 }
0x193e   :  { %2122 = vst.msk [vmem:[%s3228_s5 + $0xc] sm:$0x3] %vm267_vm2, %v529_v13  ;;  %2080 = vrot.lane.b32.xlu0 %v2052_v26, %s2539_s21 }
0x1941   :  { %v787_v10 = vpop.permute.xlu0 %786 }
0x1942   :  { %2132 = vst.msk [vmem:[%s3228_s5 + $0xa] sm:$0x3] %vm267_vm2, %v787_v10 }
0x1945   :  { %v1045_v14 = vpop.permute.xlu0 %1044 }
0x1946   :  { %2142 = vst.msk [vmem:[%s3228_s5 + $0x8] sm:$0x3] %vm267_vm2, %v1045_v14 }
0x1949   :  { %v1299_v17 = vpop.permute.xlu0 %1298 }
0x194a   :  { %2152 = vst.msk [vmem:[%s3228_s5 + $0x6] sm:$0x3] %vm267_vm2, %v1299_v17 }
0x194d   :  { %v1553_v24 = vpop.permute.xlu0 %1552 }
0x194e   :  { %2162 = vst.msk [vmem:[%s3228_s5 + $0x4] sm:$0x3] %vm267_vm2, %v1553_v24  ;;  %v2055_v25 = vpop.permute.xlu1 %2054 }
0x194f   :  { %2179 = vst.msk [vmem:[%s3227_s4 + $0xe] sm:$0x3] %vm267_vm2, %v2055_v25 }
0x1951   :  { %v1807_v27 = vpop.permute.xlu0 %1806 }
0x1952   :  { %2172 = vst.msk [vmem:[%s3228_s5 + $0x2] sm:$0x3] %vm267_vm2, %v1807_v27  ;;  %v2066_v34 = vpop.permute.xlu1 %2065 }
0x1953   :  { %2068 = vst.msk [vmem:[%s3229_s6] sm:$0x3] %vm267_vm2, %v2066_v34 }
0x1955   :  { %v2071_v35 = vpop.permute.xlu0 %2070 }
0x1956   :  { %2073 = vst.msk [vmem:[%s3230_s7] sm:$0x3] %vm267_vm2, %v2071_v35 }
0x19ac   :  { %v2061_v36 = vpop.permute.xlu0 %2060 }
0x19ad   :  { %2063 = vst.msk [vmem:[%s3228_s5] sm:$0x3] %vm267_vm2, %v2061_v36 }
0x19ae   :  { %v2076_v39 = vpop.permute.xlu1 %2075 }
0x19af   :  { %2078 = vst.msk [vmem:[%s3231_s8] sm:$0x3] %vm267_vm2, %v2076_v39 }
0x19b0   :  { %v2081_v31 = vpop.permute.xlu0 %2080 }
0x19b1   :  { %2083 = vst.msk [vmem:[%s3232_s9] sm:$0x3] %vm267_vm2, %v2081_v31 }

// kernel: _forward_core.12
= control target key start
LH: loop header
LB: loop body
LE: loop exit
PB: predicated region body
PF: predicated region fallthrough
CT: control target
= control target key end

     0   :  { %13 = vsyncpa [#allocation3], 0  ;;  %v786_v3 = vmov 0.0|0.0   ;;  %vm787_vm0 = vmmov 0   ;;  %v788_v6 = vmov 0.0   ;;  %s986_s0 = inlined_call_operand.vmem [shape: f32[4,2,128], index: 0, kind: input, shape index: {}]   ;;  %s987_s1 = inlined_call_operand.vmem [shape: f32[4,2,1], index: 1, kind: input, shape index: {}]   ;;  %s988_s2 = inlined_call_operand.vmem [shape: f32[32,128], index: 2, kind: input, shape index: {}]   ;;  %s989_s3 = inlined_call_operand.vmem [shape: f32[2,32], index: 3, kind: input, shape index: {}]   ;;  %s990_s4 = inlined_call_operand.vmem [shape: f32[2,32], index: 4, kind: input, shape index: {}]   ;;  %s991_s5 = inlined_call_operand.vmem [shape: f32[4,2,32], index: 5, kind: output, shape index: {0}]   ;;  %s992_s6 = inlined_call_operand.hbm [shape: f32[2,32], index: 6, kind: output, shape index: {1}]   ;;  %s993_s7 = inlined_call_operand.hbm [shape: f32[2,32], index: 7, kind: output, shape index: {2}]  }
   0x1   :  { %v25_v0 = vld [vmem:[%s988_s2] sm:$0xff]  ;;  %v26_v1 = vld [vmem:[%s988_s2 + $0x8] sm:$0xff]  ;;  %v27_v2 = vld [vmem:[%s988_s2 + $0x10] sm:$0xff]  ;;  %671 = vmatprep.subr.bf16.mxu0 %v786_v3  ;;  %635 = vmatprep.mubr.msk.f32.mxu0 %vm787_vm0, %v788_v6 }
   0x2   :  { %v845_v4 = vpack.c.bf16 %v26_v1, %v25_v0  ;;  %v28_v5 = vld [vmem:[%s988_s2 + $0x18] sm:$0xff]  ;;  %677 = vmatprep.subr.bf16.mxu1 %v786_v3  ;;  %646 = vmatprep.mubr.msk.f32.mxu1 %vm787_vm0, %v788_v6 }
   0x3   :  { %14 = vsyncpa [#allocation5], 0  ;;  %v856_v7 = vpack.c.bf16 %v28_v5, %v27_v2  ;;  %v29_v8 = vld [vmem:[%s989_s3] sm:$0x3]  ;;  %vm32_vm1 = vcmask 261120   ;;  %v789_v9 = vmov 0  }
   0x4   :  { %673 = vmatpush3.bf16.msra.mxu0 %v845_v4  ;;  %679 = vmatpush3.bf16.msra.mxu1 %v845_v4  ;;  %v31_v10 = vld [vmem:[%s986_s0] sm:$0x3]  ;;  %s790_s11 = smov 32   ;;  %v595_v38 = vld [vmem:[%s987_s1 + $0x2] sm:$0x3]  ;;  %vm165_vm2 = vcmask 254976  }
   0x5   :  { %674 = vmatprep.subr.bf16.mxu0 %v786_v3  ;;  %680 = vmatprep.subr.bf16.mxu1 %v786_v3  ;;  %v30_v15 = vld [vmem:[%s990_s4] sm:$0x3]  ;;  %s791_s4 = smov 64   ;;  %v592_v40 = vld [vmem:[%s986_s0 + $0x2] sm:$0x3]  ;;  %v277_v51 = vsub.f32 1.0, %v595_v38 }
   0x6   :  { %705 = vset.pattern.permute.xlu0 %v789_v9  ;;  %704 = vset.pattern.permute.xlu1 %v789_v9  ;;  %v135_v16 = vld [vmem:[%s987_s1] sm:$0x3]  ;;  %s792_s28 = smov 96   ;;  %s793_s29 = smov [#allocation4]  }
   0x7   :  { %v142_v23 = vsub.f32 1.0, %v135_v16  ;;  %s576_s30 = sshll.u32 %s793_s29, 4  ;;  %s577_s30 = int_to_ptr.vmem [resolvable:$true] %s576_s30 }
   0x8   :  { %676 = vmatpush3.bf16.msra.mxu0 %v856_v7  ;;  %682 = vmatpush3.bf16.msra.mxu1 %v856_v7  ;;  %s738_s8 = scalar_lea.vmem %s577_s30, 32  ;;  %p743_p1 = scmp.lt.s32.totalorder %s577_s30, %s577_s30 }
   0x9   :  { %683 = vmatprep.subr.bf16.mxu0 %v786_v3  ;;  %689 = vmatprep.subr.bf16.mxu1 %v786_v3  ;;  %p739_p0 = scmp.ne.s32.totalorder %s577_s30, %s738_s8  ;;  %p744_p2 = scmp.lt.s32.totalorder %s738_s8, %s738_s8 }
   0xb   :  { %636 = vmatmul.mubr.msk.f32.vlgmr.msra.gmra.mrb[0].mxu0 %vm32_vm1, %v29_v8  ;;  %p745_p3 = por %p744_p2, %p743_p1 }
   0xc   :  { %685 = vmatpush3.bf16.msra.mxu0 %v845_v4  ;;  %657 = vmatprep.mubr.msk.f32.mxu0 %vm787_vm0, %v788_v6 }
   0xd   :  { %686 = vmatprep.subr.bf16.mxu0 %v786_v3  ;;  %p746_p4 = pnand %p745_p3, %p739_p0 }
  0x10   :  { %688 = vmatpush3.bf16.msra.mxu0 %v856_v7 }
  0xde   :  { %v102_v11 = vpop.f32.mrb[0].mxu0 }
  0xdf   :  { %v106_v12 = vadd.f32 %v102_v11, %v31_v10  ;;  %v637_v13 = vpop.f32.mrb[1].mxu0 }
  0xe1   :  { %706 = vtanh.f32 %v106_v12  ;;  %v591_v17 = vmul.f32 -1.442695, %v106_v12 }
  0xe3   :  { %708 = vpow2.f32 %v591_v17 }
  0xeb   :  { %v707_v14 = vpop.eup %706 }
  0xec   :  { %120 = vrot.lane.b32.xlu0 %v707_v14, %s790_s11 }
  0xed   :  { %v709_v18 = vpop.eup %708 }
  0xee   :  { %v110_v19 = vadd.f32 1.0, %v709_v18 }
  0xf0   :  { %115 = vrot.lane.b32.xlu0 %v30_v15, %s790_s11  ;;  %710 = vrcp.f32 %v110_v19 }
  0xf4   :  { %138 = vperm.xlu0 %705, %v135_v16  }
  0xfa   :  { %v711_v20 = vpop.eup %710 }
 0x15e   :  { %v121_v21 = vpop.permute.xlu0 %120 }
 0x15f   :  { %v123_v22 = vmul.f32 %v711_v20, %v121_v21 }
 0x161   :  { %125 = vrot.lane.b32.xlu1 %v123_v22, %s790_s11 }
 0x162   :  { %v116_v24 = vpop.permute.xlu0 %115 }
 0x163   :  { %v118_v25 = vmul.f32 %v711_v20, %v116_v24 }
 0x165   :  { %145 = vperm.xlu1 %704, %v142_v23  }
 0x173   :  { %v139_v33 = vpop.permute.xlu0 %138 }
 0x1d3   :  { %v126_v26 = vpop.permute.xlu1 %125 }
 0x1d4   :  { %v128_v27 = vadd.f32 %v126_v26, %v118_v25 }
 0x1d6   :  { %712 = vtanh.f32 %v128_v27  ;;  %v154_v53 = vmul.f32 %v139_v33, %v128_v27 }
 0x1e0   :  { %v713_v28 = vpop.eup %712 }
 0x1e1   :  { %131 = vrot.lane.b32.xlu1 %v713_v28, %s790_s11 }
 0x1e4   :  { %v146_v29 = vpop.permute.xlu1 %145 }
 0x1e5   :  { %v148_v30 = vmul.f32 %v146_v29, %v29_v8  ;;  %v155_v37 = vmul.f32 %v146_v29, %v30_v15  ;;  %v600_v8 = vld [vmem:[%s987_s1 + $0x4] sm:$0x3] }
 0x1e6   :  { %v404_v15 = vsub.f32 1.0, %v600_v8 }
 0x1e7   :  { %150 = vrot.lane.b32.xlu1 %v148_v30, %s791_s4 }
 0x253   :  { %v132_v31 = vpop.permute.xlu1 %131 }
 0x254   :  { %v134_v32 = vmul.f32 %v711_v20, %v132_v31  ;;  %v602_v31 = vld [vmem:[%s986_s0 + $0x6] sm:$0x3] }
 0x256   :  { %v888_v34 = vmul.f32 %v139_v33, %v134_v32 }
 0x259   :  { %v151_v35 = vpop.permute.xlu1 %150 }
 0x25a   :  { %v153_v36 = vadd.f32 %v151_v35, %v888_v34 }
 0x25c   :  { %170 = vrot.lane.b32.xlu0 %v153_v36, %s791_s4 }
 0x260   :  { %157 = vrot.lane.b32.xlu0 %v155_v37, %s790_s11  ;;  %v605_v37 = vld [vmem:[%s987_s1 + $0x6] sm:$0x3] }
 0x264   :  { %273 = vperm.xlu0 %705, %v595_v38  }
 0x2ce   :  { %v171_v39 = vpop.permute.xlu0 %170 }
 0x2cf   :  { %647 = vmatmul.mubr.msk.f32.vlgmr.msra.gmra.mrb[0].mxu1 %vm32_vm1, %v171_v39 }
 0x2d0   :  { %691 = vmatpush3.bf16.msra.mxu1 %v845_v4  ;;  %668 = vmatprep.mubr.msk.f32.mxu1 %vm787_vm0, %v788_v6 }
 0x2d1   :  { %692 = vmatprep.subr.bf16.mxu1 %v786_v3  ;;  %v597_v3 = vld [vmem:[%s986_s0 + $0x4] sm:$0x3] }
 0x2d2   :  { %v158_v52 = vpop.permute.xlu0 %157 }
 0x2d3   :  { %v160_v54 = vadd.f32 %v158_v52, %v154_v53 }
 0x2d4   :  { %694 = vmatpush3.bf16.msra.mxu1 %v856_v7 }
 0x2e3   :  { %v274_v59 = vpop.permute.xlu0 %273 }
 0x3a2   :  { %v240_v41 = vpop.f32.mrb[0].mxu1 }
 0x3a3   :  { %v244_v42 = vadd.f32 %v592_v40, %v240_v41  ;;  %v648_v43 = vpop.f32.mrb[1].mxu1 }
 0x3a5   :  { %714 = vtanh.f32 %v244_v42  ;;  %v594_v45 = vmul.f32 -1.442695, %v244_v42 }
 0x3a7   :  { %716 = vpow2.f32 %v594_v45 }
 0x3af   :  { %v715_v44 = vpop.eup %714 }
 0x3b0   :  { %254 = vrot.lane.b32.xlu1 %v715_v44, %s790_s11  ;;  %v531_v44 = vsub.f32 1.0, %v605_v37 }
 0x3b1   :  { %v717_v46 = vpop.eup %716 }
 0x3b2   :  { %v248_v47 = vadd.f32 1.0, %v717_v46 }
 0x3b4   :  { %718 = vrcp.f32 %v248_v47 }
 0x3be   :  { %v719_v48 = vpop.eup %718 }
 0x3bf   :  { %v252_v55 = vmul.f32 %v719_v48, %v160_v54 }
 0x422   :  { %v255_v49 = vpop.permute.xlu1 %254 }
 0x423   :  { %v257_v50 = vmul.f32 %v719_v48, %v255_v49 }
 0x425   :  { %259 = vrot.lane.b32.xlu1 %v257_v50, %s790_s11 }
 0x429   :  { %280 = vperm.xlu1 %704, %v277_v51  }
 0x497   :  { %v260_v56 = vpop.permute.xlu1 %259 }
 0x498   :  { %v262_v57 = vadd.f32 %v260_v56, %v252_v55 }
 0x49a   :  { %720 = vtanh.f32 %v262_v57  ;;  %v285_v17 = vmul.f32 %v274_v59, %v262_v57 }
 0x4a4   :  { %v721_v58 = vpop.eup %720 }
 0x4a5   :  { %265 = vrot.lane.b32.xlu0 %v721_v58, %s790_s11 }
 0x4a8   :  { %v281_v60 = vpop.permute.xlu1 %280 }
 0x4a9   :  { %v283_v63 = vmul.f32 %v281_v60, %v153_v36  ;;  %v286_v16 = vmul.f32 %v281_v60, %v160_v54 }
 0x4ab   :  { %v287_v18 = vadd.f32 %v286_v16, %v285_v17 }
 0x517   :  { %v266_v61 = vpop.permute.xlu0 %265 }
 0x518   :  { %v268_v62 = vmul.f32 %v719_v48, %v266_v61 }
 0x51a   :  { %v908_v0 = vmul.f32 %v274_v59, %v268_v62 }
 0x51c   :  { %v284_v1 = vadd.f32 %v283_v63, %v908_v0 }
 0x51e   :  { %297 = vrot.lane.b32.xlu1 %v284_v1, %s791_s4 }
 0x590   :  { %v298_v2 = vpop.permute.xlu1 %297 }
 0x591   :  { %658 = vmatmul.mubr.msk.f32.vlgmr.msra.gmra.mrb[2].mxu0 %vm32_vm1, %v298_v2 }
 0x664   :  { %v367_v4 = vpop.f32.mrb[2].mxu0 }
 0x665   :  { %v371_v5 = vadd.f32 %v597_v3, %v367_v4  ;;  %v659_v6 = vpop.f32.mrb[3].mxu0 }
 0x667   :  { %722 = vtanh.f32 %v371_v5  ;;  %v599_v9 = vmul.f32 -1.442695, %v371_v5 }
 0x669   :  { %724 = vpow2.f32 %v599_v9 }
 0x671   :  { %v723_v7 = vpop.eup %722 }
 0x672   :  { %381 = vrot.lane.b32.xlu0 %v723_v7, %s790_s11 }
 0x673   :  { %v725_v10 = vpop.eup %724 }
 0x674   :  { %v375_v11 = vadd.f32 1.0, %v725_v10 }
 0x676   :  { %400 = vperm.xlu0 %705, %v600_v8   ;;  %726 = vrcp.f32 %v375_v11 }
 0x680   :  { %v727_v12 = vpop.eup %726 }
 0x681   :  { %v379_v19 = vmul.f32 %v727_v12, %v287_v18 }
 0x6e4   :  { %v382_v13 = vpop.permute.xlu0 %381 }
 0x6e5   :  { %v384_v14 = vmul.f32 %v727_v12, %v382_v13 }
 0x6e7   :  { %386 = vrot.lane.b32.xlu1 %v384_v14, %s790_s11 }
 0x6eb   :  { %407 = vperm.xlu1 %704, %v404_v15  }
 0x6f5   :  { %v401_v23 = vpop.permute.xlu0 %400 }
 0x759   :  { %v387_v20 = vpop.permute.xlu1 %386 }
 0x75a   :  { %v389_v21 = vadd.f32 %v387_v20, %v379_v19 }
 0x75c   :  { %728 = vtanh.f32 %v389_v21  ;;  %v412_v46 = vmul.f32 %v401_v23, %v389_v21 }
 0x766   :  { %v729_v22 = vpop.eup %728 }
 0x767   :  { %392 = vrot.lane.b32.xlu0 %v729_v22, %s790_s11 }
 0x76a   :  { %v408_v24 = vpop.permute.xlu1 %407 }
 0x76b   :  { %v410_v27 = vmul.f32 %v408_v24, %v284_v1  ;;  %v413_v45 = vmul.f32 %v408_v24, %v287_v18 }
 0x76d   :  { %v414_v47 = vadd.f32 %v413_v45, %v412_v46 }
 0x7d9   :  { %v393_v25 = vpop.permute.xlu0 %392 }
 0x7da   :  { %v395_v26 = vmul.f32 %v727_v12, %v393_v25 }
 0x7dc   :  { %v922_v28 = vmul.f32 %v401_v23, %v395_v26 }
 0x7de   :  { %v411_v29 = vadd.f32 %v410_v27, %v922_v28 }
 0x7e0   :  { %424 = vrot.lane.b32.xlu1 %v411_v29, %s791_s4 }
 0x852   :  { %v425_v30 = vpop.permute.xlu1 %424 }
 0x853   :  { %669 = vmatmul.mubr.msk.f32.vlgmr.msra.gmra.mrb[2].mxu1 %vm32_vm1, %v425_v30 }
 0x926   :  { %v494_v32 = vpop.f32.mrb[2].mxu1 }
 0x927   :  { %v498_v33 = vadd.f32 %v602_v31, %v494_v32  ;;  %v670_v35 = vpop.f32.mrb[3].mxu1 }
 0x929   :  { %730 = vtanh.f32 %v498_v33  ;;  %v604_v38 = vmul.f32 -1.442695, %v498_v33 }
 0x92b   :  { %732 = vpow2.f32 %v604_v38 }
 0x933   :  { %v731_v36 = vpop.eup %730 }
 0x934   :  { %508 = vrot.lane.b32.xlu0 %v731_v36, %s790_s11 }
 0x935   :  { %v733_v39 = vpop.eup %732 }
 0x936   :  { %v502_v40 = vadd.f32 1.0, %v733_v39 }
 0x938   :  { %527 = vperm.xlu0 %705, %v605_v37   ;;  %734 = vrcp.f32 %v502_v40 }
 0x942   :  { %v735_v41 = vpop.eup %734 }
 0x943   :  { %v506_v48 = vmul.f32 %v735_v41, %v414_v47 }
 0x9a6   :  { %v509_v42 = vpop.permute.xlu0 %508 }
 0x9a7   :  { %v511_v43 = vmul.f32 %v735_v41, %v509_v42 }
 0x9a9   :  { %513 = vrot.lane.b32.xlu1 %v511_v43, %s790_s11 }
 0x9ad   :  { %534 = vperm.xlu1 %704, %v531_v44  }
 0x9b1   :  { %162 = vrot.lane.b32.xlu1 %v888_v34, %s791_s4 }
 0x9b7   :  { %v528_v52 = vpop.permute.xlu0 %527 }
 0xa1b   :  { %v514_v49 = vpop.permute.xlu1 %513 }
 0xa1c   :  { %v516_v50 = vadd.f32 %v514_v49, %v506_v48 }
 0xa1e   :  { %736 = vtanh.f32 %v516_v50  ;;  %v539_v54 = vmul.f32 %v528_v52, %v516_v50 }
 0xa28   :  { %v737_v51 = vpop.eup %736 }
 0xa29   :  { %519 = vrot.lane.b32.xlu0 %v737_v51, %s790_s11 }
 0xa2c   :  { %v535_v53 = vpop.permute.xlu1 %534 }
 0xa2d   :  { %v540_v55 = vmul.f32 %v535_v53, %v414_v47  ;;  %v537_v59 = vmul.f32 %v535_v53, %v411_v29 }
 0xa2f   :  { %v541_v56 = vadd.f32 %v540_v55, %v539_v54 }
 0xa30   :  { %v163_v57 = vpop.permute.xlu1 %162 }
 0xa31   :  { %166 = vst.msk [vmem:[%s991_s5] sm:$0x3] %vm165_vm2, %v163_v57  ;;  %554 = vrot.lane.b32.xlu0 %v541_v56, %s792_s28 }
 0xa35   :  { %289 = vrot.lane.b32.xlu0 %v908_v0, %s791_s4 }
 0xa9b   :  { %v520_v34 = vpop.permute.xlu0 %519 }
 0xa9c   :  { %v522_v58 = vmul.f32 %v735_v41, %v520_v34 }
 0xa9e   :  { %v530_v60 = vmul.f32 %v528_v52, %v522_v58 }
 0xaa0   :  { %543 = vrot.lane.b32.xlu0 %v530_v60, %s791_s4  ;;  %v538_v61 = vadd.f32 %v537_v59, %v530_v60 }
 0xaa2   :  { %549 = vrot.lane.b32.xlu1 %v538_v61, %s791_s4 }
 0xaa3   :  { %v555_v62 = vpop.permute.xlu0 %554 }
 0xaa4   :  { %557 = vst.msk [vmem:[#allocation4] sm:$0x3] %vm165_vm2, %v555_v62 }
 0xaa5   :  { %749 = shalt.err (!%p746_p4)
}
 0xaa6   :  { %s750_s3 = scalar_lea.hbm %s993_s7, 32 }
 0xaa7   :  { %p751_p5 = scmp.ne.s32.totalorder %s993_s7, %s750_s3  ;;  %p754_p6 = scmp.lt.u32.totalorder %s750_s3, %s993_s7 }
 0xaa9   :  { %p756_p7 = pnand %p754_p6, %p751_p5 }
 0xaab   :  { %759 = shalt.err (!%p756_p7)
}
 0xaac   :  { %579 = dma.vmem_to_hbm [thread:$0]  %s577_s30, 32, %s993_s7, [#allocation5]   ;;  %416 = vrot.lane.b32.xlu1 %v922_v28, %s791_s4  ;;  %v290_v63 = vpop.permute.xlu0 %289 }
 0xaad   :  { %596 = vst.msk [vmem:[%s991_s5 + $0x2] sm:$0x3] %vm165_vm2, %v290_v63  ;;  %s794_s18 = smov [#allocation2]  }
 0xaae   :  { %s566_s19 = sshll.u32 %s794_s18, 4  ;;  %s567_s19 = int_to_ptr.vmem [resolvable:$true] %s566_s19 }
 0xaaf   :  { %s760_s7 = scalar_lea.vmem %s567_s19, 32  ;;  %p765_p9 = scmp.lt.s32.totalorder %s567_s19, %s567_s19 }
 0xab0   :  { %p761_p8 = scmp.ne.s32.totalorder %s567_s19, %s760_s7  ;;  %p766_p10 = scmp.lt.s32.totalorder %s760_s7, %s760_s7 }
 0xab2   :  { %p767_p11 = por %p766_p10, %p765_p9 }
 0xab4   :  { %p768_p12 = pnand %p767_p11, %p761_p8 }
 0xb12   :  { %v544_v0 = vpop.permute.xlu0 %543 }
 0xb13   :  { %606 = vst.msk [vmem:[%s991_s5 + $0x6] sm:$0x3] %vm165_vm2, %v544_v0 }
 0xb14   :  { %v550_v1 = vpop.permute.xlu1 %549 }
 0xb15   :  { %552 = vst.msk [vmem:[#allocation2] sm:$0x3] %vm165_vm2, %v550_v1 }
 0xb16   :  { %771 = shalt.err (!%p768_p12)
}
 0xb17   :  { %s772_s23 = scalar_lea.hbm %s992_s6, 32 }
 0xb18   :  { %p773_p13 = scmp.ne.s32.totalorder %s992_s6, %s772_s23  ;;  %p776_p0 = scmp.lt.u32.totalorder %s772_s23, %s992_s6 }
 0xb1a   :  { %p778_p1 = pnand %p776_p0, %p773_p13 }
 0xb1c   :  { %781 = shalt.err (!%p778_p1)
}
 0xb1d   :  { %569 = dma.vmem_to_hbm [thread:$0]  %s567_s19, 32, %s992_s6, [#allocation3]  }
 0xb1e   :  { %v417_v2 = vpop.permute.xlu1 %416 }
 0xb1f   :  { %601 = vst.msk [vmem:[%s991_s5 + $0x4] sm:$0x3] %vm165_vm2, %v417_v2 }
 0xb20   :  { %782 = dma.done.wait [#allocation3], 32  }
 0xb21   :  { %783 = vsyncadd [#allocation3], 4294967264 }
 0xb22   :  { %784 = dma.done.wait [#allocation5], 32  }
 0xb23   :  { %785 = vsyncadd [#allocation5], 4294967264 }
 0xb24   :  { %588 = vsyncpa [#allocation3], 1 }
 0xb25   :  { %589 = vsyncpa [#allocation5], 1 }

// kernel: _forward_core.15
= control target key start
LH: loop header
LB: loop body
LE: loop exit
PB: predicated region body
PF: predicated region fallthrough
CT: control target
= control target key end

     0   :  { %15 = vsyncpa [#allocation5], 0  ;;  %s739_s0 = inlined_call_operand.vmem [shape: f32[16,32], index: 0, kind: input, shape index: {}]   ;;  %s740_s1 = inlined_call_operand.vmem [shape: f32[8,32], index: 1, kind: input, shape index: {}]   ;;  %s741_s2 = inlined_call_operand.vmem [shape: f32[32,32], index: 2, kind: input, shape index: {}]   ;;  %s742_s3 = inlined_call_operand.vmem [shape: f32[1,32], index: 3, kind: input, shape index: {}]   ;;  %s743_s4 = inlined_call_operand.vmem [shape: f32[32,32], index: 4, kind: input, shape index: {}]   ;;  %s744_s5 = inlined_call_operand.vmem [shape: f32[1,32], index: 5, kind: input, shape index: {}]   ;;  %s745_s6 = inlined_call_operand.vmem [shape: f32[1,1,32], index: 6, kind: input, shape index: {}]   ;;  %s746_s7 = inlined_call_operand.vmem [shape: s32[2], index: 7, kind: input, shape index: {}]   ;;  %s747_s8 = inlined_call_operand.<no memory space> [shape: f32[1], index: 8, kind: input, shape index: {}]   ;;  %s748_s9 = inlined_call_operand.hbm [shape: f32[2,4,8], index: 9, kind: output, shape index: {}]  }
   0x1   :  { %16 = vsyncpa [#allocation4], 0  ;;  %s37_s11 = sshll.u32 %s746_s7, 4  ;;  %s38_s11 = int_to_ptr.vmem [resolvable:$true] %s37_s11 }
   0x2   :  { %s542_s12 = scalar_lea.vmem %s38_s11, 16  ;;  %p547_p1 = scmp.lt.s32.totalorder %s38_s11, %s38_s11 }
   0x3   :  { %p543_p0 = scmp.ne.s32.totalorder %s38_s11, %s542_s12  ;;  %p548_p2 = scmp.lt.s32.totalorder %s542_s12, %s542_s12 }
   0x5   :  { %p549_p3 = por %p548_p2, %p547_p1 }
   0x7   :  { %p550_p4 = pnand %p549_p3, %p543_p0 }
   0x9   :  { %553 = shalt.err (!%p550_p4)
}
   0xa   :  { %s580_s13 = smov [#allocation3]  }
   0xb   :  { %40 = dma.vmem_to_smem %s38_s11, 16, %s580_s13, [#allocation5]  }
   0xc   :  { %576 = dma.done.wait [#allocation5], 16  }
   0xd   :  { %577 = vsyncadd [#allocation5], 4294967280 }
   0xe   :  { %46 = sfence }
   0xf   :  { %v143_v0 = vld [vmem:[%s743_s4] sm:$0xff]  ;;  %v144_v1 = vld [vmem:[%s743_s4 + $0x8] sm:$0xff]  ;;  %v581_v3 = vmov 0.0|0.0   ;;  %v145_v6 = vld [vmem:[%s743_s4 + $0x10] sm:$0xff]  ;;  %vm582_vm0 = vmmov 0   ;;  %v583_v8 = vmov 0.0   ;;  %v233_v17 = vlaneseq }
  0x10   :  { %v49_v2 = vld [vmem:[%s741_s2] sm:$0xff]  ;;  %512 = vmatprep.subr.bf16.mxu1 %v581_v3  ;;  %v513_v4 = vpack.c.bf16 %v144_v1, %v143_v0  ;;  %v50_v5 = vld [vmem:[%s741_s2 + $0x8] sm:$0xff]  ;;  %v146_v7 = vld [vmem:[%s743_s4 + $0x18] sm:$0xff]  ;;  %501 = vmatprep.mubr.msk.f32.mxu1 %vm582_vm0, %v583_v8  ;;  %vm60_vm1 = vcmask 261120   ;;  %v584_v21 = vmov 1966171168  }
  0x11   :  { %v504_v9 = vpack.c.bf16 %v50_v5, %v49_v2  ;;  %v51_v10 = vld [vmem:[%s741_s2 + $0x10] sm:$0xff]  ;;  %v52_v11 = vld [vmem:[%s741_s2 + $0x18] sm:$0xff]  ;;  %v516_v12 = vpack.c.bf16 %v146_v7, %v145_v6  ;;  %v47_v14 = vld [vmem:[%s739_s0] sm:$0xff]  ;;  %v234_v18 = vshrl.u32 %v233_v17, 7  ;;  %v677_v19 = vand.u32 127, %v233_v17  ;;  %s702_s16 = sld [smem:[#allocation3 + $0x1]] }
  0x12   :  { %514 = vmatpush3.bf16.msra.mxu1 %v513_v4  ;;  %v508_v13 = vpack.c.bf16 %v52_v11, %v51_v10  ;;  %490 = vmatprep.mubr.msk.f32.mxu0 %vm60_vm1, %v47_v14  ;;  %v142_v15 = vld [vmem:[%s740_s1] sm:$0xff]  ;;  %v48_v16 = vld [vmem:[%s739_s0 + $0x8] sm:$0xff]  ;;  %v231_v22 = vunpack.c.l.s4 %v584_v21  ;;  %vm334_vm2 = vcmask 1041409   ;;  %vm336_vm3 = vcmask 1042434  }
  0x13   :  { %515 = vmatprep.subr.bf16.mxu1 %v581_v3  ;;  %505 = vmatprep.subr.bf16.mxu0 %v504_v9  ;;  %v680_v20 = vsub.s32 %v677_v19, %v234_v18  ;;  %v467_v24 = vld [vmem:[%s744_s5] ss:$0 sm:$0xff]  ;;  %v256_v31 = vsub.s32 0, %v234_v18  ;;  %vm338_vm4 = vcmask 1043459   ;;  %vm342_vm6 = vcmask 60416  }
  0x14   :  { %507 = vmatpush3.bf16.msra.mxu0 %v504_v9  ;;  %v232_v23 = vunpack.c.0.s8 %v231_v22  ;;  %v464_v33 = vld [vmem:[%s742_s3] ss:$0 sm:$0xff] }
  0x15   :  { %509 = vmatprep.subr.bf16.mxu0 %v508_v13  ;;  %v469_v0 = vld [vmem:[%s745_s6] ss:$0 sm:$0xff]  ;;  %s311_s6 = sld [smem:[#allocation3]] }
  0x16   :  { %517 = vmatpush3.bf16.msra.mxu1 %v516_v12  ;;  %v235_v25 = vsub.s32 %v232_v23, %v234_v18 }
  0x18   :  { %511 = vmatpush3.bf16.msra.mxu0 %v508_v13 }
  0x19   :  { %502 = vmatmul.mubr.msk.f32.vlgmr.msra.gmra.mrb[0].mxu1 %vm60_vm1, %v142_v15 }
  0x1b   :  { %491 = vmatmul.mubr.msk.f32.vlgmr.msra.gmra.mrb[0].mxu0 %vm60_vm1, %v48_v16 }
  0xec   :  { %v223_v26 = vpop.f32.mrb[0].mxu1 }
  0xed   :  { %v224_v27 = vadd.f32 %v467_v24, %v223_v26  ;;  %v503_v28 = vpop.f32.mrb[1].mxu1 }
  0xee   :  { %v492_v29 = vpop.f32.mrb[0].mxu0 }
  0xef   :  { %v236_v30 = vrot.slane %v224_v27, %v235_v25  ;;  %v344_v32 = vcombine.high %v224_v27, %v224_v27  ;;  %v133_v34 = vpop.f32.mrb[1].mxu0  ;;  %v139_v44 = vadd.f32 %v492_v29, %v464_v33 }
  0xf0   :  { %v134_v38 = vadd.f32 %v464_v33, %v133_v34 }
  0xf1   :  { %v237_v35 = vcombine.high %v236_v30, %v236_v30  ;;  %v244_v36 = vrot.slane %v236_v30, %v235_v25  ;;  %v351_v37 = vrot.slane %v344_v32, %v235_v25  ;;  %v304_v30 = vstv %s747_s8  ;;  %s585_s8 = smov [#allocation6]  }
  0xf2   :  { %s452_s17 = sshll.u32 %s585_s8, 4  ;;  %s453_s17 = int_to_ptr.vmem [resolvable:$true] %s452_s17 }
  0xf3   :  { %v251_v39 = vrot.slane %v237_v35, %v235_v25  ;;  %v252_v40 = vcombine.high %v244_v36, %v244_v36  ;;  %v257_v41 = vrot.slane %v244_v36, %v256_v31  ;;  %v352_v42 = vcombine.high %v351_v37, %v351_v37  ;;  %s554_s7 = scalar_lea.vmem %s453_s17, 128  ;;  %p559_p6 = scmp.lt.s32.totalorder %s453_s17, %s453_s17 }
  0xf4   :  { %v359_v43 = vrot.slane %v351_v37, %v235_v25  ;;  %p555_p5 = scmp.ne.s32.totalorder %s453_s17, %s554_s7  ;;  %p560_p7 = scmp.lt.s32.totalorder %s554_s7, %s554_s7 }
  0xf5   :  { %v253_v45 = vcombine.high %v251_v39, %v251_v39  ;;  %v261_v46 = vrot.slane %v251_v39, %v256_v31  ;;  %v265_v47 = vrot.slane %v252_v40, %v256_v31  ;;  %v366_v48 = vrot.slane %v352_v42, %v235_v25 }
  0xf6   :  { %v367_v49 = vcombine.high %v359_v43, %v359_v43  ;;  %v372_v50 = vrot.slane %v359_v43, %v256_v31  ;;  %v274_v51 = vadd.f32 %v257_v41, %v134_v38  ;;  %v312_v41 = vstv %s311_s6  ;;  %p561_p8 = por %p560_p7, %p559_p6 }
  0xf7   :  { %v368_v52 = vcombine.high %v366_v48, %v366_v48  ;;  %v376_v53 = vrot.slane %v366_v48, %v256_v31  ;;  %v269_v54 = vrot.slane %v253_v45, %v256_v31  ;;  %v275_v55 = vadd.f32 %v261_v46, %v134_v38 }
  0xf8   :  { %v380_v56 = vrot.slane %v367_v49, %v256_v31  ;;  %v389_v57 = vadd.f32 %v372_v50, %v139_v44  ;;  %v276_v58 = vadd.f32 %v265_v47, %v134_v38  ;;  %526 = vtanh.f32 %v274_v51  ;;  %p562_p9 = pnand %p561_p8, %p555_p5 }
  0xf9   :  { %v384_v59 = vrot.slane %v368_v52, %v256_v31  ;;  %v390_v60 = vadd.f32 %v376_v53, %v139_v44  ;;  %v277_v61 = vadd.f32 %v269_v54, %v134_v38  ;;  %528 = vtanh.f32 %v275_v55 }
  0xfa   :  { %v391_v62 = vadd.f32 %v380_v56, %v139_v44  ;;  %530 = vtanh.f32 %v389_v57  ;;  %vm710_vm5 = vcmp.lt.s32.totalorder %v677_v19, %v312_v41  ;;  %v418_v50 = vstv %s702_s16 }
  0xfb   :  { %v392_v63 = vadd.f32 %v384_v59, %v139_v44  ;;  %532 = vtanh.f32 %v390_v60  ;;  %vm419_vm7 = vcmp.lt.s32.totalorder %v677_v19, %v418_v50 }
  0xfc   :  { %534 = vtanh.f32 %v391_v62 }
  0xfd   :  { %536 = vtanh.f32 %v276_v58 }
  0xfe   :  { %538 = vtanh.f32 %v277_v61 }
  0xff   :  { %540 = vtanh.f32 %v392_v63 }
 0x102   :  { %v527_v1 = vpop.eup %526 }
 0x103   :  { %v529_v2 = vpop.eup %528  ;;  %v288_v3 = vmul.f32 %v527_v1, %v469_v0 }
 0x104   :  { %v531_v4 = vpop.eup %530  ;;  %v289_v8 = vmul.f32 %v529_v2, %v469_v0 }
 0x105   :  { %v533_v5 = vpop.eup %532  ;;  %v292_v6 = vsel %vm60_vm1, %v288_v3, 0.0  ;;  %v397_v7 = vmul.f32 %v531_v4, %v469_v0 }
 0x106   :  { %293 = vadd.xlane.f32.xlu0 %v292_v6  ;;  %v535_v9 = vpop.eup %534  ;;  %v398_v11 = vmul.f32 %v533_v5, %v469_v0  ;;  %v295_v13 = vsel %vm60_vm1, %v289_v8, 0.0 }
 0x107   :  { %v401_v10 = vsel %vm60_vm1, %v397_v7, 0.0  ;;  %v537_v12 = vpop.eup %536  ;;  %v399_v17 = vmul.f32 %v535_v9, %v469_v0 }
 0x108   :  { %402 = vadd.xlane.f32.xlu1 %v401_v10  ;;  %v290_v14 = vmul.f32 %v537_v12, %v469_v0  ;;  %v539_v15 = vpop.eup %538  ;;  %v404_v16 = vsel %vm60_vm1, %v398_v11, 0.0 }
 0x109   :  { %v541_v18 = vpop.eup %540  ;;  %v291_v22 = vmul.f32 %v539_v15, %v469_v0  ;;  %v407_v23 = vsel %vm60_vm1, %v399_v17, 0.0 }
 0x10a   :  { %296 = vadd.xlane.f32.xlu0 %v295_v13  ;;  %v298_v21 = vsel %vm60_vm1, %v290_v14, 0.0  ;;  %v400_v24 = vmul.f32 %v541_v18, %v469_v0 }
 0x10b   :  { %v301_v25 = vsel %vm60_vm1, %v291_v22, 0.0 }
 0x10c   :  { %405 = vadd.xlane.f32.xlu1 %v404_v16  ;;  %v410_v26 = vsel %vm60_vm1, %v400_v24, 0.0 }
 0x10e   :  { %299 = vadd.xlane.f32.xlu0 %v298_v21 }
 0x110   :  { %408 = vadd.xlane.f32.xlu1 %v407_v23 }
 0x112   :  { %302 = vadd.xlane.f32.xlu0 %v301_v25 }
 0x114   :  { %411 = vadd.xlane.f32.xlu1 %v410_v26 }
 0x193   :  { %v294_v27 = vpop.xlane.xlu0 %293 }
 0x194   :  { %v305_v34 = vadd.f32 %v304_v30, %v294_v27 }
 0x195   :  { %v403_v28 = vpop.xlane.xlu1 %402 }
 0x196   :  { %v413_v38 = vadd.f32 %v403_v28, %v304_v30  ;;  %v321_v44 = vrot.slane %v305_v34, %v680_v20 }
 0x197   :  { %v297_v29 = vpop.xlane.xlu0 %296 }
 0x198   :  { %v306_v32 = vadd.f32 %v304_v30, %v297_v29  ;;  %v427_v51 = vrot.slane %v413_v38, %v680_v20 }
 0x199   :  { %v406_v31 = vpop.xlane.xlu1 %405 }
 0x19a   :  { %v414_v35 = vadd.f32 %v406_v31, %v304_v30  ;;  %v325_v39 = vrot.slane %v306_v32, %v680_v20 }
 0x19b   :  { %v300_v33 = vpop.xlane.xlu0 %299 }
 0x19c   :  { %v307_v36 = vadd.f32 %v304_v30, %v300_v33  ;;  %v431_v45 = vrot.slane %v414_v35, %v680_v20  ;;  %v335_v52 = vsel %vm334_vm2, %v325_v39, %v321_v44 }
 0x19d   :  { %v409_v37 = vpop.xlane.xlu1 %408 }
 0x19e   :  { %v415_v40 = vadd.f32 %v409_v37, %v304_v30  ;;  %v329_v42 = vrot.slane %v307_v36, %v680_v20  ;;  %v440_v56 = vsel %vm334_vm2, %v431_v45, %v427_v51 }
 0x19f   :  { %v303_v43 = vpop.xlane.xlu0 %302 }
 0x1a0   :  { %v308_v46 = vadd.f32 %v304_v30, %v303_v43  ;;  %v435_v47 = vrot.slane %v415_v40, %v680_v20  ;;  %v337_v55 = vsel %vm336_vm3, %v329_v42, %v335_v52 }
 0x1a1   :  { %v412_v48 = vpop.xlane.xlu1 %411 }
 0x1a2   :  { %v333_v53 = vrot.slane %v308_v46, %v680_v20  ;;  %v416_v54 = vadd.f32 %v412_v48, %v304_v30  ;;  %v441_v59 = vsel %vm336_vm3, %v435_v47, %v440_v56 }
 0x1a4   :  { %v339_v57 = vsel %vm338_vm4, %v333_v53, %v337_v55  ;;  %v439_v58 = vrot.slane %v416_v54, %v680_v20 }
 0x1a5   :  { %v341_v60 = vsel %vm710_vm5, %v339_v57, -100.0 }
 0x1a6   :  { %v442_v61 = vsel %vm338_vm4, %v439_v58, %v441_v59  ;;  %343 = vst.msk [vmem:[#allocation6] sm:$0xf] %vm342_vm6, %v341_v60 }
 0x1a7   :  { %v444_v62 = vsel %vm419_vm7, %v442_v61, -100.0 }
 0x1a8   :  { %446 = vst.msk [vmem:[#allocation6 + $0x4] sm:$0xf] %vm342_vm6, %v444_v62 }
 0x1a9   :  { %565 = shalt.err (!%p562_p9)
}
 0x1aa   :  { %s566_s20 = scalar_lea.hbm %s748_s9, 128 }
 0x1ab   :  { %p567_p10 = scmp.ne.s32.totalorder %s748_s9, %s566_s20  ;;  %p570_p11 = scmp.lt.u32.totalorder %s566_s20, %s748_s9 }
 0x1ad   :  { %p572_p12 = pnand %p570_p11, %p567_p10 }
 0x1af   :  { %575 = shalt.err (!%p572_p12)
}
 0x1b0   :  { %s586_s25 = smov 64   ;;  %s587_s26 = smov 4  }
 0x1b1   :  { %458 = dma.vmem_to_hbm [thread:$0]  %s453_s17, 128, %s748_s9, [#allocation4], %s586_s25, %s586_s25, %s587_s26  }
 0x1b2   :  { %578 = dma.done.wait [#allocation4], 128  }
 0x1b3   :  { %579 = vsyncadd [#allocation4], 4294967168 }
 0x1b4   :  { %462 = vsyncpa [#allocation4], 1 }
 0x1b5   :  { %463 = vsyncpa [#allocation5], 1 }

</bundles_post_ra>
